<compile_context>
chip_gen: v5e
topology: v5e:2x2
jax: 0.10.0
libtpu: 0.0.40
codegen_flags: <defaults>
</compile_context>

<pallas_src>
import jax
import jax.numpy as jnp
from jax.experimental import pallas as pl
from jax.experimental.pallas import tpu as pltpu

# --- model dimensions (resnet18 / embedding / binary / att config) -----------
N_INSTANCES = 8      # bag size (patches per WSI bag); multiple of 8 (sublanes)
FC_FEAT_IN  = 512    # fc_input_features for resnet18
E           = 128    # embedding size (== L); exactly one lane tile
D           = 64     # attention hidden size
K           = 1      # N_CLASSES (binary)
HEAD_W      = 2 * E  # fused matmul width: [embedding | fc+attention head]
PACK_W      = 128    # lane-dense per-bag packed output row

BAGS_PER_TILE = 16   # 16 bags * 8 instances = 128 LHS rows per grid step
                     # (fills a v5e MXU pass; 32 is the sweet spot on v6e/v7x)

# packed-output lane layout (per bag)
FCN_LO    = 0                 # lanes 0..7  : output_fcn per instance
A_LO      = N_INSTANCES       # lanes 8..15 : attention weights A per instance
POOL_LANE = 2 * N_INSTANCES   # lane 16     : output_pool


def _make_kernel(bags_per_tile):
    n = N_INSTANCES

    def mil_kernel(feats_ref, w_fused_ref, misc_ref, feat_out_ref, packed_ref):
        # misc layout, (8, 256) f32:
        #   row 0            : fused bias  [b_emb | b_fc, b_a1, 0...] (256)
        #   row 1, lanes 129..192 : w_a2 (attention output weight), aligned with
        #                           head columns (zeros elsewhere)
        #   row 2, lane 0    : b_a2
        b_fused  = misc_ref[0:1, :]               # (1, 256)
        w_a2_row = misc_ref[1:2, E:HEAD_W]        # (1, 128), zeros outside 1..D
        b_a2     = misc_ref[2:3, 0:1]             # (1, 1)

        # One fused MXU matmul covers
        #   embedding    = Linear(F -> E)        (cols 0..127)
        #   embedding_fc = Linear(E -> 1)        (col 128)
        #   attention[0] = Linear(E -> D)        (cols 129..192)
        # dropout(p=0.2) -> identity (inference), so the fold is exact.
        feats = feats_ref[...].astype(jnp.bfloat16)              # (tile_m, F)
        fused = jnp.dot(feats, w_fused_ref[...],
                        preferred_element_type=jnp.float32) + b_fused  # (tile_m, 256)

        emb = fused[:, 0:E]                                      # features_to_return
        feat_out_ref[...] = emb

        head = fused[:, E:HEAD_W]                                # (tile_m, 128)

        # binary task, N_CLASSES == 1 -> sigmoid.
        # (torch.clamp(sigmoid, -10, 10) is a no-op: range (0,1).)
        out_fcn = jax.nn.sigmoid(head[:, 0:1])                   # (tile_m, 1)

        # attention tail: tanh then Linear(D -> 1) as VPU mul + lane reduction.
        # tanh also hits col 0 (fc logit) and padding cols 65..127 -- harmless
        # because w_a2_row is zero there (invariant kept by pack_params).
        t = jnp.tanh(head)                                       # (tile_m, 128)
        a_logits = jnp.sum(t * w_a2_row, axis=-1, keepdims=True) + b_a2  # (tile_m, 1)

        # Per-bag (8-instance) groups live in consecutive sublanes: view as
        # (bags, 8, 1) and reduce over axis 1 (cheap sublane-group reductions).
        fcn3 = out_fcn.reshape(bags_per_tile, n, 1)
        a3   = a_logits.reshape(bags_per_tile, n, 1)

        # F.softmax(A, dim=0): softmax over the bag dimension.
        a_max  = jnp.max(a3, axis=1, keepdims=True)
        a_exp  = jnp.exp(a3 - a_max)
        a_soft = a_exp / jnp.sum(a_exp, axis=1, keepdims=True)   # (bags, 8, 1)

        # attention pooling: sum(out_fcn * A) / sum(A); sum(A) == 1 after softmax
        # and the final clamp of a value in (0,1) is a no-op, so both dropped.
        pool = jnp.sum(fcn3 * a_soft, axis=1, keepdims=True)     # (bags, 1, 1)

        # Pack the per-bag results into one lane-dense (bags, 128) row each:
        # lanes 0..7 = output_fcn, 8..15 = A, 16 = output_pool.
        lane = jax.lax.broadcasted_iota(jnp.int32, (bags_per_tile, n, PACK_W), 2)
        inst = jax.lax.broadcasted_iota(jnp.int32, (bags_per_tile, n, PACK_W), 1)
        packed = jnp.where(lane == inst + FCN_LO, fcn3, 0.0)
        packed = jnp.where(lane == inst + A_LO, a_soft, packed)
        packed = jnp.where((lane == POOL_LANE) & (inst == 0), pool, packed)
        packed_ref[...] = jnp.sum(packed, axis=1)                # (bags, 128)

    return mil_kernel


def pack_params(params):
    """Fold the 4 Linear layers into one (512,256) bf16 RHS + one (8,256) misc tile."""
    # head weight over the embedding: col 0 = embedding_fc, cols 1..D = attention[0]
    w_head = jnp.zeros((E, E), jnp.float32)
    w_head = w_head.at[:, 0:K].set(params["w_fc"])               # (E, 1)
    w_head = w_head.at[:, K:K + D].set(params["w_a1"])           # (E, D)
    b_head = jnp.zeros((E,), jnp.float32)
    b_head = b_head.at[0].set(params["b_fc"].reshape(()))
    b_head = b_head.at[K:K + D].set(params["b_a1"].reshape(D))

    # fold in f32, then quantize the fused weight to bf16 for the MXU.
    w_fused = jnp.concatenate(
        [params["w_emb"], params["w_emb"] @ w_head], axis=1)     # (512, 256)
    b_fused = jnp.concatenate(
        [params["b_emb"].reshape(E),
         params["b_emb"].reshape(E) @ w_head + b_head])          # (256,)

    misc = jnp.zeros((8, HEAD_W), jnp.float32)
    misc = misc.at[0, :].set(b_fused)
    misc = misc.at[1, E + K:E + K + D].set(params["w_a2"].reshape(D))
    misc = misc.at[2, 0].set(params["b_a2"].reshape(()))
    return w_fused.astype(jnp.bfloat16), misc


def mil_forward(conv_layers_out, params, *, bags_per_tile=BAGS_PER_TILE):
    """conv_layers_out: (B, N, FC_FEAT_IN) -- B bags of N precomputed features
    (ideally already bf16 from the backbone). Returns the per-bag PyTorch forward
    (output_pool (B,K), output_fcn (B,N,K), A (B,N,K), features (B,N,E)) batched
    over bags, with `bags_per_tile` bags processed per grid step.
    """
    B, n, f = conv_layers_out.shape
    assert n == N_INSTANCES and f == FC_FEAT_IN

    pad = (-B) % bags_per_tile
    if pad:
        conv_layers_out = jnp.concatenate(
            [conv_layers_out,
             jnp.zeros((pad, n, f), conv_layers_out.dtype)], axis=0)
    Bp = B + pad
    tile_m = bags_per_tile * n

    feats_flat = conv_layers_out.reshape(Bp * n, f)   # layout no-op
    w_fused, misc = pack_params(params)

    out_shapes = (
        jax.ShapeDtypeStruct((Bp * n, E), jnp.float32),      # features_to_return
        jax.ShapeDtypeStruct((Bp, PACK_W), jnp.float32),     # packed fcn / A / pool
    )
    grid_spec = pltpu.PrefetchScalarGridSpec(
        num_scalar_prefetch=0,
        grid=(Bp // bags_per_tile,),
        in_specs=[
            pl.BlockSpec((tile_m, FC_FEAT_IN), lambda i: (i, 0)),   # per-tile bags
            pl.BlockSpec((FC_FEAT_IN, HEAD_W), lambda i: (0, 0)),   # resident weights
            pl.BlockSpec((8, HEAD_W), lambda i: (0, 0)),            # resident misc
        ],
        out_specs=[
            pl.BlockSpec((tile_m, E), lambda i: (i, 0)),
            pl.BlockSpec((bags_per_tile, PACK_W), lambda i: (i, 0)),
        ],
    )
    feats_out, packed = pl.pallas_call(
        _make_kernel(bags_per_tile),
        out_shape=out_shapes,
        grid_spec=grid_spec,
        compiler_params=pltpu.CompilerParams(
            dimension_semantics=("parallel",)),   # shards bag tiles across v7x TCs
    )(feats_flat, w_fused, misc)

    feats_out = feats_out.reshape(Bp, n, E)[:B]
    packed = packed[:B]
    output_fcn  = packed[:, FCN_LO:FCN_LO + n].reshape(B, n, K)
    A           = packed[:, A_LO:A_LO + n].reshape(B, n, K)
    output_pool = packed[:, POOL_LANE:POOL_LANE + K]
    return output_pool, output_fcn, A, feats_out


def init_params(key):
    """Deterministic init mimicking torch.nn.Linear default U(-1/sqrt(fan_in), +)."""
    ks = jax.random.split(key, 8)

    def lin(kw, kb, fan_in, fan_out):
        bound = 1.0 / jnp.sqrt(float(fan_in))
        w = jax.random.uniform(kw, (fan_in, fan_out), jnp.float32, -bound, bound)
        b = jax.random.uniform(kb, (fan_out,), jnp.float32, -bound, bound)
        return w, b

    w_emb, b_emb = lin(ks[0], ks[1], FC_FEAT_IN, E)
    w_fc,  b_fc  = lin(ks[2], ks[3], E, K)
    w_a1,  b_a1  = lin(ks[4], ks[5], E, D)
    w_a2,  b_a2  = lin(ks[6], ks[7], D, K)
    return dict(w_emb=w_emb, b_emb=b_emb, w_fc=w_fc, b_fc=b_fc,
                w_a1=w_a1, b_a1=b_a1, w_a2=w_a2, b_a2=b_a2)


def ref_forward(feats_batched, params):
    """Pure-JAX f32 reference, faithful to the PyTorch forward (clamps, /A.sum())."""
    feats_batched = feats_batched.astype(jnp.float32)

    def one_bag(x):
        emb = x @ params["w_emb"] + params["b_emb"]
        logits = emb @ params["w_fc"] + params["b_fc"]
        out_fcn = jnp.clip(jax.nn.sigmoid(logits), -10.0, 10.0)
        h = jnp.tanh(emb @ params["w_a1"] + params["b_a1"])
        a = jax.nn.softmax(h @ params["w_a2"] + params["b_a2"], axis=0)
        pool = jnp.clip((out_fcn * a).sum(0) / a.sum(0), -10.0, 10.0)
        return pool, out_fcn, a, emb

    return jax.vmap(one_bag)(feats_batched)


if __name__ == "__main__":
    key = jax.random.PRNGKey(0)
    k_feat, k_param = jax.random.split(key)

    B = 64  # bags; grid = 4 steps of 16 bags (keeps both v7x TensorCores busy)
    # backbone features arrive in bf16 (dominant HBM stream halved at the source)
    conv_layers_out = jax.random.normal(
        k_feat, (B, N_INSTANCES, FC_FEAT_IN), jnp.float32).astype(jnp.bfloat16)
    params = init_params(k_param)

    fwd = jax.jit(mil_forward)
    output_pool, output_fcn, A, features = jax.block_until_ready(
        fwd(conv_layers_out, params))

    assert output_pool.shape == (B, K)
    assert output_fcn.shape == (B, N_INSTANCES, K)
    assert A.shape == (B, N_INSTANCES, K)
    assert features.shape == (B, N_INSTANCES, E)
    # attention weights softmax to 1 over the bag dimension
    assert jnp.allclose(jnp.sum(A, axis=1), 1.0, atol=1e-5)

    # compare against the f32 pure-JAX reference (kernel uses bf16 fused weights)
    r_pool, r_fcn, r_A, r_feats = ref_forward(conv_layers_out, params)
    assert jnp.allclose(output_pool, r_pool, atol=2e-2, rtol=2e-2)
    assert jnp.allclose(output_fcn, r_fcn, atol=2e-2, rtol=2e-2)
    assert jnp.allclose(A, r_A, atol=2e-2, rtol=2e-2)
    assert jnp.allclose(features, r_feats, atol=3e-2, rtol=3e-2)

    print("KERNEL_OK")
</pallas_src>

<mosaic_0001>
module attributes {stable_mosaic.version = 11 : i64} {
  func.func @mil_kernel(%arg0: i32, %arg1: memref<128x512xbf16, #tpu.memory_space<vmem>>, %arg2: memref<512x256xbf16, #tpu.memory_space<vmem>>, %arg3: memref<8x256xf32, #tpu.memory_space<vmem>>, %arg4: memref<128x128xf32, #tpu.memory_space<vmem>>, %arg5: memref<16x128xf32, #tpu.memory_space<vmem>>) attributes {dimension_semantics = [#tpu.dimension_semantics<parallel>], iteration_bounds = array<i64: 4>, scalar_prefetch = 0 : i64, scratch_operands = 0 : i64, tpu.core_type = #tpu.core_type<tc>, window_params = [{transform_indices = @transform_0, window_bounds = array<i64: 128, 512>}, {pipeline_mode = #tpu.pipeline_mode<synchronous>, transform_indices = @transform_1, window_bounds = array<i64: 512, 256>}, {pipeline_mode = #tpu.pipeline_mode<synchronous>, transform_indices = @transform_2, window_bounds = array<i64: 8, 256>}, {transform_indices = @transform_3, window_bounds = array<i64: 128, 128>}, {transform_indices = @transform_4, window_bounds = array<i64: 16, 128>}]} {
    %c0 = arith.constant 0 : index
    %c0_0 = arith.constant 0 : index
    %0 = vector.load %arg3[%c0, %c0_0] : memref<8x256xf32, #tpu.memory_space<vmem>>, vector<1x256xf32>
    %c1 = arith.constant 1 : index
    %c128 = arith.constant 128 : index
    %1 = vector.load %arg3[%c1, %c128] : memref<8x256xf32, #tpu.memory_space<vmem>>, vector<1x128xf32>
    %c2 = arith.constant 2 : index
    %c0_1 = arith.constant 0 : index
    %2 = vector.load %arg3[%c2, %c0_1] : memref<8x256xf32, #tpu.memory_space<vmem>>, vector<1x1xf32>
    %c0_2 = arith.constant 0 : index
    %c0_3 = arith.constant 0 : index
    %3 = vector.load %arg1[%c0_2, %c0_3] : memref<128x512xbf16, #tpu.memory_space<vmem>>, vector<128x512xbf16>
    %c0_4 = arith.constant 0 : index
    %c0_5 = arith.constant 0 : index
    %4 = vector.load %arg2[%c0_4, %c0_5] : memref<512x256xbf16, #tpu.memory_space<vmem>>, vector<512x256xbf16>
    %cst = arith.constant dense<0.000000e+00> : vector<128x256xf32>
    %5 = tpu.matmul %3, %4, %cst {dimension_numbers = #tpu.dot_dimension_numbers<[1], [0], [0], [1], [0, 0, 1, 1], [], []>} : vector<128x512xbf16>, vector<512x256xbf16>, vector<128x256xf32> -> vector<128x256xf32>
    %6 = vector.broadcast %0 : vector<1x256xf32> to vector<128x256xf32>
    %7 = arith.addf %5, %6 : vector<128x256xf32>
    %8 = vector.extract_strided_slice %7 {offsets = [0, 0], sizes = [128, 128], strides = [1, 1]} : vector<128x256xf32> to vector<128x128xf32>
    %c0_6 = arith.constant 0 : index
    %c0_7 = arith.constant 0 : index
    %9 = vector.load %arg4[%c0_6, %c0_7] : memref<128x128xf32, #tpu.memory_space<vmem>>, vector<128x128xf32>
    tpu.vector_store %arg4[%c0_6, %c0_7], %8 {strides = array<i32>} : memref<128x128xf32, #tpu.memory_space<vmem>>, vector<128x128xf32>,
    %10 = vector.extract_strided_slice %7 {offsets = [0, 128], sizes = [128, 128], strides = [1, 1]} : vector<128x256xf32> to vector<128x128xf32>
    %11 = vector.extract_strided_slice %10 {offsets = [0, 0], sizes = [128, 1], strides = [1, 1]} : vector<128x128xf32> to vector<128x1xf32>
    %12 = arith.negf %11 : vector<128x1xf32>
    %13 = math.exp %12 : vector<128x1xf32>
    %cst_8 = arith.constant 1.000000e+00 : f32
    %14 = vector.broadcast %cst_8 : f32 to vector<128x1xf32>
    %15 = arith.addf %14, %13 : vector<128x1xf32>
    %16 = arith.divf %14, %15 : vector<128x1xf32>
    %17 = math.tanh %10 : vector<128x128xf32>
    %18 = vector.broadcast %1 : vector<1x128xf32> to vector<128x128xf32>
    %19 = arith.mulf %17, %18 : vector<128x128xf32>
    %cst_9 = arith.constant dense<0.000000e+00> : vector<128xf32>
    %20 = vector.multi_reduction <add>, %19, %cst_9 [1] : vector<128x128xf32> to vector<128xf32>
    %21 = vector.shape_cast %20 : vector<128xf32> to vector<128x1xf32>
    %22 = vector.broadcast %2 : vector<1x1xf32> to vector<128x1xf32>
    %23 = arith.addf %21, %22 : vector<128x1xf32>
    %24 = vector.shape_cast %16 : vector<128x1xf32> to vector<16x8x1xf32>
    %25 = vector.shape_cast %23 : vector<128x1xf32> to vector<16x8x1xf32>
    %cst_10 = arith.constant dense<0xFF800000> : vector<16x1xf32>
    %26 = vector.multi_reduction <maximumf>, %25, %cst_10 [1] : vector<16x8x1xf32> to vector<16x1xf32>
    %27 = vector.shape_cast %26 : vector<16x1xf32> to vector<16x1x1xf32>
    %28 = vector.broadcast %27 : vector<16x1x1xf32> to vector<16x8x1xf32>
    %29 = arith.subf %25, %28 : vector<16x8x1xf32>
    %30 = math.exp %29 : vector<16x8x1xf32>
    %cst_11 = arith.constant dense<0.000000e+00> : vector<16x1xf32>
    %31 = vector.multi_reduction <add>, %30, %cst_11 [1] : vector<16x8x1xf32> to vector<16x1xf32>
    %32 = vector.shape_cast %31 : vector<16x1xf32> to vector<16x1x1xf32>
    %33 = vector.broadcast %32 : vector<16x1x1xf32> to vector<16x8x1xf32>
    %34 = arith.divf %30, %33 : vector<16x8x1xf32>
    %35 = arith.mulf %24, %34 : vector<16x8x1xf32>
    %cst_12 = arith.constant dense<0.000000e+00> : vector<16x1xf32>
    %36 = vector.multi_reduction <add>, %35, %cst_12 [1] : vector<16x8x1xf32> to vector<16x1xf32>
    %37 = vector.shape_cast %36 : vector<16x1xf32> to vector<16x1x1xf32>
    %38 = tpu.iota {dimensions = array<i32: 2>} : vector<16x8x128xi32>
    %39 = tpu.iota {dimensions = array<i32: 1>} : vector<16x8x128xi32>
    %c0_i32 = arith.constant 0 : i32
    %40 = vector.broadcast %c0_i32 : i32 to vector<16x8x128xi32>
    %41 = arith.addi %39, %40 : vector<16x8x128xi32>
    %42 = arith.cmpi eq, %38, %41 : vector<16x8x128xi32>
    %cst_13 = arith.constant 0.000000e+00 : f32
    %43 = vector.shape_cast %24 : vector<16x8x1xf32> to vector<16x8x1xf32>
    %44 = vector.broadcast %43 : vector<16x8x1xf32> to vector<16x8x128xf32>
    %45 = vector.broadcast %cst_13 : f32 to vector<16x8x128xf32>
    %46 = arith.select %42, %44, %45 : vector<16x8x128xi1>, vector<16x8x128xf32>
    %c8_i32 = arith.constant 8 : i32
    %47 = vector.broadcast %c8_i32 : i32 to vector<16x8x128xi32>
    %48 = arith.addi %39, %47 : vector<16x8x128xi32>
    %49 = arith.cmpi eq, %38, %48 : vector<16x8x128xi32>
    %50 = vector.shape_cast %34 : vector<16x8x1xf32> to vector<16x8x1xf32>
    %51 = vector.broadcast %50 : vector<16x8x1xf32> to vector<16x8x128xf32>
    %52 = arith.select %49, %51, %46 : vector<16x8x128xi1>, vector<16x8x128xf32>
    %c16_i32 = arith.constant 16 : i32
    %53 = vector.broadcast %c16_i32 : i32 to vector<16x8x128xi32>
    %54 = arith.cmpi eq, %38, %53 : vector<16x8x128xi32>
    %c0_i32_14 = arith.constant 0 : i32
    %55 = vector.broadcast %c0_i32_14 : i32 to vector<16x8x128xi32>
    %56 = arith.cmpi eq, %39, %55 : vector<16x8x128xi32>
    %57 = arith.andi %54, %56 : vector<16x8x128xi1>
    %58 = vector.shape_cast %37 : vector<16x1x1xf32> to vector<16x1x1xf32>
    %59 = vector.broadcast %58 : vector<16x1x1xf32> to vector<16x8x128xf32>
    %60 = arith.select %57, %59, %52 : vector<16x8x128xi1>, vector<16x8x128xf32>
    %cst_15 = arith.constant dense<0.000000e+00> : vector<16x128xf32>
    %61 = vector.multi_reduction <add>, %60, %cst_15 [1] : vector<16x8x128xf32> to vector<16x128xf32>
    %c0_16 = arith.constant 0 : index
    %c0_17 = arith.constant 0 : index
    %62 = vector.load %arg5[%c0_16, %c0_17] : memref<16x128xf32, #tpu.memory_space<vmem>>, vector<16x128xf32>
    tpu.vector_store %arg5[%c0_16, %c0_17], %61 {strides = array<i32>} : memref<16x128xf32, #tpu.memory_space<vmem>>, vector<16x128xf32>,
    return
  }
  func.func @transform_0(%arg0: i32) -> (i32, i32) {
    %c0_i32 = arith.constant 0 : i32
    %c0_i32_0 = arith.constant 0 : i32
    return %arg0, %c0_i32 : i32, i32
  }
  func.func @transform_1(%arg0: i32) -> (i32, i32) {
    %c0_i32 = arith.constant 0 : i32
    %c0_i32_0 = arith.constant 0 : i32
    %c0_i32_1 = arith.constant 0 : i32
    return %c0_i32, %c0_i32_0 : i32, i32
  }
  func.func @transform_2(%arg0: i32) -> (i32, i32) {
    %c0_i32 = arith.constant 0 : i32
    %c0_i32_0 = arith.constant 0 : i32
    %c0_i32_1 = arith.constant 0 : i32
    return %c0_i32, %c0_i32_0 : i32, i32
  }
  func.func @transform_3(%arg0: i32) -> (i32, i32) {
    %c0_i32 = arith.constant 0 : i32
    %c0_i32_0 = arith.constant 0 : i32
    return %arg0, %c0_i32 : i32, i32
  }
  func.func @transform_4(%arg0: i32) -> (i32, i32) {
    %c0_i32 = arith.constant 0 : i32
    %c0_i32_0 = arith.constant 0 : i32
    return %arg0, %c0_i32 : i32, i32
  }
}

</mosaic_0001>

<bundles_post_ra>
// kernel: mil_forward.1
= control target key start
LH: loop header
LB: loop body
LE: loop exit
PB: predicated region body
PF: predicated region fallthrough
CT: control target
= control target key end

     0   :  { %10 = vsyncpa [#allocation3], 0  ;;  %s5406_s0 = inlined_call_operand.vmem [shape: bf16[512,512], index: 0, kind: input, shape index: {}]   ;;  %s5407_s1 = inlined_call_operand.vmem [shape: bf16[512,256], index: 1, kind: input, shape index: {}]   ;;  %s5408_s2 = inlined_call_operand.vmem [shape: f32[8,256], index: 2, kind: input, shape index: {}]   ;;  %s5409_s3 = inlined_call_operand.hbm [shape: f32[512,128], index: 3, kind: output, shape index: {0}]   ;;  %s5410_s4 = inlined_call_operand.vmem [shape: f32[64,128], index: 4, kind: output, shape index: {1}]  }
   0x1   :  { %12 = vsyncpa [#allocation3 + $0x1], 0  ;;  %s3592_s15 = smov 0   ;;  %s3594_s16 = smov 0  }
   0x2   :  { %s3596_s17 = smov 0   ;;  %s3598_s18 = smov 0  }
   0x3 LB: > { %s3613_s19 = sadd.s32 4294967295, %s3562_s18   ;;  %s2780_s20 = sadd.s32 4294967294, %s3562_s18   ;;  %s3562_s18 = sphi %s3598_s18, %s5464_s18   ;;  %s3558_s17 = sphi %s3596_s17, %s5463_s17   ;;  %s3554_s16 = sphi %s3594_s16, %s5462_s16   ;;  %s3550_s15 = sphi %s3592_s15, %s5461_s15  }
   0x4   : > { %s3617_s21 = sadd.s32 1, %s3562_s18   ;;  %s93_s22 = sadd.s32 1, %s3558_s17 }
   0x5   : > { %s90_s23 = ssub.s32 %s3562_s18, %s3617_s21  ;;  %p103_p0 = scmp.ne.s32.totalorder %s3558_s17, %s3554_s16 }
   0x6   : > { %p91_p1 = scmp.eq.s32.totalorder %s90_s23, 0  ;;  %p104_p2 = scmp.eq.s32.totalorder %s3613_s19, 3 }
   0x7   : > { %p109_p3 = scmp.ne.s32.totalorder %s3554_s16, %s3550_s15  ;;  %p110_p4 = scmp.eq.s32.totalorder %s2780_s20, 3 }
   0x8   : > { %s3628_s24 = scalar_select %p91_p1, %s3558_s17, %s93_s22  }
   0x9   : > { %p3630_p5 = por %p104_p2, %p103_p0  ;;  %p3634_p6 = por %p110_p4, %p109_p3 }
   0xa   : > { %p2783_p7 = scmp.ge.s32.totalorder %s3562_s18, 1  ;;  %p170_p8 = scmp.lt.s32.totalorder %s3562_s18, 5 }
   0xc   : > { %p171_p9 = pnand %p2783_p7, %p170_p8 }
   0xd   : > { %s2785_s7 = sshll.u32 (!%p171_p9), %s3613_s19, 4  ;;  %s3292_s11 = sshll.u32 (!%p171_p9), %s3613_s19, 7 }
   0xe   : > { %174 = sbr.rel (%p171_p9) target bundleno = 939 (0x3ab), region = 32  ;;  %p203_p10 = scmp.lt.s32.totalorder (!%p171_p9), %s2785_s7, 63 }
   0xf   : > { %s2685_s20 = scalar_lea.hbm (!%p171_p9), %s5409_s3, %s3292_s11  ;;  %s3520_s5 = scalar_lea.hbm (!%p171_p9), %s5409_s3, 512 }
  0x10   : > { %s2688_s22 = sshll.u32 (!%p171_p9), %s2685_s20, 4  ;;  %s2689_s22 = int_to_ptr.hbm [resolvable:$true] %s2688_s22 }
  0x11   : > { %s3514_s29 = sshra.s32 (!%p171_p9), %s2689_s22, 4  ;;  %s3515_s29 = int_to_ptr.hbm [resolvable:$true] %s3514_s29 }
  0x12   : > { %s3516_s30 = scalar_lea.hbm (!%p171_p9), %s3515_s29, 128  ;;  %p3521_p0 = scmp.lt.s32.totalorder (!%p171_p9), %s3515_s29, %s5409_s3 }
  0x13   : > { %v2976_v0 = vld [vmem:[%s5407_s1 + $0x70] sm:$0xf]  ;;  %v3243_v1 = vld [vmem:[%s5407_s1 + $0x74] sm:$0xf0]  ;;  %v2968_v11 = vld [vmem:[%s5407_s1 + $0x60] sm:$0xf]  ;;  %p3517_p11 = scmp.ne.s32.totalorder %s3515_s29, %s3516_s30  ;;  %p3522_p1 = scmp.lt.s32.totalorder %s3520_s5, %s3516_s30 }
  0x14   : > { %v3040_v2 = vld [vmem:[%s5407_s1 + $0xf0] sm:$0xf]  ;;  %v2977_v3 = vor.u32 %v3243_v1, %v2976_v0  ;;  %v3259_v4 = vld [vmem:[%s5407_s1 + $0xf4] sm:$0xf0]  ;;  %v3241_v13 = vld [vmem:[%s5407_s1 + $0x64] sm:$0xf0] }
  0x15   : > { %v3104_v5 = vld [vmem:[%s5407_s1 + $0x170] sm:$0xf]  ;;  %v3275_v6 = vld [vmem:[%s5407_s1 + $0x174] sm:$0xf0]  ;;  %v3041_v7 = vor.u32 %v3259_v4, %v3040_v2  ;;  %v3032_v14 = vld [vmem:[%s5407_s1 + $0xe0] sm:$0xf]  ;;  %v2969_v16 = vor.u32 %v3241_v13, %v2968_v11  ;;  %p3518_p12 = pnand %p3517_p11, %p3630_p5  ;;  %p3523_p2 = por %p3522_p1, %p3521_p0 }
  0x16   : > { %v3105_v8 = vor.u32 %v3275_v6, %v3104_v5  ;;  %v3168_v9 = vld [vmem:[%s5407_s1 + $0x1f0] sm:$0xf]  ;;  %v3291_v10 = vld [vmem:[%s5407_s1 + $0x1f4] sm:$0xf0]  ;;  %800 = vmatpush.bf16.msra.mxu0 %v2977_v3  ;;  %v3257_v15 = vld [vmem:[%s5407_s1 + $0xe4] sm:$0xf0] }
  0x17   : > { %v3169_v12 = vor.u32 %v3291_v10, %v3168_v9  ;;  %849 = vmatpush.bf16.msra.mxu1 %v3041_v7  ;;  %v3033_v17 = vor.u32 %v3257_v15, %v3032_v14  ;;  %v3096_v18 = vld [vmem:[%s5407_s1 + $0x160] sm:$0xf]  ;;  %v3273_v19 = vld [vmem:[%s5407_s1 + $0x164] sm:$0xf0]  ;;  %v2960_v23 = vld [vmem:[%s5407_s1 + $0x50] sm:$0xf]  ;;  %p3519_p13 = pneg %p3518_p12 }
  0x18   : > { %898 = vmatpush.bf16.msra.mxu2 %v3105_v8  ;;  %v3160_v20 = vld [vmem:[%s5407_s1 + $0x1e0] sm:$0xf]  ;;  %v3097_v21 = vor.u32 %v3273_v19, %v3096_v18  ;;  %v3289_v22 = vld [vmem:[%s5407_s1 + $0x1e4] sm:$0xf0]  ;;  %v3239_v24 = vld [vmem:[%s5407_s1 + $0x54] sm:$0xf0] }
  0x19   : > { %947 = vmatpush.bf16.msra.mxu3 %v3169_v12  ;;  %v3161_v25 = vor.u32 %v3289_v22, %v3160_v20  ;;  %v3024_v26 = vld [vmem:[%s5407_s1 + $0xd0] sm:$0xf]  ;;  %v3255_v27 = vld [vmem:[%s5407_s1 + $0xd4] sm:$0xf0]  ;;  %v2961_v29 = vor.u32 %v3239_v24, %v2960_v23  ;;  %v2952_v35 = vld [vmem:[%s5407_s1 + $0x40] sm:$0xf]  ;;  %p3524_p3 = pnand %p3523_p2, %p3519_p13 }
  0x1a   : > { %v3088_v28 = vld [vmem:[%s5407_s1 + $0x150] sm:$0xf]  ;;  %801 = vmatpush.bf16.msra.mxu0 %v2969_v16  ;;  %v3271_v30 = vld [vmem:[%s5407_s1 + $0x154] sm:$0xf0]  ;;  %v3025_v33 = vor.u32 %v3255_v27, %v3024_v26  ;;  %v3237_v36 = vld [vmem:[%s5407_s1 + $0x44] sm:$0xf0] }
  0x1b   : > { %v3152_v31 = vld [vmem:[%s5407_s1 + $0x1d0] sm:$0xf]  ;;  %v3287_v32 = vld [vmem:[%s5407_s1 + $0x1d4] sm:$0xf0]  ;;  %850 = vmatpush.bf16.msra.mxu1 %v3033_v17  ;;  %v3089_v34 = vor.u32 %v3271_v30, %v3088_v28  ;;  %v3016_v37 = vld [vmem:[%s5407_s1 + $0xc0] sm:$0xf]  ;;  %v2953_v44 = vor.u32 %v3237_v36, %v2952_v35 }
  0x1c   : > { %899 = vmatpush.bf16.msra.mxu2 %v3097_v21  ;;  %v3153_v38 = vor.u32 %v3287_v32, %v3152_v31  ;;  %v3253_v39 = vld [vmem:[%s5407_s1 + $0xc4] sm:$0xf0]  ;;  %v3080_v40 = vld [vmem:[%s5407_s1 + $0x140] sm:$0xf]  ;;  %v2944_v47 = vld [vmem:[%s5407_s1 + $0x30] sm:$0xf] }
  0x1d   : > { %948 = vmatpush.bf16.msra.mxu3 %v3161_v25  ;;  %v3269_v41 = vld [vmem:[%s5407_s1 + $0x144] sm:$0xf0]  ;;  %v3144_v42 = vld [vmem:[%s5407_s1 + $0x1c0] sm:$0xf]  ;;  %v3017_v45 = vor.u32 %v3253_v39, %v3016_v37  ;;  %v3235_v48 = vld [vmem:[%s5407_s1 + $0x34] sm:$0xf0] }
  0x1e   : > { %v3285_v43 = vld [vmem:[%s5407_s1 + $0x1c4] sm:$0xf0]  ;;  %802 = vmatpush.bf16.msra.mxu0 %v2961_v29  ;;  %v3081_v46 = vor.u32 %v3269_v41, %v3080_v40  ;;  %v3008_v49 = vld [vmem:[%s5407_s1 + $0xb0] sm:$0xf]  ;;  %v3251_v51 = vld [vmem:[%s5407_s1 + $0xb4] sm:$0xf0]  ;;  %v2945_v56 = vor.u32 %v3235_v48, %v2944_v47 }
  0x1f   : > { %851 = vmatpush.bf16.msra.mxu1 %v3025_v33  ;;  %v3145_v50 = vor.u32 %v3285_v43, %v3144_v42  ;;  %v3072_v52 = vld [vmem:[%s5407_s1 + $0x130] sm:$0xf]  ;;  %v3267_v53 = vld [vmem:[%s5407_s1 + $0x134] sm:$0xf0]  ;;  %v3009_v57 = vor.u32 %v3251_v51, %v3008_v49  ;;  %v2936_v59 = vld [vmem:[%s5407_s1 + $0x20] sm:$0xf] }
  0x20   : > { %900 = vmatpush.bf16.msra.mxu2 %v3089_v34  ;;  %v3136_v54 = vld [vmem:[%s5407_s1 + $0x1b0] sm:$0xf]  ;;  %v3283_v55 = vld [vmem:[%s5407_s1 + $0x1b4] sm:$0xf0]  ;;  %v3073_v58 = vor.u32 %v3267_v53, %v3072_v52  ;;  %v3233_v60 = vld [vmem:[%s5407_s1 + $0x24] sm:$0xf0] }
  0x21   : > { %949 = vmatpush.bf16.msra.mxu3 %v3153_v38  ;;  %v3000_v61 = vld [vmem:[%s5407_s1 + $0xa0] sm:$0xf]  ;;  %v3137_v62 = vor.u32 %v3283_v55, %v3136_v54  ;;  %v3249_v63 = vld [vmem:[%s5407_s1 + $0xa4] sm:$0xf0]  ;;  %v2937_v4 = vor.u32 %v3233_v60, %v2936_v59  ;;  %v2928_v5 = vld [vmem:[%s5407_s1 + $0x10] sm:$0xf] }
  0x22   : > { %803 = vmatpush.bf16.msra.mxu0 %v2953_v44  ;;  %v3064_v0 = vld [vmem:[%s5407_s1 + $0x120] sm:$0xf]  ;;  %v3265_v1 = vld [vmem:[%s5407_s1 + $0x124] sm:$0xf0]  ;;  %v3001_v6 = vor.u32 %v3249_v63, %v3000_v61  ;;  %v3231_v8 = vld [vmem:[%s5407_s1 + $0x14] sm:$0xf0] }
  0x23   : > { %852 = vmatpush.bf16.msra.mxu1 %v3017_v45  ;;  %v3128_v2 = vld [vmem:[%s5407_s1 + $0x1a0] sm:$0xf]  ;;  %v3281_v3 = vld [vmem:[%s5407_s1 + $0x1a4] sm:$0xf0]  ;;  %v3065_v7 = vor.u32 %v3265_v1, %v3064_v0  ;;  %v2992_v9 = vld [vmem:[%s5407_s1 + $0x90] sm:$0xf]  ;;  %v2929_v16 = vor.u32 %v3231_v8, %v2928_v5 }
  0x24   : > { %901 = vmatpush.bf16.msra.mxu2 %v3081_v46  ;;  %v3247_v10 = vld [vmem:[%s5407_s1 + $0x94] sm:$0xf0]  ;;  %v3129_v11 = vor.u32 %v3281_v3, %v3128_v2  ;;  %v3056_v12 = vld [vmem:[%s5407_s1 + $0x110] sm:$0xf]  ;;  %v2920_v17 = vld [vmem:[%s5407_s1] sm:$0xf] }
  0x25   : > { %950 = vmatpush.bf16.msra.mxu3 %v3145_v50  ;;  %v3263_v13 = vld [vmem:[%s5407_s1 + $0x114] sm:$0xf0]  ;;  %v3120_v14 = vld [vmem:[%s5407_s1 + $0x190] sm:$0xf]  ;;  %v3229_v18 = vld [vmem:[%s5407_s1 + $0x4] sm:$0xf0]  ;;  %v2993_v20 = vor.u32 %v3247_v10, %v2992_v9 }
  0x26   : > { %804 = vmatpush.bf16.msra.mxu0 %v2945_v56  ;;  %v3279_v15 = vld [vmem:[%s5407_s1 + $0x194] sm:$0xf0]  ;;  %v2984_v19 = vld [vmem:[%s5407_s1 + $0x80] sm:$0xf]  ;;  %v3057_v21 = vor.u32 %v3263_v13, %v3056_v12  ;;  %v3245_v22 = vld [vmem:[%s5407_s1 + $0x84] sm:$0xf0]  ;;  %v2921_v30 = vor.u32 %v3229_v18, %v2920_v17 }
  0x27   : > { %853 = vmatpush.bf16.msra.mxu1 %v3009_v57  ;;  %v3048_v23 = vld [vmem:[%s5407_s1 + $0x100] sm:$0xf]  ;;  %s5466_s7 = smov (!%p203_p10, %s2785_s7), 63  ;;  %v3121_v24 = vor.u32 %v3279_v15, %v3120_v14  ;;  %v3261_v25 = vld [vmem:[%s5407_s1 + $0x104] sm:$0xf0]  ;;  %v2985_v35 = vor.u32 %v3245_v22, %v2984_v19 }
  0x28   : > { %902 = vmatpush.bf16.msra.mxu2 %v3073_v58  ;;  %v3112_v26 = vld [vmem:[%s5407_s1 + $0x180] sm:$0xf]  ;;  %v3277_v27 = vld [vmem:[%s5407_s1 + $0x184] sm:$0xf0]  ;;  %s3195_s12 = sshll.u32 %s5466_s7, 4  ;;  %v3049_v36 = vor.u32 %v3261_v25, %v3048_v23 }
  0x29   : > { %951 = vmatpush.bf16.msra.mxu3 %v3137_v62  ;;  %v3274_v28 = vld [vmem:[%s5407_s1 + $0x174] sm:$0xf]  ;;  %v3106_v29 = vld [vmem:[%s5407_s1 + $0x178] sm:$0xf0]  ;;  %s3842_s28 = scalar_lea.vmem %s5406_s0, %s3195_s12  ;;  %v3272_v42 = vld [vmem:[%s5407_s1 + $0x164] sm:$0xf]  ;;  %v3113_v43 = vor.u32 %v3277_v27, %v3112_v26 }
  0x2a   : > { %805 = vmatpush.bf16.msra.mxu0 %v2937_v4  ;;  %v3242_v31 = vld [vmem:[%s5407_s1 + $0x74] sm:$0xf]  ;;  %v2978_v32 = vld [vmem:[%s5407_s1 + $0x78] sm:$0xf0]  ;;  %v2792_v37 = vld [vmem:[%s3842_s28] sm:$0xf]  ;;  %v3109_v47 = vor.u32 %v3274_v28, %v3106_v29 }
  0x2b   : > { %854 = vmatpush.bf16.msra.mxu1 %v3001_v6  ;;  %v3290_v33 = vld [vmem:[%s5407_s1 + $0x1f4] sm:$0xf]  ;;  %v3170_v34 = vld [vmem:[%s5407_s1 + $0x1f8] sm:$0xf0]  ;;  %v3198_v38 = vld [vmem:[%s3842_s28 + $0xc] sm:$0xf0]  ;;  %v2981_v58 = vor.u32 %v3242_v31, %v2978_v32 }
  0x2c   : > { %903 = vmatpush.bf16.msra.mxu2 %v3065_v7  ;;  %v3196_v39 = vld [vmem:[%s3842_s28 + $0x4] sm:$0xf]  ;;  %v3258_v40 = vld [vmem:[%s5407_s1 + $0xf4] sm:$0xf]  ;;  %v3042_v41 = vld [vmem:[%s5407_s1 + $0xf8] sm:$0xf0]  ;;  %v3871_v48 = vor.u32 %v3198_v38, %v2792_v37  ;;  %v3173_v51 = vor.u32 %v3290_v33, %v3170_v34 }
  0x2d   : > { %952 = vmatpush.bf16.msra.mxu3 %v3129_v11  ;;  %v2794_v44 = vld [vmem:[%s3842_s28 + $0x10] sm:$0xf0]  ;;  %v2800_v45 = vld [vmem:[%s3842_s28 + $0x8] sm:$0xf]  ;;  %v3199_v46 = vld [vmem:[%s3842_s28 + $0x14] sm:$0xf0]  ;;  %v3045_v59 = vor.u32 %v3258_v40, %v3042_v41 }
  0x2e   : > { %806 = vmatpush.bf16.msra.mxu0 %v2929_v16  ;;  %v3197_v49 = vld [vmem:[%s3842_s28 + $0xc] sm:$0xf]  ;;  %v2802_v50 = vld [vmem:[%s3842_s28 + $0x18] sm:$0xf0]  ;;  %v3878_v53 = vor.u32 %v3196_v39, %v2794_v44  ;;  %v3880_v54 = vor.u32 %v3199_v46, %v2800_v45  ;;  %v3288_v55 = vld [vmem:[%s5407_s1 + $0x1e4] sm:$0xf] }
  0x2f   : > { %855 = vmatpush.bf16.msra.mxu1 %v2993_v20  ;;  %v3098_v52 = vld [vmem:[%s5407_s1 + $0x168] sm:$0xf0]  ;;  %v3888_v57 = vor.u32 %v3197_v49, %v2802_v50  ;;  %v3240_v61 = vld [vmem:[%s5407_s1 + $0x64] sm:$0xf]  ;;  %v3270_v3 = vld [vmem:[%s5407_s1 + $0x154] sm:$0xf] }
  0x30   : > { %904 = vmatpush.bf16.msra.mxu2 %v3057_v21  ;;  %v3162_v56 = vld [vmem:[%s5407_s1 + $0x1e8] sm:$0xf0]  ;;  %v3101_v60 = vor.u32 %v3272_v42, %v3098_v52  ;;  %v3256_v0 = vld [vmem:[%s5407_s1 + $0xe4] sm:$0xf]  ;;  %v3090_v4 = vld [vmem:[%s5407_s1 + $0x158] sm:$0xf0] }
  0x31   : > { %953 = vmatpush.bf16.msra.mxu3 %v3121_v24  ;;  %v2970_v62 = vld [vmem:[%s5407_s1 + $0x68] sm:$0xf0]  ;;  %v3165_v63 = vor.u32 %v3288_v55, %v3162_v56  ;;  %v3238_v5 = vld [vmem:[%s5407_s1 + $0x54] sm:$0xf]  ;;  %v3093_v7 = vor.u32 %v3270_v3, %v3090_v4  ;;  %v2962_v8 = vld [vmem:[%s5407_s1 + $0x58] sm:$0xf0] }
  0x32   : > { %807 = vmatpush.bf16.msra.mxu0 %v2921_v30  ;;  %v3034_v1 = vld [vmem:[%s5407_s1 + $0xe8] sm:$0xf0]  ;;  %v2973_v2 = vor.u32 %v3240_v61, %v2970_v62  ;;  %v3286_v9 = vld [vmem:[%s5407_s1 + $0x1d4] sm:$0xf]  ;;  %v3154_v10 = vld [vmem:[%s5407_s1 + $0x1d8] sm:$0xf0]  ;;  %v2965_v14 = vor.u32 %v3238_v5, %v2962_v8 }
  0x33   : > { %856 = vmatpush.bf16.msra.mxu1 %v2985_v35  ;;  %v3037_v6 = vor.u32 %v3256_v0, %v3034_v1  ;;  %v3157_v11 = vor.u32 %v3286_v9, %v3154_v10  ;;  %v3254_v12 = vld [vmem:[%s5407_s1 + $0xd4] sm:$0xf]  ;;  %v3026_v13 = vld [vmem:[%s5407_s1 + $0xd8] sm:$0xf0]  ;;  %v2808_v16 = vld [vmem:[%s3842_s28 + $0x20] sm:$0xf] }
  0x34   : > { %905 = vmatpush.bf16.msra.mxu2 %v3049_v36  ;;  %v3029_v15 = vor.u32 %v3254_v12, %v3026_v13  ;;  %v3202_v17 = vld [vmem:[%s3842_s28 + $0x2c] sm:$0xf0]  ;;  %v3200_v18 = vld [vmem:[%s3842_s28 + $0x24] sm:$0xf]  ;;  %v2810_v19 = vld [vmem:[%s3842_s28 + $0x30] sm:$0xf0] }
  0x35   : > { %954 = vmatpush.bf16.msra.mxu3 %v3113_v43  ;;  %808 = vmatmul.bf16.vlgmr.msra.gmra.mxu0 %v3871_v48  ;;  %v2816_v20 = vld [vmem:[%s3842_s28 + $0x28] sm:$0xf]  ;;  %v3203_v21 = vld [vmem:[%s3842_s28 + $0x34] sm:$0xf0]  ;;  %v3201_v22 = vld [vmem:[%s3842_s28 + $0x2c] sm:$0xf]  ;;  %v3938_v24 = vor.u32 %v3202_v17, %v2808_v16  ;;  %v3940_v25 = vor.u32 %v3200_v18, %v2810_v19 }
  0x36   : > { %857 = vmatmul.bf16.vlgmr.msra.gmra.mxu1 %v3878_v53  ;;  %996 = vmatpush.bf16.msrb.mxu0 %v2981_v58  ;;  %v2818_v23 = vld [vmem:[%s3842_s28 + $0x38] sm:$0xf0]  ;;  %v3942_v26 = vor.u32 %v3203_v21, %v2816_v20  ;;  %v3268_v28 = vld [vmem:[%s5407_s1 + $0x144] sm:$0xf]  ;;  %v3082_v29 = vld [vmem:[%s5407_s1 + $0x148] sm:$0xf0] }
  0x37   : > { %906 = vmatmul.bf16.vlgmr.msra.gmra.mxu2 %v3880_v54  ;;  %1045 = vmatpush.bf16.msrb.mxu1 %v3045_v59  ;;  %v3944_v27 = vor.u32 %v3201_v22, %v2818_v23  ;;  %v3236_v30 = vld [vmem:[%s5407_s1 + $0x44] sm:$0xf]  ;;  %v3085_v31 = vor.u32 %v3268_v28, %v3082_v29  ;;  %v2954_v32 = vld [vmem:[%s5407_s1 + $0x48] sm:$0xf0]  ;;  %v2824_v40 = vld [vmem:[%s3842_s28 + $0x40] sm:$0xf] }
  0x38   : > { %1094 = vmatpush.bf16.msrb.mxu2 %v3109_v47  ;;  %955 = vmatmul.bf16.vlgmr.msra.gmra.mxu3 %v3888_v57  ;;  %v3284_v33 = vld [vmem:[%s5407_s1 + $0x1c4] sm:$0xf]  ;;  %v3146_v34 = vld [vmem:[%s5407_s1 + $0x1c8] sm:$0xf0]  ;;  %v2957_v35 = vor.u32 %v3236_v30, %v2954_v32  ;;  %v3206_v41 = vld [vmem:[%s3842_s28 + $0x4c] sm:$0xf0] }
  0x39   : > { %1143 = vmatpush.bf16.msrb.mxu3 %v3173_v51  ;;  %v3149_v36 = vor.u32 %v3284_v33, %v3146_v34  ;;  %v3252_v37 = vld [vmem:[%s5407_s1 + $0xc4] sm:$0xf]  ;;  %v3018_v38 = vld [vmem:[%s5407_s1 + $0xc8] sm:$0xf0]  ;;  %v2826_v43 = vld [vmem:[%s3842_s28 + $0x50] sm:$0xf0]  ;;  %v3982_v49 = vor.u32 %v3206_v41, %v2824_v40 }
  0x3a   : > { %997 = vmatpush.bf16.msrb.mxu0 %v2973_v2  ;;  %v3021_v39 = vor.u32 %v3252_v37, %v3018_v38  ;;  %v3204_v42 = vld [vmem:[%s3842_s28 + $0x44] sm:$0xf]  ;;  %v2832_v44 = vld [vmem:[%s3842_s28 + $0x48] sm:$0xf]  ;;  %v3207_v45 = vld [vmem:[%s3842_s28 + $0x54] sm:$0xf0] }
  0x3b   : > { %1046 = vmatpush.bf16.msrb.mxu1 %v3037_v6  ;;  %v3205_v46 = vld [vmem:[%s3842_s28 + $0x4c] sm:$0xf]  ;;  %v2834_v47 = vld [vmem:[%s3842_s28 + $0x58] sm:$0xf0]  ;;  %v3984_v50 = vor.u32 %v3204_v42, %v2826_v43  ;;  %v3986_v51 = vor.u32 %v3207_v45, %v2832_v44  ;;  %v3266_v55 = vld [vmem:[%s5407_s1 + $0x134] sm:$0xf] }
  0x3c   : > { %1095 = vmatpush.bf16.msrb.mxu2 %v3101_v60  ;;  %v3988_v52 = vor.u32 %v3205_v46, %v2834_v47  ;;  %v3074_v56 = vld [vmem:[%s5407_s1 + $0x138] sm:$0xf0]  ;;  %v3234_v58 = vld [vmem:[%s5407_s1 + $0x34] sm:$0xf]  ;;  %v2840_v4 = vld [vmem:[%s3842_s28 + $0x60] sm:$0xf] }
  0x3d   : > { %1144 = vmatpush.bf16.msrb.mxu3 %v3165_v63  ;;  %v3077_v59 = vor.u32 %v3266_v55, %v3074_v56  ;;  %v2946_v60 = vld [vmem:[%s5407_s1 + $0x38] sm:$0xf0]  ;;  %v3282_v61 = vld [vmem:[%s5407_s1 + $0x1b4] sm:$0xf]  ;;  %v3210_v5 = vld [vmem:[%s3842_s28 + $0x6c] sm:$0xf0] }
  0x3e   : > { %998 = vmatpush.bf16.msrb.mxu0 %v2965_v14  ;;  %v3138_v62 = vld [vmem:[%s5407_s1 + $0x1b8] sm:$0xf0]  ;;  %v2949_v63 = vor.u32 %v3234_v58, %v2946_v60  ;;  %v3250_v1 = vld [vmem:[%s5407_s1 + $0xb4] sm:$0xf]  ;;  %v3208_v6 = vld [vmem:[%s3842_s28 + $0x64] sm:$0xf]  ;;  %v4026_v12 = vor.u32 %v3210_v5, %v2840_v4 }
  0x3f   : > { %1047 = vmatpush.bf16.msrb.mxu1 %v3029_v15  ;;  %v3141_v0 = vor.u32 %v3282_v61, %v3138_v62  ;;  %v3010_v2 = vld [vmem:[%s5407_s1 + $0xb8] sm:$0xf0]  ;;  %v2848_v8 = vld [vmem:[%s3842_s28 + $0x68] sm:$0xf]  ;;  %v3211_v9 = vld [vmem:[%s3842_s28 + $0x74] sm:$0xf0] }
  0x40   : > { %1096 = vmatpush.bf16.msrb.mxu2 %v3093_v7  ;;  %v3013_v3 = vor.u32 %v3250_v1, %v3010_v2  ;;  %v2842_v7 = vld [vmem:[%s3842_s28 + $0x70] sm:$0xf0]  ;;  %v3209_v10 = vld [vmem:[%s3842_s28 + $0x6c] sm:$0xf]  ;;  %v4030_v14 = vor.u32 %v3211_v9, %v2848_v8  ;;  %v3264_v16 = vld [vmem:[%s5407_s1 + $0x124] sm:$0xf] }
  0x41   : > { %1145 = vmatpush.bf16.msrb.mxu3 %v3157_v11  ;;  %v2850_v11 = vld [vmem:[%s3842_s28 + $0x78] sm:$0xf0]  ;;  %v4028_v13 = vor.u32 %v3208_v6, %v2842_v7  ;;  %v3066_v17 = vld [vmem:[%s5407_s1 + $0x128] sm:$0xf0]  ;;  %v3232_v18 = vld [vmem:[%s5407_s1 + $0x24] sm:$0xf] }
  0x42   : > { %999 = vmatpush.bf16.msrb.mxu0 %v2957_v35  ;;  %v4032_v15 = vor.u32 %v3209_v10, %v2850_v11  ;;  %v3069_v19 = vor.u32 %v3264_v16, %v3066_v17  ;;  %v2938_v20 = vld [vmem:[%s5407_s1 + $0x28] sm:$0xf0]  ;;  %v3280_v21 = vld [vmem:[%s5407_s1 + $0x1a4] sm:$0xf]  ;;  %v2856_v32 = vld [vmem:[%s3842_s28 + $0x80] sm:$0xf] }
  0x43   : > { %1048 = vmatpush.bf16.msrb.mxu1 %v3021_v39  ;;  %v3130_v22 = vld [vmem:[%s5407_s1 + $0x1a8] sm:$0xf0]  ;;  %v2941_v23 = vor.u32 %v3232_v18, %v2938_v20  ;;  %v3248_v29 = vld [vmem:[%s5407_s1 + $0xa4] sm:$0xf]  ;;  %v3214_v33 = vld [vmem:[%s3842_s28 + $0x8c] sm:$0xf0] }
  0x44   : > { %1097 = vmatpush.bf16.msrb.mxu2 %v3085_v31  ;;  %v3133_v28 = vor.u32 %v3280_v21, %v3130_v22  ;;  %v3002_v30 = vld [vmem:[%s5407_s1 + $0xa8] sm:$0xf0]  ;;  %v3212_v34 = vld [vmem:[%s3842_s28 + $0x84] sm:$0xf]  ;;  %v2858_v35 = vld [vmem:[%s3842_s28 + $0x90] sm:$0xf0]  ;;  %v4070_v40 = vor.u32 %v3214_v33, %v2856_v32 }
  0x45   : > { %813 = vmatmul.bf16.gmra.mxu0 %v3938_v24  ;;  %1146 = vmatpush.bf16.msrb.mxu3 %v3149_v36  ;;  %v3005_v31 = vor.u32 %v3248_v29, %v3002_v30  ;;  %v2864_v36 = vld [vmem:[%s3842_s28 + $0x88] sm:$0xf]  ;;  %v3215_v37 = vld [vmem:[%s3842_s28 + $0x94] sm:$0xf0]  ;;  %v3213_v38 = vld [vmem:[%s3842_s28 + $0x8c] sm:$0xf]  ;;  %v4072_v41 = vor.u32 %v3212_v34, %v2858_v35 }
  0x46   : > { %862 = vmatmul.bf16.gmra.mxu1 %v3940_v25  ;;  %1000 = vmatpush.bf16.msrb.mxu0 %v2949_v63  ;;  %v2866_v39 = vld [vmem:[%s3842_s28 + $0x98] sm:$0xf0]  ;;  %v4074_v42 = vor.u32 %v3215_v37, %v2864_v36  ;;  %v3262_v44 = vld [vmem:[%s5407_s1 + $0x114] sm:$0xf]  ;;  %v3218_v1 = vld [vmem:[%s3842_s28 + $0xac] sm:$0xf0] }
  0x47   : > { %911 = vmatmul.bf16.gmra.mxu2 %v3942_v26  ;;  %1049 = vmatpush.bf16.msrb.mxu1 %v3013_v3  ;;  %v4076_v43 = vor.u32 %v3213_v38, %v2866_v39  ;;  %v3058_v45 = vld [vmem:[%s5407_s1 + $0x118] sm:$0xf0]  ;;  %v3230_v46 = vld [vmem:[%s5407_s1 + $0x14] sm:$0xf]  ;;  %v3216_v2 = vld [vmem:[%s3842_s28 + $0xa4] sm:$0xf] }
  0x48   : > { %960 = vmatmul.bf16.gmra.mxu3 %v3944_v27  ;;  %1098 = vmatpush.bf16.msrb.mxu2 %v3077_v59  ;;  %v3061_v47 = vor.u32 %v3262_v44, %v3058_v45  ;;  %v2930_v55 = vld [vmem:[%s5407_s1 + $0x18] sm:$0xf0]  ;;  %v3278_v56 = vld [vmem:[%s5407_s1 + $0x194] sm:$0xf]  ;;  %v2880_v4 = vld [vmem:[%s3842_s28 + $0xa8] sm:$0xf] }
  0x49   : > { %1147 = vmatpush.bf16.msrb.mxu3 %v3141_v0  ;;  %v3122_v58 = vld [vmem:[%s5407_s1 + $0x198] sm:$0xf0]  ;;  %v2933_v59 = vor.u32 %v3230_v46, %v2930_v55  ;;  %v3246_v61 = vld [vmem:[%s5407_s1 + $0x94] sm:$0xf]  ;;  %v2872_v0 = vld [vmem:[%s3842_s28 + $0xa0] sm:$0xf] }
  0x4a   : > { %1001 = vmatpush.bf16.msrb.mxu0 %v2941_v23  ;;  %v3125_v60 = vor.u32 %v3278_v56, %v3122_v58  ;;  %v2994_v62 = vld [vmem:[%s5407_s1 + $0x98] sm:$0xf0]  ;;  %v2874_v3 = vld [vmem:[%s3842_s28 + $0xb0] sm:$0xf0]  ;;  %v3219_v5 = vld [vmem:[%s3842_s28 + $0xb4] sm:$0xf0]  ;;  %v4114_v8 = vor.u32 %v3218_v1, %v2872_v0 }
  0x4b   : > { %1050 = vmatpush.bf16.msrb.mxu1 %v3005_v31  ;;  %v2997_v63 = vor.u32 %v3246_v61, %v2994_v62  ;;  %v3217_v6 = vld [vmem:[%s3842_s28 + $0xac] sm:$0xf]  ;;  %v2882_v7 = vld [vmem:[%s3842_s28 + $0xb8] sm:$0xf0]  ;;  %v4116_v9 = vor.u32 %v3216_v2, %v2874_v3  ;;  %v4118_v10 = vor.u32 %v3219_v5, %v2880_v4  ;;  %v3260_v16 = vld [vmem:[%s5407_s1 + $0x104] sm:$0xf] }
  0x4c   : > { %1099 = vmatpush.bf16.msrb.mxu2 %v3069_v19  ;;  %v4120_v11 = vor.u32 %v3217_v6, %v2882_v7  ;;  %v3050_v17 = vld [vmem:[%s5407_s1 + $0x108] sm:$0xf0]  ;;  %v3228_v18 = vld [vmem:[%s5407_s1 + $0x4] sm:$0xf]  ;;  %v2888_v32 = vld [vmem:[%s3842_s28 + $0xc0] sm:$0xf] }
  0x4d   : > { %1148 = vmatpush.bf16.msrb.mxu3 %v3133_v28  ;;  %v3053_v19 = vor.u32 %v3260_v16, %v3050_v17  ;;  %v2922_v20 = vld [vmem:[%s5407_s1 + $0x8] sm:$0xf0]  ;;  %v3276_v21 = vld [vmem:[%s5407_s1 + $0x184] sm:$0xf]  ;;  %v3222_v33 = vld [vmem:[%s3842_s28 + $0xcc] sm:$0xf0] }
  0x4e   : > { %1002 = vmatpush.bf16.msrb.mxu0 %v2933_v59  ;;  %v3114_v22 = vld [vmem:[%s5407_s1 + $0x188] sm:$0xf0]  ;;  %v2925_v23 = vor.u32 %v3228_v18, %v2922_v20  ;;  %v3244_v29 = vld [vmem:[%s5407_s1 + $0x84] sm:$0xf]  ;;  %v2890_v35 = vld [vmem:[%s3842_s28 + $0xd0] sm:$0xf0]  ;;  %v4158_v44 = vor.u32 %v3222_v33, %v2888_v32 }
  0x4f   : > { %1051 = vmatpush.bf16.msrb.mxu1 %v2997_v63  ;;  %v3117_v28 = vor.u32 %v3276_v21, %v3114_v22  ;;  %v2986_v30 = vld [vmem:[%s5407_s1 + $0x88] sm:$0xf0]  ;;  %v3220_v34 = vld [vmem:[%s3842_s28 + $0xc4] sm:$0xf]  ;;  %v2896_v36 = vld [vmem:[%s3842_s28 + $0xc8] sm:$0xf] }
  0x50   : > { %1100 = vmatpush.bf16.msrb.mxu2 %v3061_v47  ;;  %v2989_v31 = vor.u32 %v3244_v29, %v2986_v30  ;;  %v3223_v37 = vld [vmem:[%s3842_s28 + $0xd4] sm:$0xf0]  ;;  %v3221_v38 = vld [vmem:[%s3842_s28 + $0xcc] sm:$0xf]  ;;  %v2898_v39 = vld [vmem:[%s3842_s28 + $0xd8] sm:$0xf0]  ;;  %v4160_v45 = vor.u32 %v3220_v34, %v2890_v35 }
  0x51   : > { %1149 = vmatpush.bf16.msrb.mxu3 %v3125_v60  ;;  %v4162_v46 = vor.u32 %v3223_v37, %v2896_v36  ;;  %v4164_v47 = vor.u32 %v3221_v38, %v2898_v39  ;;  %v2904_v55 = vld [vmem:[%s3842_s28 + $0xe0] sm:$0xf]  ;;  %v3226_v56 = vld [vmem:[%s3842_s28 + $0xec] sm:$0xf0]  ;;  %v3224_v58 = vld [vmem:[%s3842_s28 + $0xe4] sm:$0xf] }
  0x52   : > { %1003 = vmatpush.bf16.msrb.mxu0 %v2925_v23  ;;  %v2906_v59 = vld [vmem:[%s3842_s28 + $0xf0] sm:$0xf0]  ;;  %v2912_v60 = vld [vmem:[%s3842_s28 + $0xe8] sm:$0xf]  ;;  %v3227_v61 = vld [vmem:[%s3842_s28 + $0xf4] sm:$0xf0]  ;;  %v4178_v0 = vor.u32 %v3226_v56, %v2904_v55 }
  0x53   : > { %1052 = vmatpush.bf16.msrb.mxu1 %v2989_v31  ;;  %v3225_v62 = vld [vmem:[%s3842_s28 + $0xec] sm:$0xf]  ;;  %v2914_v63 = vld [vmem:[%s3842_s28 + $0xf8] sm:$0xf0]  ;;  %v4180_v1 = vor.u32 %v3224_v58, %v2906_v59  ;;  %v4182_v2 = vor.u32 %v3227_v61, %v2912_v60  ;;  %s192_s28 = sand.u32 1, %s3554_s16  }
  0x54   : > { %1101 = vmatpush.bf16.msrb.mxu2 %v3053_v19  ;;  %v4184_v3 = vor.u32 %v3225_v62, %v2914_v63  ;;  %v4193_v4 = vld [vmem:[%s5408_s2] ss:$8 sm:$0x3]  ;;  %s2784_s23 = sshll.u32 %s192_s28, 7 }
  0x55   : > { %818 = vmatmul.bf16.gmra.mxu0 %v3982_v49  ;;  %1150 = vmatpush.bf16.msrb.mxu3 %v3117_v28  ;;  %v4196_v5 = vperm.slane %v4193_v4, 0  ;;  %s4207_s27 = scalar_lea.vmem [#allocation2], %s2784_s23  ;;  %s2669_s23 = scalar_lea.sflag [#allocation3], %s192_s28 }
  0x56   : > { %867 = vmatmul.bf16.gmra.mxu1 %v3984_v50  ;;  %s2686_s12 = sshll.u32 %s4207_s27, 4  ;;  %s2687_s12 = int_to_ptr.vmem [resolvable:$true] %s2686_s12 }
  0x57   : > { %916 = vmatmul.bf16.gmra.mxu2 %v3986_v51 }
  0x58   : > { %965 = vmatmul.bf16.gmra.mxu3 %v3988_v52 }
  0x65   : > { %823 = vmatmul.bf16.gmra.mxu0 %v4026_v12 }
  0x66   : > { %872 = vmatmul.bf16.gmra.mxu1 %v4028_v13 }
  0x67   : > { %921 = vmatmul.bf16.gmra.mxu2 %v4030_v14 }
  0x68   : > { %970 = vmatmul.bf16.gmra.mxu3 %v4032_v15 }
  0x75   : > { %828 = vmatmul.bf16.gmra.mxu0 %v4070_v40 }
  0x76   : > { %877 = vmatmul.bf16.gmra.mxu1 %v4072_v41 }
  0x77   : > { %926 = vmatmul.bf16.gmra.mxu2 %v4074_v42 }
  0x78   : > { %975 = vmatmul.bf16.gmra.mxu3 %v4076_v43 }
  0x85   : > { %833 = vmatmul.bf16.gmra.mxu0 %v4114_v8 }
  0x86   : > { %882 = vmatmul.bf16.gmra.mxu1 %v4116_v9 }
  0x87   : > { %931 = vmatmul.bf16.gmra.mxu2 %v4118_v10 }
  0x88   : > { %980 = vmatmul.bf16.gmra.mxu3 %v4120_v11 }
  0x95   : > { %838 = vmatmul.bf16.gmra.mxu0 %v4158_v44 }
  0x96   : > { %887 = vmatmul.bf16.gmra.mxu1 %v4160_v45 }
  0x97   : > { %936 = vmatmul.bf16.gmra.mxu2 %v4162_v46 }
  0x98   : > { %985 = vmatmul.bf16.gmra.mxu3 %v4164_v47 }
  0xa5   : > { %843 = vmatmul.bf16.gmra.mxu0 %v4178_v0 }
  0xa6   : > { %892 = vmatmul.bf16.gmra.mxu1 %v4180_v1 }
  0xa7   : > { %941 = vmatmul.bf16.gmra.mxu2 %v4182_v2 }
  0xa8   : > { %990 = vmatmul.bf16.gmra.mxu3 %v4184_v3 }
  0xb2   : > { %v809_v6 = vpop.f32.mrf.mxu0 }
  0xb3   : > { %v810_v7 = vadd.f32 %v809_v6, %v4196_v5  ;;  %v858_v16 = vpop.f32.mrf.mxu1 }
  0xb5   : > { %1004 = vmatmul.bf16.vlgmr.msrb.gmra.mxu0 %v3871_v48  ;;  %v859_v17 = vadd.f32 %v858_v16, %v810_v7 }
  0xb6   : > { %1053 = vmatmul.bf16.vlgmr.msrb.gmra.mxu1 %v3878_v53 }
  0xb7   : > { %1102 = vmatmul.bf16.vlgmr.msrb.gmra.mxu2 %v3880_v54 }
  0xb8   : > { %1151 = vmatmul.bf16.vlgmr.msrb.gmra.mxu3 %v3888_v57 }
  0xba   : > { %v907_v18 = vpop.f32.mrf.mxu2  ;;  %v811_v21 = vpop.f32.mrf.mxu0 }
  0xbb   : > { %v908_v19 = vadd.f32 %v907_v18, %v859_v17  ;;  %v956_v20 = vpop.f32.mrf.mxu3  ;;  %v860_v22 = vpop.f32.mrf.mxu1  ;;  %v812_v28 = vadd.f32 %v811_v21, %v4196_v5 }
  0xbd   : > { %v957_v23 = vadd.f32 %v956_v20, %v908_v19  ;;  %v861_v48 = vadd.f32 %v860_v22, %v812_v28 }
  0xbf   : > { %1192 = vst [vmem:[%s4207_s27] sm:$0xff] %v957_v23 }
  0xc2   : > { %v909_v53 = vpop.f32.mrf.mxu2  ;;  %v814_v57 = vpop.f32.mrf.mxu0 }
  0xc3   : > { %v910_v54 = vadd.f32 %v909_v53, %v861_v48  ;;  %v958_v29 = vpop.f32.mrf.mxu3  ;;  %v815_v30 = vadd.f32 %v814_v57, %v4196_v5  ;;  %v863_v31 = vpop.f32.mrf.mxu1 }
  0xc5   : > { %v959_v32 = vadd.f32 %v958_v29, %v910_v54  ;;  %1009 = vmatmul.bf16.gmra.mxu0 %v3938_v24  ;;  %v864_v33 = vadd.f32 %v863_v31, %v815_v30 }
  0xc6   : > { %1058 = vmatmul.bf16.gmra.mxu1 %v3940_v25 }
  0xc7   : > { %1193 = vst [vmem:[%s4207_s27 + $0x8] sm:$0xff] %v959_v32  ;;  %1107 = vmatmul.bf16.gmra.mxu2 %v3942_v26 }
  0xc8   : > { %1156 = vmatmul.bf16.gmra.mxu3 %v3944_v27 }
  0xca   : > { %v912_v34 = vpop.f32.mrf.mxu2  ;;  %v816_v37 = vpop.f32.mrf.mxu0 }
  0xcb   : > { %v913_v35 = vadd.f32 %v912_v34, %v864_v33  ;;  %v961_v36 = vpop.f32.mrf.mxu3  ;;  %v865_v38 = vpop.f32.mrf.mxu1  ;;  %v817_v55 = vadd.f32 %v816_v37, %v4196_v5 }
  0xcd   : > { %v962_v39 = vadd.f32 %v961_v36, %v913_v35  ;;  %v866_v56 = vadd.f32 %v865_v38, %v817_v55 }
  0xcf   : > { %1194 = vst [vmem:[%s4207_s27 + $0x10] sm:$0xff] %v962_v39 }
  0xd2   : > { %v914_v24 = vpop.f32.mrf.mxu2  ;;  %v819_v60 = vpop.f32.mrf.mxu0 }
  0xd3   : > { %v915_v58 = vadd.f32 %v914_v24, %v866_v56  ;;  %v963_v59 = vpop.f32.mrf.mxu3  ;;  %v820_v25 = vadd.f32 %v819_v60, %v4196_v5  ;;  %v868_v26 = vpop.f32.mrf.mxu1 }
  0xd5   : > { %v964_v27 = vadd.f32 %v963_v59, %v915_v58  ;;  %1014 = vmatmul.bf16.gmra.mxu0 %v3982_v49  ;;  %v869_v61 = vadd.f32 %v868_v26, %v820_v25 }
  0xd6   : > { %1063 = vmatmul.bf16.gmra.mxu1 %v3984_v50 }
  0xd7   : > { %1195 = vst [vmem:[%s4207_s27 + $0x18] sm:$0xff] %v964_v27  ;;  %1112 = vmatmul.bf16.gmra.mxu2 %v3986_v51 }
  0xd8   : > { %1161 = vmatmul.bf16.gmra.mxu3 %v3988_v52 }
  0xda   : > { %v917_v62 = vpop.f32.mrf.mxu2  ;;  %v821_v7 = vpop.f32.mrf.mxu0 }
  0xdb   : > { %v918_v63 = vadd.f32 %v917_v62, %v869_v61  ;;  %v966_v6 = vpop.f32.mrf.mxu3  ;;  %v870_v16 = vpop.f32.mrf.mxu1  ;;  %v822_v18 = vadd.f32 %v821_v7, %v4196_v5 }
  0xdd   : > { %v967_v17 = vadd.f32 %v966_v6, %v918_v63  ;;  %v871_v19 = vadd.f32 %v870_v16, %v822_v18 }
  0xdf   : > { %1196 = vst [vmem:[%s4207_s27 + $0x20] sm:$0xff] %v967_v17 }
  0xe2   : > { %v919_v49 = vpop.f32.mrf.mxu2  ;;  %v824_v22 = vpop.f32.mrf.mxu0 }
  0xe3   : > { %v920_v20 = vadd.f32 %v919_v49, %v871_v19  ;;  %v968_v21 = vpop.f32.mrf.mxu3  ;;  %v825_v51 = vadd.f32 %v824_v22, %v4196_v5  ;;  %v873_v50 = vpop.f32.mrf.mxu1 }
  0xe5   : > { %v969_v52 = vadd.f32 %v968_v21, %v920_v20  ;;  %1019 = vmatmul.bf16.gmra.mxu0 %v4026_v12  ;;  %v874_v23 = vadd.f32 %v873_v50, %v825_v51 }
  0xe6   : > { %1068 = vmatmul.bf16.gmra.mxu1 %v4028_v13 }
  0xe7   : > { %1197 = vst [vmem:[%s4207_s27 + $0x28] sm:$0xff] %v969_v52  ;;  %1117 = vmatmul.bf16.gmra.mxu2 %v4030_v14 }
  0xe8   : > { %1166 = vmatmul.bf16.gmra.mxu3 %v4032_v15 }
  0xea   : > { %v922_v28 = vpop.f32.mrf.mxu2  ;;  %v826_v54 = vpop.f32.mrf.mxu0 }
  0xeb   : > { %v923_v48 = vadd.f32 %v922_v28, %v874_v23  ;;  %v971_v53 = vpop.f32.mrf.mxu3  ;;  %v875_v29 = vpop.f32.mrf.mxu1  ;;  %v827_v30 = vadd.f32 %v826_v54, %v4196_v5 }
  0xed   : > { %v972_v57 = vadd.f32 %v971_v53, %v923_v48  ;;  %v876_v31 = vadd.f32 %v875_v29, %v827_v30 }
  0xef   : > { %1198 = vst [vmem:[%s4207_s27 + $0x30] sm:$0xff] %v972_v57 }
  0xf2   : > { %v924_v12 = vpop.f32.mrf.mxu2  ;;  %v829_v34 = vpop.f32.mrf.mxu0 }
  0xf3   : > { %v925_v32 = vadd.f32 %v924_v12, %v876_v31  ;;  %v973_v33 = vpop.f32.mrf.mxu3  ;;  %v830_v14 = vadd.f32 %v829_v34, %v4196_v5  ;;  %v878_v13 = vpop.f32.mrf.mxu1 }
  0xf5   : > { %v974_v15 = vadd.f32 %v973_v33, %v925_v32  ;;  %1024 = vmatmul.bf16.gmra.mxu0 %v4070_v40  ;;  %v879_v35 = vadd.f32 %v878_v13, %v830_v14 }
  0xf6   : > { %1073 = vmatmul.bf16.gmra.mxu1 %v4072_v41 }
  0xf7   : > { %1199 = vst [vmem:[%s4207_s27 + $0x38] sm:$0xff] %v974_v15  ;;  %1122 = vmatmul.bf16.gmra.mxu2 %v4074_v42 }
  0xf8   : > { %1171 = vmatmul.bf16.gmra.mxu3 %v4076_v43 }
  0xfa   : > { %v927_v36 = vpop.f32.mrf.mxu2  ;;  %v831_v39 = vpop.f32.mrf.mxu0 }
  0xfb   : > { %v928_v37 = vadd.f32 %v927_v36, %v879_v35  ;;  %v976_v38 = vpop.f32.mrf.mxu3  ;;  %v880_v55 = vpop.f32.mrf.mxu1  ;;  %v832_v24 = vadd.f32 %v831_v39, %v4196_v5 }
  0xfd   : > { %v977_v56 = vadd.f32 %v976_v38, %v928_v37  ;;  %v881_v58 = vadd.f32 %v880_v55, %v832_v24 }
  0xff   : > { %1200 = vst [vmem:[%s4207_s27 + $0x40] sm:$0xff] %v977_v56 }
 0x102   : > { %v929_v40 = vpop.f32.mrf.mxu2  ;;  %v834_v25 = vpop.f32.mrf.mxu0 }
 0x103   : > { %v930_v59 = vadd.f32 %v929_v40, %v881_v58  ;;  %v978_v60 = vpop.f32.mrf.mxu3  ;;  %v835_v42 = vadd.f32 %v834_v25, %v4196_v5  ;;  %v883_v41 = vpop.f32.mrf.mxu1 }
 0x105   : > { %v979_v43 = vadd.f32 %v978_v60, %v930_v59  ;;  %1029 = vmatmul.bf16.gmra.mxu0 %v4114_v8  ;;  %v884_v26 = vadd.f32 %v883_v41, %v835_v42 }
 0x106   : > { %1078 = vmatmul.bf16.gmra.mxu1 %v4116_v9 }
 0x107   : > { %1201 = vst [vmem:[%s4207_s27 + $0x48] sm:$0xff] %v979_v43  ;;  %1127 = vmatmul.bf16.gmra.mxu2 %v4118_v10  ;;  %v4275_v43 = vld [vmem:[%s5408_s2 + $0x9] ss:$0 sm:$0xff] }
 0x108   : > { %1176 = vmatmul.bf16.gmra.mxu3 %v4120_v11 }
 0x10a   : > { %v932_v27 = vpop.f32.mrf.mxu2  ;;  %v836_v63 = vpop.f32.mrf.mxu0 }
 0x10b   : > { %v933_v61 = vadd.f32 %v932_v27, %v884_v26  ;;  %v981_v62 = vpop.f32.mrf.mxu3  ;;  %v885_v6 = vpop.f32.mrf.mxu1  ;;  %v837_v16 = vadd.f32 %v836_v63, %v4196_v5  ;;  %v3564_v26 = vmov 0  }
 0x10c   : > { %3336 = vset.pattern.permute.xlu2 %v3564_v26  ;;  %3337 = vset.pattern.permute.xlu0 %v3564_v26 }
 0x10d   : > { %v982_v7 = vadd.f32 %v981_v62, %v933_v61  ;;  %v886_v17 = vadd.f32 %v885_v6, %v837_v16  ;;  %3335 = vset.pattern.permute.xlu1 %v3564_v26 }
 0x10f   : > { %1202 = vst [vmem:[%s4207_s27 + $0x50] sm:$0xff] %v982_v7 }
 0x112   : > { %v934_v8 = vpop.f32.mrf.mxu2  ;;  %v839_v49 = vpop.f32.mrf.mxu0 }
 0x113   : > { %v935_v18 = vadd.f32 %v934_v8, %v886_v17  ;;  %v983_v19 = vpop.f32.mrf.mxu3  ;;  %v840_v10 = vadd.f32 %v839_v49, %v4196_v5  ;;  %v888_v9 = vpop.f32.mrf.mxu1 }
 0x115   : > { %v984_v11 = vadd.f32 %v983_v19, %v935_v18  ;;  %1034 = vmatmul.bf16.gmra.mxu0 %v4158_v44  ;;  %v889_v20 = vadd.f32 %v888_v9, %v840_v10 }
 0x116   : > { %1083 = vmatmul.bf16.gmra.mxu1 %v4160_v45 }
 0x117   : > { %1203 = vst [vmem:[%s4207_s27 + $0x58] sm:$0xff] %v984_v11  ;;  %1132 = vmatmul.bf16.gmra.mxu2 %v4162_v46 }
 0x118   : > { %1181 = vmatmul.bf16.gmra.mxu3 %v4164_v47 }
 0x11a   : > { %v937_v21 = vpop.f32.mrf.mxu2  ;;  %v841_v50 = vpop.f32.mrf.mxu0 }
 0x11b   : > { %v938_v22 = vadd.f32 %v937_v21, %v889_v20  ;;  %v986_v51 = vpop.f32.mrf.mxu3  ;;  %v890_v52 = vpop.f32.mrf.mxu1  ;;  %v842_v28 = vadd.f32 %v841_v50, %v4196_v5 }
 0x11d   : > { %v987_v23 = vadd.f32 %v986_v51, %v938_v22  ;;  %v891_v48 = vadd.f32 %v890_v52, %v842_v28 }
 0x11f   : > { %1204 = vst [vmem:[%s4207_s27 + $0x60] sm:$0xff] %v987_v23 }
 0x122   : > { %v939_v44 = vpop.f32.mrf.mxu2  ;;  %v844_v29 = vpop.f32.mrf.mxu0 }
 0x123   : > { %v940_v53 = vadd.f32 %v939_v44, %v891_v48  ;;  %v988_v54 = vpop.f32.mrf.mxu3  ;;  %v845_v46 = vadd.f32 %v844_v29, %v4196_v5  ;;  %v893_v45 = vpop.f32.mrf.mxu1 }
 0x125   : > { %v989_v47 = vadd.f32 %v988_v54, %v940_v53  ;;  %1039 = vmatmul.bf16.gmra.mxu0 %v4178_v0  ;;  %v894_v57 = vadd.f32 %v893_v45, %v845_v46  ;;  %v4267_v0 = vperm.slane %v4193_v4, 1 }
 0x126   : > { %1088 = vmatmul.bf16.gmra.mxu1 %v4180_v1 }
 0x127   : > { %1205 = vst [vmem:[%s4207_s27 + $0x68] sm:$0xff] %v989_v47  ;;  %1137 = vmatmul.bf16.gmra.mxu2 %v4182_v2 }
 0x128   : > { %1186 = vmatmul.bf16.gmra.mxu3 %v4184_v3 }
 0x12a   : > { %v942_v30 = vpop.f32.mrf.mxu2  ;;  %v846_v32 = vpop.f32.mrf.mxu0 }
 0x12b   : > { %v943_v31 = vadd.f32 %v942_v30, %v894_v57  ;;  %v991_v12 = vpop.f32.mrf.mxu3  ;;  %v895_v33 = vpop.f32.mrf.mxu1  ;;  %v847_v14 = vadd.f32 %v846_v32, %v4196_v5 }
 0x12d   : > { %v992_v34 = vadd.f32 %v991_v12, %v943_v31  ;;  %v896_v13 = vadd.f32 %v895_v33, %v847_v14 }
 0x12f   : > { %1206 = vst [vmem:[%s4207_s27 + $0x70] sm:$0xff] %v992_v34 }
 0x132   : > { %v944_v15 = vpop.f32.mrf.mxu2  ;;  %v1005_v1 = vpop.f32.mrf.mxu0 }
 0x133   : > { %v945_v2 = vadd.f32 %v944_v15, %v896_v13  ;;  %v993_v35 = vpop.f32.mrf.mxu3  ;;  %v1006_v3 = vadd.f32 %v1005_v1, %v4267_v0  ;;  %v1054_v36 = vpop.f32.mrf.mxu1 }
 0x135   : > { %v994_v37 = vadd.f32 %v993_v35, %v945_v2  ;;  %v1055_v38 = vadd.f32 %v1054_v36, %v1006_v3 }
 0x137   : > { %1207 = vst [vmem:[%s4207_s27 + $0x78] sm:$0xff] %v994_v37 }
 0x13a   : > { %v1103_v39 = vpop.f32.mrf.mxu2  ;;  %v1007_v24 = vpop.f32.mrf.mxu0 }
 0x13b   : > { %v1104_v55 = vadd.f32 %v1103_v39, %v1055_v38  ;;  %v1152_v56 = vpop.f32.mrf.mxu3  ;;  %v1056_v5 = vpop.f32.mrf.mxu1  ;;  %v1008_v4 = vadd.f32 %v1007_v24, %v4267_v0 }
 0x13d   : > { %v1153_v58 = vadd.f32 %v1152_v56, %v1104_v55  ;;  %v1057_v40 = vadd.f32 %v1056_v5, %v1008_v4 }
 0x13f   : > { %3338 = vtanh.f32 %v1153_v58  ;;  %v3174_v59 = vmul.f32 -1.442695, %v1153_v58 }
 0x141   : > { %3340 = vpow2.f32 %v3174_v59 }
 0x142   : > { %v1105_v60 = vpop.f32.mrf.mxu2  ;;  %v1010_v41 = vpop.f32.mrf.mxu0 }
 0x143   : > { %v1106_v25 = vadd.f32 %v1105_v60, %v1057_v40  ;;  %v1154_v42 = vpop.f32.mrf.mxu3  ;;  %v1011_v27 = vadd.f32 %v1010_v41, %v4267_v0  ;;  %v1059_v61 = vpop.f32.mrf.mxu1 }
 0x145   : > { %v3339_v62 = vpop.eup %3338  ;;  %v1155_v63 = vadd.f32 %v1154_v42, %v1106_v25  ;;  %v1060_v16 = vadd.f32 %v1059_v61, %v1011_v27 }
 0x146   : > { %v1528_v6 = vmul.f32 %v3339_v62, %v4275_v43 }
 0x147   : > { %v3175_v7 = vmul.f32 -1.442695, %v1155_v63  ;;  %3342 = vtanh.f32 %v1155_v63  ;;  %v3341_v49 = vpop.eup %3340 }
 0x148   : > { %1544 = vadd.xlane.f32.xlu0 %v1528_v6  ;;  %v4284_v51 = vadd.f32 1.0, %v3341_v49 }
 0x149   : > { %3344 = vpow2.f32 %v3175_v7 }
 0x14a   : > { %v1108_v17 = vpop.f32.mrf.mxu2  ;;  %v4279_v19 = vpop.f32.mrf.mxu0  ;;  %v1283_v26 = vand.u32 2147483648, %v4284_v51  ;;  %vm1277_vm9 = vweird.f32 %v4284_v51  ;;  %v1281_v61 = vand.u32 2147483647, %v4284_v51 }
 0x14b   : > { %v1109_v8 = vadd.f32 %v1108_v17, %v1060_v16  ;;  %v1157_v18 = vpop.f32.mrf.mxu3  ;;  %v4281_v10 = vpop.f32.mrf.mxu1 }
 0x14c   : > { %v1284_v17 = vor.u32 1.1754944e-38, %v1283_v26  ;;  %vm1282_vm11 = vcmp.eq.f32.partialorder %v1281_v61, 8.507059e+37 }
 0x14d   : > { %v3343_v9 = vpop.eup %3342  ;;  %v1158_v11 = vadd.f32 %v1157_v18, %v1109_v8  ;;  %v1013_v18 = vadd.f32 %v4279_v19, %v4267_v0 }
 0x14e   : > { %v1529_v20 = vmul.f32 %v3343_v9, %v4275_v43 }
 0x14f   : > { %v3345_v21 = vpop.eup %3344  ;;  %v3176_v22 = vmul.f32 -1.442695, %v1158_v11  ;;  %3346 = vtanh.f32 %v1158_v11 }
 0x150   : > { %v1257_v50 = vadd.f32 1.0, %v3345_v21  ;;  %1546 = vadd.xlane.f32.xlu0 %v1529_v20  ;;  %v1062_v20 = vadd.f32 %v4281_v10, %v1013_v18 }
 0x151   : > { %3348 = vpow2.f32 %v3176_v22 }
 0x152   : > { %3350 = vrcp.f32 %v1257_v50  ;;  %v4286_v52 = vpop.f32.mrf.mxu2  ;;  %v4290_v28 = vpop.f32.mrf.mxu0  ;;  %v1298_v32 = vand.u32 2147483648, %v1257_v50  ;;  %v1296_v14 = vand.u32 2147483647, %v1257_v50  ;;  %vm1292_vm1 = vweird.f32 %v1257_v50 }
 0x153   : > { %v4288_v23 = vpop.f32.mrf.mxu3  ;;  %3352 = vrcp.f32 %v4284_v51  ;;  %v4293_v48 = vpop.f32.mrf.mxu1  ;;  %v1016_v49 = vadd.f32 %v4290_v28, %v4267_v0  ;;  %v1111_v19 = vadd.f32 %v4286_v52, %v1062_v20 }
 0x154   : > { %v1299_v35 = vor.u32 1.1754944e-38, %v1298_v32  ;;  %vm1297_vm3 = vcmp.eq.f32.partialorder %v1296_v14, 8.507059e+37 }
 0x155   : > { %v3347_v44 = vpop.eup %3346  ;;  %v1065_v21 = vadd.f32 %v4293_v48, %v1016_v49  ;;  %v1160_v48 = vadd.f32 %v4288_v23, %v1111_v19 }
 0x156   : > { %v1530_v53 = vmul.f32 %v3347_v44, %v4275_v43 }
 0x157   : > { %v3349_v54 = vpop.eup %3348 }
 0x158   : > { %v3351_v29 = vpop.eup %3350  ;;  %v1258_v46 = vadd.f32 1.0, %v3349_v54  ;;  %1548 = vadd.xlane.f32.xlu1 %v1530_v53 }
 0x159   : > { %v1288_v45 = vmul.f32 %v3351_v29, %v1257_v50  ;;  %v3353_v47 = vpop.eup %3352  ;;  %vm1293_vm0 = vweird.f32 %v3351_v29 }
 0x15a   : > { %3354 = vrcp.f32 %v1258_v46  ;;  %v4296_v57 = vpop.f32.mrf.mxu2  ;;  %v4300_v12 = vpop.f32.mrf.mxu0  ;;  %v1273_v13 = vmul.f32 %v3353_v47, %v4284_v51  ;;  %vm1294_vm2 = vmor %vm1292_vm1, %vm1293_vm0  ;;  %v1313_v24 = vand.u32 2147483648, %v1258_v46  ;;  %v1311_v4 = vand.u32 2147483647, %v1258_v46 }
 0x15b   : > { %v1289_v30 = vsub.f32 1.0, %v1288_v45  ;;  %v4298_v31 = vpop.f32.mrf.mxu3  ;;  %v4302_v33 = vpop.f32.mrf.mxu1  ;;  %vm1307_vm5 = vweird.f32 %v1258_v46  ;;  %vm1278_vm8 = vweird.f32 %v3353_v47  ;;  %v1018_v28 = vadd.f32 %v4300_v12, %v4267_v0 }
 0x15c   : > { %v1274_v36 = vsub.f32 1.0, %v1273_v13  ;;  %v1314_v60 = vor.u32 1.1754944e-38, %v1313_v24  ;;  %vm1312_vm7 = vcmp.eq.f32.partialorder %v1311_v4, 8.507059e+37  ;;  %vm1279_vm10 = vmor %vm1277_vm9, %vm1278_vm8  ;;  %v3177_v12 = vmul.f32 -1.442695, %v1160_v48 }
 0x15d   : > { %v1290_v34 = vmul.f32 %v3351_v29, %v1289_v30  ;;  %v1067_v45 = vadd.f32 %v4302_v33, %v1018_v28 }
 0x15e   : > { %v1275_v40 = vmul.f32 %v3353_v47, %v1274_v36 }
 0x15f   : > { %v1291_v15 = vadd.f32 %v3351_v29, %v1290_v34 }
 0x160   : > { %v3355_v2 = vpop.eup %3354  ;;  %v1276_v42 = vadd.f32 %v3353_v47, %v1275_v40 }
 0x161   : > { %v1295_v1 = vsel %vm1294_vm2, %v3351_v29, %v1291_v15  ;;  %v1303_v3 = vmul.f32 %v3355_v2, %v1258_v46  ;;  %vm1308_vm4 = vweird.f32 %v3355_v2  ;;  %v1114_v46 = vadd.f32 %v4296_v57, %v1065_v21 }
 0x162   : > { %v4305_v37 = vsel %vm1297_vm3, %v1299_v35, %v1295_v1  ;;  %v4307_v38 = vpop.f32.mrf.mxu2  ;;  %v1020_v56 = vpop.f32.mrf.mxu0  ;;  %vm1309_vm6 = vmor %vm1307_vm5, %vm1308_vm4  ;;  %v1280_v16 = vsel %vm1279_vm10, %v3353_v47, %v1276_v42 }
 0x163   : > { %2245 = vperm.xlu2 %3336, %v4305_v37   ;;  %v1304_v39 = vsub.f32 1.0, %v1303_v3  ;;  %v4310_v55 = vpop.f32.mrf.mxu3  ;;  %v1069_v5 = vpop.f32.mrf.mxu1  ;;  %v4323_v9 = vsel %vm1282_vm11, %v1284_v17, %v1280_v16  ;;  %v1021_v10 = vadd.f32 %v1020_v56, %v4267_v0  ;;  %v1163_v30 = vadd.f32 %v4298_v31, %v1114_v46 }
 0x164   : > { %v1116_v57 = vadd.f32 %v4307_v38, %v1067_v45 }
 0x165   : > { %v1305_v58 = vmul.f32 %v3355_v2, %v1304_v39  ;;  %v1070_v14 = vadd.f32 %v1069_v5, %v1021_v10  ;;  %3356 = vtanh.f32 %v1163_v30  ;;  %v3178_v33 = vmul.f32 -1.442695, %v1163_v30 }
 0x166   : > { %3358 = vpow2.f32 %v3177_v12  ;;  %v1165_v1 = vadd.f32 %v4310_v55, %v1116_v57 }
 0x167   : > { %v1306_v59 = vadd.f32 %v3355_v2, %v1305_v58  ;;  %3360 = vpow2.f32 %v3178_v33 }
 0x168   : > { %v3179_v5 = vmul.f32 -1.442695, %v1165_v1  ;;  %3362 = vtanh.f32 %v1165_v1 }
 0x169   : > { %v1310_v25 = vsel %vm1309_vm6, %v3355_v2, %v1306_v59 }
 0x16a   : > { %v4312_v41 = vsel %vm1312_vm7, %v1314_v60, %v1310_v25  ;;  %v1118_v27 = vpop.f32.mrf.mxu2  ;;  %v1022_v63 = vpop.f32.mrf.mxu0 }
 0x16b   : > { %2250 = vperm.xlu0 %3337, %v4312_v41   ;;  %v1167_v62 = vpop.f32.mrf.mxu3  ;;  %v1023_v6 = vadd.f32 %v1022_v63, %v4267_v0  ;;  %v1071_v7 = vpop.f32.mrf.mxu1  ;;  %v1119_v23 = vadd.f32 %v1118_v27, %v1070_v14 }
 0x16c   : > { %v3357_v56 = vpop.eup %3356 }
 0x16d   : > { %v1072_v8 = vadd.f32 %v1071_v7, %v1023_v6  ;;  %v4344_v39 = vadd.f32 %v1167_v62, %v1119_v23  ;;  %v3359_v58 = vpop.eup %3358  ;;  %v1532_v38 = vmul.f32 %v3357_v56, %v4275_v43 }
 0x16e   : > { %v4348_v40 = vadd.f32 1.0, %v3359_v58  ;;  %v3361_v55 = vpop.eup %3360 }
 0x16f   : > { %3364 = vtanh.f32 %v4344_v39  ;;  %v3363_v59 = vpop.eup %3362  ;;  %v4355_v62 = vadd.f32 1.0, %v3361_v55 }
 0x170   : > { %v1533_v27 = vmul.f32 %v3363_v59, %v4275_v43  ;;  %v1328_v30 = vand.u32 2147483648, %v4348_v40  ;;  %vm1322_vm13 = vweird.f32 %v4348_v40  ;;  %v1326_v14 = vand.u32 2147483647, %v4348_v40 }
 0x171   : > { %2240 = vperm.xlu1 %3335, %v4323_v9   ;;  %vm1337_vm5 = vweird.f32 %v4355_v62  ;;  %v1343_v58 = vand.u32 2147483648, %v4355_v62  ;;  %v1341_v59 = vand.u32 2147483647, %v4355_v62 }
 0x172   : > { %v1120_v11 = vpop.f32.mrf.mxu2  ;;  %v1025_v50 = vpop.f32.mrf.mxu0  ;;  %v1329_v23 = vor.u32 1.1754944e-38, %v1328_v30  ;;  %vm1327_vm2 = vcmp.eq.f32.partialorder %v1326_v14, 8.507059e+37 }
 0x173   : > { %v1121_v22 = vadd.f32 %v1120_v11, %v1072_v8  ;;  %v1169_v51 = vpop.f32.mrf.mxu3  ;;  %v1026_v44 = vadd.f32 %v1025_v50, %v4267_v0  ;;  %v1074_v53 = vpop.f32.mrf.mxu1  ;;  %vm1342_vm11 = vcmp.eq.f32.partialorder %v1341_v59, 8.507059e+37 }
 0x175   : > { %v4330_v54 = vadd.f32 %v1169_v51, %v1121_v22  ;;  %v1075_v29 = vadd.f32 %v1074_v53, %v1026_v44  ;;  %v3365_v60 = vpop.eup %3364 }
 0x176   : > { %v1534_v61 = vmul.f32 %v3365_v60, %v4275_v43 }
 0x17a   : > { %v1123_v47 = vpop.f32.mrf.mxu2  ;;  %v1027_v52 = vpop.f32.mrf.mxu0 }
 0x17b   : > { %v1124_v32 = vadd.f32 %v1123_v47, %v1075_v29  ;;  %v1172_v34 = vpop.f32.mrf.mxu3  ;;  %v1028_v13 = vadd.f32 %v1027_v52, %v4267_v0  ;;  %v1076_v15 = vpop.f32.mrf.mxu1 }
 0x17d   : > { %v4340_v2 = vadd.f32 %v1172_v34, %v1124_v32  ;;  %v1077_v35 = vadd.f32 %v1076_v15, %v1028_v13 }
 0x182   : > { %v1125_v31 = vpop.f32.mrf.mxu2  ;;  %v1030_v7 = vpop.f32.mrf.mxu0 }
 0x183   : > { %v1126_v3 = vadd.f32 %v1125_v31, %v1077_v35  ;;  %v1174_v36 = vpop.f32.mrf.mxu3  ;;  %v1031_v17 = vadd.f32 %v1030_v7, %v4267_v0  ;;  %v1079_v18 = vpop.f32.mrf.mxu1 }
 0x185   : > { %v1175_v24 = vadd.f32 %v1174_v36, %v1126_v3  ;;  %v4364_v11 = vadd.f32 %v1079_v18, %v1031_v17 }
 0x187   : > { %v3183_v4 = vmul.f32 -1.442695, %v1175_v24 }
 0x189   : > { %3366 = vpow2.f32 %v3183_v4 }
 0x18a   : > { %3368 = vpow2.f32 %v3179_v5  ;;  %v4374_v10 = vpop.f32.mrf.mxu2 }
 0x18b   : > { %3370 = vrcp.f32 %v4348_v40  ;;  %v4379_v52 = vpop.f32.mrf.mxu3  ;;  %v1081_v15 = vpop.f32.mrf.mxu1 }
 0x18c   : > { %1552 = vadd.xlane.f32.xlu2 %v1532_v38  ;;  %3372 = vtanh.f32 %v1160_v48  ;;  %v4376_v48 = vpop.f32.mrf.mxu0 }
 0x18d   : > { %3374 = vtanh.f32 %v1175_v24 }
 0x18f   : > { %v3367_v25 = vpop.eup %3366 }
 0x190   : > { %v3369_v42 = vpop.eup %3368  ;;  %v4351_v26 = vadd.f32 1.0, %v3367_v25 }
 0x191   : > { %v4358_v63 = vadd.f32 1.0, %v3369_v42  ;;  %v3371_v6 = vpop.eup %3370 }
 0x192   : > { %3376 = vrcp.f32 %v4351_v26  ;;  %v3373_v16 = vpop.eup %3372  ;;  %v1318_v49 = vmul.f32 %v3371_v6, %v4348_v40  ;;  %vm1323_vm12 = vweird.f32 %v3371_v6  ;;  %vm1412_vm14 = vweird.f32 %v4351_v26  ;;  %v4396_v56 = vpop.f32.mrf.mxu2 }
 0x193   : > { %v3375_v8 = vpop.eup %3374  ;;  %3378 = vrcp.f32 %v4355_v62  ;;  %v1531_v21 = vmul.f32 %v3373_v16, %v4275_v43  ;;  %vm1324_vm0 = vmor %vm1322_vm13, %vm1323_vm12  ;;  %v1418_v13 = vand.u32 2147483648, %v4351_v26  ;;  %v1416_v35 = vand.u32 2147483647, %v4351_v26  ;;  %v4412_v42 = vpop.f32.mrf.mxu3 }
 0x194   : > { %1554 = vadd.xlane.f32.xlu2 %v1533_v27  ;;  %3380 = vrcp.f32 %v4358_v63  ;;  %v1537_v22 = vmul.f32 %v3375_v8, %v4275_v43  ;;  %v1319_v51 = vsub.f32 1.0, %v1318_v49  ;;  %vm1352_vm3 = vweird.f32 %v4358_v63  ;;  %v1035_v60 = vpop.f32.mrf.mxu0  ;;  %v1084_v7 = vpop.f32.mrf.mxu1 }
 0x195   : > { %1556 = vadd.xlane.f32.xlu0 %v1534_v61  ;;  %v1419_v36 = vor.u32 1.1754944e-38, %v1418_v13  ;;  %vm1417_vm7 = vcmp.eq.f32.partialorder %v1416_v35, 8.507059e+37  ;;  %v1358_v5 = vand.u32 2147483648, %v4358_v63  ;;  %v1356_v40 = vand.u32 2147483647, %v4358_v63 }
 0x196   : > { %v1320_v19 = vmul.f32 %v3371_v6, %v1319_v51  ;;  %v1344_v27 = vor.u32 1.1754944e-38, %v1343_v58  ;;  %v1036_v61 = vadd.f32 %v1035_v60, %v4267_v0  ;;  %v4430_v51 = vld [vmem:[%s5408_s2 + $0x2] ss:$0 sm:$0xff]  ;;  %vm1592_vm12 = vcmask 7168  }
 0x197   : > { %vm1357_vm10 = vcmp.eq.f32.partialorder %v1356_v40, 8.507059e+37 }
 0x198   : > { %v3377_v20 = vpop.eup %3376  ;;  %v1321_v45 = vadd.f32 %v3371_v6, %v1320_v19  ;;  %v1085_v17 = vadd.f32 %v1084_v7, %v1036_v61 }
 0x199   : > { %v1408_v50 = vmul.f32 %v3377_v20, %v4351_v26  ;;  %v4369_v44 = vpop.eup %3378  ;;  %vm1413_vm15 = vweird.f32 %v3377_v20  ;;  %v1359_v26 = vor.u32 1.1754944e-38, %v1358_v5 }
 0x19a   : > { %v3381_v53 = vpop.eup %3380  ;;  %v1333_v46 = vmul.f32 %v4369_v44, %v4355_v62  ;;  %v1325_v12 = vsel %vm1324_vm0, %v3371_v6, %v1321_v45  ;;  %vm4386_vm1 = vmor %vm1412_vm14, %vm1413_vm15  ;;  %vm1338_vm6 = vweird.f32 %v4369_v44  ;;  %v1133_v8 = vpop.f32.mrf.mxu2 }
 0x19b   : > { %1550 = vadd.xlane.f32.xlu1 %v1531_v21  ;;  %v1409_v28 = vsub.f32 1.0, %v1408_v50  ;;  %v1348_v29 = vmul.f32 %v3381_v53, %v4358_v63  ;;  %vm1353_vm4 = vweird.f32 %v3381_v53  ;;  %v4392_v3 = vsel %vm1327_vm2, %v1329_v23, %v1325_v12  ;;  %vm1339_vm9 = vmor %vm1337_vm5, %vm1338_vm6  ;;  %v1182_v49 = vpop.f32.mrf.mxu3 }
 0x19c   : > { %v1334_v34 = vsub.f32 1.0, %v1333_v46  ;;  %vm4403_vm8 = vmor %vm1352_vm3, %vm1353_vm4  ;;  %v1134_v18 = vadd.f32 %v1133_v8, %v1085_v17  ;;  %v1129_v50 = vadd.f32 %v4374_v10, %v4364_v11  ;;  %v3180_v11 = vmul.f32 -1.442695, %v4344_v39  ;;  %v1037_v40 = vpop.f32.mrf.mxu0 }
 0x19d   : > { %1562 = vadd.xlane.f32.xlu0 %v1537_v22  ;;  %v1410_v47 = vmul.f32 %v3377_v20, %v1409_v28  ;;  %v1349_v32 = vsub.f32 1.0, %v1348_v29  ;;  %v3181_v28 = vmul.f32 -1.442695, %v4330_v54 }
 0x19e   : > { %v1335_v31 = vmul.f32 %v4369_v44, %v1334_v34  ;;  %v1183_v21 = vadd.f32 %v1182_v49, %v1134_v18  ;;  %v4439_v29 = vadd.f32 %v4379_v52, %v1129_v50 }
 0x19f   : > { %v1411_v57 = vadd.f32 %v3377_v20, %v1410_v47  ;;  %v1350_v1 = vmul.f32 %v3381_v53, %v1349_v32 }
 0x1a0   : > { %v1336_v55 = vadd.f32 %v4369_v44, %v1335_v31  ;;  %v3186_v22 = vmul.f32 -1.442695, %v1183_v21 }
 0x1a1   : > { %v1415_v24 = vsel %vm4386_vm1, %v3377_v20, %v1411_v57  ;;  %v1351_v4 = vadd.f32 %v3381_v53, %v1350_v1 }
 0x1a2   : > { %v4410_v25 = vsel %vm1417_vm7, %v1419_v36, %v1415_v24  ;;  %v1340_v63 = vsel %vm1339_vm9, %v4369_v44, %v1336_v55  ;;  %v1033_v44 = vadd.f32 %v4376_v48, %v4267_v0  ;;  %3382 = vpow2.f32 %v3186_v22  ;;  %v1135_v22 = vpop.f32.mrf.mxu2 }
 0x1a3   : > { %v1355_v6 = vsel %vm4403_vm8, %v3381_v53, %v1351_v4  ;;  %v4421_v16 = vsel %vm1342_vm11, %v1344_v27, %v1340_v63  ;;  %3384 = vpow2.f32 %v3181_v28  ;;  %v1038_v63 = vadd.f32 %v1037_v40, %v4267_v0 }
 0x1a4   : > { %v4419_v62 = vsel %vm1357_vm10, %v1359_v26, %v1355_v6  ;;  %v1082_v46 = vadd.f32 %v1081_v15, %v1033_v44  ;;  %3386 = vpow2.f32 %v3180_v11  ;;  %v1086_v26 = vpop.f32.mrf.mxu1 }
 0x1a5   : > { %3388 = vtanh.f32 %v1183_v21  ;;  %v1087_v21 = vadd.f32 %v1086_v26, %v1038_v63 }
 0x1a6   : > { %3390 = vtanh.f32 %v4340_v2  ;;  %v1131_v61 = vadd.f32 %v4396_v56, %v1082_v46  ;;  %v1184_v46 = vpop.f32.mrf.mxu3 }
 0x1a7   : > { %v1136_v44 = vadd.f32 %v1135_v22, %v1087_v21 }
 0x1a8   : > { %v3383_v30 = vpop.eup %3382  ;;  %v4472_v18 = vadd.f32 %v4412_v42, %v1131_v61 }
 0x1a9   : > { %v4446_v14 = vadd.f32 1.0, %v3383_v30  ;;  %v3385_v15 = vpop.eup %3384 }
 0x1aa   : > { %v4452_v35 = vadd.f32 1.0, %v3385_v15  ;;  %v3387_v33 = vpop.eup %3386 }
 0x1ab   : > { %3392 = vrcp.f32 %v4446_v14  ;;  %v3389_v31 = vpop.eup %3388  ;;  %v4455_v58 = vadd.f32 1.0, %v3387_v33  ;;  %vm1457_vm13 = vweird.f32 %v4446_v14  ;;  %v1463_v30 = vand.u32 2147483648, %v4446_v14 }
 0x1ac   : > { %2255 = vperm.xlu2 %3336, %v4392_v3   ;;  %3394 = vtanh.f32 %v4330_v54  ;;  %v3391_v36 = vpop.eup %3390  ;;  %v1540_v38 = vmul.f32 %v3389_v31, %v4275_v43  ;;  %vm1382_vm1 = vweird.f32 %v4452_v35 }
 0x1ad   : > { %3396 = vrcp.f32 %v4452_v35  ;;  %v1536_v59 = vmul.f32 %v3391_v36, %v4275_v43  ;;  %vm1367_vm3 = vweird.f32 %v4455_v58  ;;  %v1371_v26 = vand.u32 2147483647, %v4455_v58 }
 0x1af   : > { %vm1372_vm8 = vcmp.eq.f32.partialorder %v1371_v26, 8.507059e+37 }
 0x1b1   : > { %2285 = vperm.xlu0 %3337, %v4410_v25   ;;  %v3393_v5 = vpop.eup %3392 }
 0x1b2   : > { %v3395_v55 = vpop.eup %3394  ;;  %v1453_v60 = vmul.f32 %v3393_v5, %v4446_v14  ;;  %vm1458_vm14 = vweird.f32 %v3393_v5 }
 0x1b3   : > { %v4462_v27 = vpop.eup %3396  ;;  %v1535_v6 = vmul.f32 %v3395_v55, %v4275_v43  ;;  %vm1459_vm15 = vmor %vm1457_vm13, %vm1458_vm14 }
 0x1b4   : > { %2265 = vperm.xlu2 %3336, %v4419_v62   ;;  %2260 = vperm.xlu1 %3335, %v4421_v16   ;;  %v1454_v17 = vsub.f32 1.0, %v1453_v60  ;;  %v1378_v56 = vmul.f32 %v4462_v27, %v4452_v35  ;;  %vm1383_vm2 = vweird.f32 %v4462_v27 }
 0x1b5   : > { %vm4510_vm5 = vmor %vm1382_vm1, %vm1383_vm2 }
 0x1b6   : > { %v1455_v28 = vmul.f32 %v3393_v5, %v1454_v17  ;;  %v1379_v11 = vsub.f32 1.0, %v1378_v56 }
 0x1bb   : > { %v4425_v20 = vpop.xlane.xlu0 %1544 }
 0x1bc   : > { %v4508_v55 = vadd.f32 %v4425_v20, %v4430_v51 }
 0x1c3   : > { %v1547_v53 = vpop.xlane.xlu0 %1546 }
 0x1c4   : > { %v1577_v19 = vadd.f32 %v1547_v53, %v4430_v51  ;;  %v4478_v53 = vpop.f32.mrf.mxu0 }
 0x1c6   : > { %v1600_v45 = vsel %vm1592_vm12, %v1577_v19, -inf }
 0x1c7   : > { %v1601_v47 = vrot.slane %v1600_v45, 4 }
 0x1c9   : > { %v1602_v10 = vmax.f32 %v1600_v45, %v1601_v47  ;;  %v4480_v47 = vadd.f32 %v1184_v46, %v1136_v44 }
 0x1cb   : > { %v1603_v48 = vrot.slane %v1602_v10, 2  ;;  %v1549_v32 = vpop.xlane.xlu1 %1548 }
 0x1cc   : > { %v4444_v34 = vadd.f32 %v1549_v32, %v4430_v51  ;;  %v1456_v32 = vadd.f32 %v3393_v5, %v1455_v28  ;;  %v1042_v31 = vpop.f32.mrf.mxu0 }
 0x1cd   : > { %v1604_v13 = vmax.f32 %v1602_v10, %v1603_v48  ;;  %v4486_v10 = vpop.f32.mrf.mxu1  ;;  %v1043_v40 = vadd.f32 %v1042_v31, %v4267_v0 }
 0x1ce   : > { %v1607_v52 = vsel %vm1592_vm12, %v4444_v34, -inf  ;;  %v1460_v33 = vsel %vm1459_vm15, %v3393_v5, %v1456_v32 }
 0x1cf   : > { %v1605_v12 = vrot.slane %v1604_v13, 1  ;;  %v1608_v39 = vrot.slane %v1607_v52, 4 }
 0x1d1   : > { %v1606_v57 = vmax.f32 %v1604_v13, %v1605_v12  ;;  %v1609_v23 = vmax.f32 %v1607_v52, %v1608_v39  ;;  %v1461_v13 = vand.u32 2147483647, %v4446_v14  ;;  %v1464_v12 = vor.u32 1.1754944e-38, %v1463_v30 }
 0x1d2   : > { %v1380_v39 = vmul.f32 %v4462_v27, %v1379_v11 }
 0x1d3   : > { %v1706_v1 = vsub.f32 %v1577_v19, %v1606_v57  ;;  %v1610_v4 = vrot.slane %v1609_v23, 2  ;;  %v4491_v57 = vpop.f32.mrf.mxu2  ;;  %vm1462_vm0 = vcmp.eq.f32.partialorder %v1461_v13, 8.507059e+37 }
 0x1d4   : > { %v4496_v36 = vsel %vm1462_vm0, %v1464_v12, %v1460_v33 }
 0x1d5   : > { %v1723_v24 = vmul.f32 1.442695, %v1706_v1  ;;  %v1611_v54 = vmax.f32 %v1609_v23, %v1610_v4  ;;  %v1388_v4 = vand.u32 2147483648, %v4452_v35  ;;  %v1091_v60 = vpop.f32.mrf.mxu1 }
 0x1d6   : > { %v1092_v17 = vadd.f32 %v1091_v60, %v1043_v40 }
 0x1d7   : > { %3398 = vpow2.f32 %v1723_v24  ;;  %v1612_v49 = vrot.slane %v1611_v54, 1  ;;  %v1386_v24 = vand.u32 2147483647, %v4452_v35  ;;  %v1373_v35 = vand.u32 2147483648, %v4455_v58 }
 0x1d8   : > { %3400 = vrcp.f32 %v4455_v58  ;;  %v1389_v61 = vor.u32 1.1754944e-38, %v1388_v4 }
 0x1d9   : > { %v1613_v45 = vmax.f32 %v1611_v54, %v1612_v49  ;;  %vm1387_vm7 = vcmp.eq.f32.partialorder %v1386_v24, 8.507059e+37  ;;  %v1374_v49 = vor.u32 1.1754944e-38, %v1373_v35 }
 0x1db   : > { %1568 = vadd.xlane.f32.xlu0 %v1540_v38  ;;  %v1707_v52 = vsub.f32 %v4444_v34, %v1613_v45  ;;  %v1381_v34 = vadd.f32 %v4462_v27, %v1380_v39  ;;  %v4501_v38 = vpop.f32.mrf.mxu3  ;;  %v1140_v21 = vpop.f32.mrf.mxu2 }
 0x1dc   : > { %v4539_v45 = vpop.permute.xlu2 %2245 }
 0x1dd   : > { %v4467_v7 = vpop.eup %3398  ;;  %1560 = vadd.xlane.f32.xlu2 %v1536_v59  ;;  %v1725_v1 = vmul.f32 1.442695, %v1707_v52  ;;  %v1385_v63 = vsel %vm4510_vm5, %v4462_v27, %v1381_v34  ;;  %v1141_v27 = vadd.f32 %v1140_v21, %v1092_v17 }
 0x1de   : > { %v1760_v8 = vsel %vm1592_vm12, %v4467_v7, 0.0  ;;  %1558 = vadd.xlane.f32.xlu1 %v1535_v6  ;;  %v4474_v50 = vpop.eup %3400  ;;  %v4532_v56 = vsel %vm1387_vm7, %v1389_v61, %v1385_v63 }
 0x1df   : > { %v1761_v19 = vrot.slane %v1760_v8, 4  ;;  %v1363_v42 = vmul.f32 %v4474_v50, %v4455_v58  ;;  %vm1368_vm4 = vweird.f32 %v4474_v50  ;;  %3402 = vpow2.f32 %v1725_v1 }
 0x1e0   : > { %vm4518_vm6 = vmor %vm1367_vm3, %vm1368_vm4 }
 0x1e1   : > { %v1762_v48 = vadd.f32 %v1761_v19, %v1760_v8  ;;  %v1364_v15 = vsub.f32 1.0, %v1363_v42  ;;  %v1593_v8 = vsel %vm1592_vm12, %v4508_v55, -inf }
 0x1e2   : > { %v1594_v44 = vrot.slane %v1593_v8, 4 }
 0x1e3   : > { %v1763_v23 = vrot.slane %v1762_v48, 2  ;;  %v1365_v14 = vmul.f32 %v4474_v50, %v1364_v15  ;;  %v1189_v46 = vpop.f32.mrf.mxu3 }
 0x1e4   : > { %v1190_v30 = vadd.f32 %v1189_v46, %v1141_v27  ;;  %v4564_v27 = vpop.permute.xlu1 %2240 }
 0x1e5   : > { %v1764_v5 = vadd.f32 %v1763_v23, %v1762_v48  ;;  %v1366_v54 = vadd.f32 %v4474_v50, %v1365_v14  ;;  %v4530_v22 = vpop.eup %3402  ;;  %v3182_v48 = vmul.f32 -1.442695, %v4340_v2  ;;  %v3184_v2 = vmul.f32 -1.442695, %v4439_v29 }
 0x1e6   : > { %v1767_v42 = vsel %vm1592_vm12, %v4530_v22, 0.0  ;;  %v3189_v13 = vmul.f32 -1.442695, %v1190_v30 }
 0x1e7   : > { %v1765_v20 = vrot.slane %v1764_v5, 1  ;;  %v1370_v58 = vsel %vm4518_vm6, %v4474_v50, %v1366_v54  ;;  %v1595_v50 = vmax.f32 %v1593_v8, %v1594_v44  ;;  %v1768_v11 = vrot.slane %v1767_v42, 4 }
 0x1e8   : > { %v4537_v28 = vsel %vm1372_vm8, %v1374_v49, %v1370_v58  ;;  %v4560_v58 = vpop.permute.xlu0 %2250 }
 0x1e9   : > { %v4534_v19 = vadd.f32 %v1765_v20, %v1764_v5  ;;  %v1596_v32 = vrot.slane %v1595_v50, 2  ;;  %v1769_v52 = vadd.f32 %v1768_v11, %v1767_v42 }
 0x1eb   : > { %3404 = vrcp.f32 %v4534_v19  ;;  %v1597_v23 = vmax.f32 %v1595_v50, %v1596_v32  ;;  %v1770_v1 = vrot.slane %v1769_v52, 2  ;;  %v1891_v32 = vand.u32 2147483648, %v4534_v19 }
 0x1ec   : > { %3406 = vpow2.f32 %v3182_v48  ;;  %vm1885_vm10 = vweird.f32 %v4534_v19 }
 0x1ed   : > { %3408 = vpow2.f32 %v3189_v13  ;;  %v1598_v34 = vrot.slane %v1597_v23, 1  ;;  %v1771_v40 = vadd.f32 %v1770_v1, %v1769_v52 }
 0x1ee   : > { %3410 = vpow2.f32 %v3184_v2 }
 0x1ef   : > { %2300 = vperm.xlu0 %3337, %v4496_v36   ;;  %v1599_v61 = vmax.f32 %v1597_v23, %v1598_v34  ;;  %v1772_v63 = vrot.slane %v1771_v40, 1  ;;  %3412 = vtanh.f32 %v1190_v30 }
 0x1f1   : > { %v4546_v15 = vpop.eup %3404  ;;  %v1705_v44 = vsub.f32 %v4508_v55, %v1599_v61  ;;  %v4568_v11 = vadd.f32 %v1772_v63, %v1771_v40  ;;  %v1889_v55 = vand.u32 2147483647, %v4534_v19 }
 0x1f2   : > { %v1881_v33 = vmul.f32 %v4546_v15, %v4534_v19  ;;  %v3407_v4 = vpop.eup %3406  ;;  %vm1886_vm9 = vweird.f32 %v4546_v15  ;;  %v1892_v19 = vor.u32 1.1754944e-38, %v1891_v32 }
 0x1f3   : > { %v3409_v59 = vpop.eup %3408  ;;  %v4554_v26 = vadd.f32 1.0, %v3407_v4  ;;  %vm4574_vm11 = vmor %vm1885_vm10, %vm1886_vm9  ;;  %v1721_v1 = vmul.f32 1.442695, %v1705_v44  ;;  %vm1890_vm13 = vcmp.eq.f32.partialorder %v1889_v55, 8.507059e+37  ;;  %vm1900_vm2 = vweird.f32 %v4568_v11 }
 0x1f4   : > { %v1882_v5 = vsub.f32 1.0, %v1881_v33  ;;  %v4558_v8 = vadd.f32 1.0, %v3409_v59  ;;  %v3411_v48 = vpop.eup %3410 }
 0x1f5   : > { %2275 = vperm.xlu2 %3336, %v4532_v56   ;;  %3414 = vrcp.f32 %v4554_v26  ;;  %v3413_v33 = vpop.eup %3412  ;;  %vm1397_vm1 = vweird.f32 %v4554_v26 }
 0x1f6   : > { %v1883_v20 = vmul.f32 %v4546_v15, %v1882_v5  ;;  %3416 = vrcp.f32 %v4558_v8  ;;  %v1543_v59 = vmul.f32 %v3413_v33, %v4275_v43  ;;  %vm1502_vm14 = vweird.f32 %v4558_v8 }
 0x1f7   : > { %2270 = vperm.xlu1 %3335, %v4537_v28   ;;  %3418 = vtanh.f32 %v4472_v18 }
 0x1f8   : > { %v1884_v50 = vadd.f32 %v4546_v15, %v1883_v20  ;;  %3420 = vrcp.f32 %v4568_v11 }
 0x1ff   : > { %v1553_v12 = vpop.xlane.xlu2 %1552 }
 0x200   : > { %v1580_v39 = vadd.f32 %v1553_v12, %v4430_v51 }
 0x202   : > { %v1621_v31 = vsel %vm1592_vm12, %v1580_v39, -inf }
 0x203   : > { %v1622_v14 = vrot.slane %v1621_v31, 4 }
 0x205   : > { %v1623_v24 = vmax.f32 %v1621_v31, %v1622_v14  ;;  %v1888_v31 = vsel %vm4574_vm11, %v4546_v15, %v1884_v50  ;;  %v4585_v14 = vadd.f32 1.0, %v3411_v48 }
 0x206   : > { %v1893_v5 = vsel %vm1890_vm13, %v1892_v19, %v1888_v31 }
 0x207   : > { %v1624_v35 = vrot.slane %v1623_v24, 2  ;;  %v1555_v60 = vpop.xlane.xlu2 %1554  ;;  %vm1427_vm5 = vweird.f32 %v4585_v14 }
 0x208   : > { %v1581_v54 = vadd.f32 %v1555_v60, %v4430_v51  ;;  %v1557_v4 = vpop.xlane.xlu0 %1556 }
 0x209   : > { %v1625_v6 = vmax.f32 %v1623_v24, %v1624_v35  ;;  %v1041_v24 = vadd.f32 %v4478_v53, %v4267_v0 }
 0x20a   : > { %v1628_v17 = vsel %vm1592_vm12, %v1581_v54, -inf }
 0x20b   : > { %v1626_v49 = vrot.slane %v1625_v6, 1  ;;  %v1629_v21 = vrot.slane %v1628_v17, 4  ;;  %v1090_v53 = vadd.f32 %v4486_v10, %v1041_v24 }
 0x20d   : > { %v1627_v46 = vmax.f32 %v1625_v6, %v1626_v49  ;;  %v1630_v42 = vmax.f32 %v1628_v17, %v1629_v21  ;;  %v1139_v49 = vadd.f32 %v4491_v57, %v1090_v53 }
 0x20e   : > { %v1551_v40 = vpop.xlane.xlu1 %1550 }
 0x20f   : > { %v1709_v30 = vsub.f32 %v1580_v39, %v1627_v46  ;;  %v1631_v13 = vrot.slane %v1630_v42, 2  ;;  %v4583_v39 = vpop.eup %3414  ;;  %v4605_v20 = vadd.f32 %v1551_v40, %v4430_v51  ;;  %v4616_v50 = vadd.f32 %v4501_v38, %v1139_v49 }
 0x210   : > { %v4587_v2 = vpop.eup %3416  ;;  %v1393_v35 = vmul.f32 %v4583_v39, %v4554_v26  ;;  %v1563_v55 = vpop.xlane.xlu0 %1562  ;;  %v1506_v40 = vand.u32 2147483647, %v4558_v8  ;;  %vm1398_vm8 = vweird.f32 %v4583_v39 }
 0x211   : > { %v1729_v12 = vmul.f32 1.442695, %v1709_v30  ;;  %v1632_v23 = vmax.f32 %v1630_v42, %v1631_v13  ;;  %v3419_v60 = vpop.eup %3418  ;;  %v1498_v6 = vmul.f32 %v4587_v2, %v4558_v8  ;;  %v1614_v48 = vsel %vm1592_vm12, %v4605_v20, -inf  ;;  %vm4713_vm11 = vmor %vm1397_vm1, %vm1398_vm8 }
 0x212   : > { %v4598_v0 = vpop.eup %3420  ;;  %v1539_v21 = vmul.f32 %v3419_v60, %v4275_v43  ;;  %v1394_v44 = vsub.f32 1.0, %v1393_v35  ;;  %vm1503_vm15 = vweird.f32 %v4587_v2  ;;  %vm1507_vm4 = vcmp.eq.f32.partialorder %v1506_v40, 8.507059e+37 }
 0x213   : > { %3422 = vpow2.f32 %v1729_v12  ;;  %v1633_v34 = vrot.slane %v1632_v23, 1  ;;  %v1499_v42 = vsub.f32 1.0, %v1498_v6  ;;  %v1896_v32 = vmul.f32 %v4598_v0, %v4568_v11  ;;  %vm4649_vm0 = vmor %vm1502_vm14, %vm1503_vm15 }
 0x214   : > { %3424 = vtanh.f32 %v4439_v29  ;;  %v4601_v29 = vmul.f32 %v4467_v7, %v1893_v5  ;;  %v1395_v52 = vmul.f32 %v4583_v39, %v1394_v44  ;;  %v4637_v5 = vadd.f32 %v1563_v55, %v4430_v51 }
 0x215   : > { %v1634_v15 = vmax.f32 %v1632_v23, %v1633_v34  ;;  %3426 = vpow2.f32 %v1721_v1  ;;  %v1615_v23 = vrot.slane %v1614_v48, 4  ;;  %v1500_v33 = vmul.f32 %v4587_v2, %v1499_v42 }
 0x216   : > { %3428 = vrcp.f32 %v4585_v14  ;;  %v2106_v57 = vmul.f32 %v4601_v29, %v4305_v37  ;;  %v1897_v31 = vsub.f32 1.0, %v1896_v32  ;;  %vm1901_vm3 = vweird.f32 %v4598_v0 }
 0x217   : > { %v1710_v61 = vsub.f32 %v1581_v54, %v1634_v15  ;;  %v4644_v15 = vadd.f32 %v1557_v4, %v4430_v51  ;;  %v1501_v6 = vadd.f32 %v4587_v2, %v1500_v33  ;;  %v4655_v4 = vadd.f32 %v4583_v39, %v1395_v52  ;;  %vm4682_vm7 = vmor %vm1900_vm2, %vm1901_vm3 }
 0x218   : > { %v2128_v19 = vsel %vm1592_vm12, %v2106_v57, 0.0 }
 0x219   : > { %v4607_v63 = vpop.eup %3422  ;;  %v1731_v17 = vmul.f32 1.442695, %v1710_v61  ;;  %1574 = vadd.xlane.f32.xlu0 %v1543_v59  ;;  %v1508_v59 = vand.u32 2147483648, %v4558_v8  ;;  %v1616_v61 = vmax.f32 %v1614_v48, %v1615_v23  ;;  %v1656_v8 = vsel %vm1592_vm12, %v4637_v5, -inf }
 0x21a   : > { %v1781_v54 = vsel %vm1592_vm12, %v4607_v63, 0.0  ;;  %v3425_v46 = vpop.eup %3424  ;;  %v1505_v32 = vsel %vm4649_vm0, %v4587_v2, %v1501_v6  ;;  %v1906_v23 = vand.u32 2147483648, %v4568_v11  ;;  %v1431_v6 = vand.u32 2147483647, %v4585_v14 }
 0x21b   : > { %v1782_v7 = vrot.slane %v1781_v54, 4  ;;  %3430 = vpow2.f32 %v1731_v17  ;;  %v4613_v10 = vpop.eup %3426  ;;  %v1538_v38 = vmul.f32 %v3425_v46, %v4275_v43  ;;  %v2129_v46 = vrot.slane %v2128_v19, 4 }
 0x21c   : > { %v4624_v30 = vpop.eup %3428  ;;  %v1753_v1 = vsel %vm1592_vm12, %v4613_v10, 0.0  ;;  %v1509_v42 = vor.u32 1.1754944e-38, %v1508_v59  ;;  %v1617_v48 = vrot.slane %v1616_v61, 2  ;;  %vm4718_vm13 = vcmp.eq.f32.partialorder %v1431_v6, 8.507059e+37 }
 0x21d   : > { %v1783_v13 = vadd.f32 %v1782_v7, %v1781_v54  ;;  %v1423_v37 = vmul.f32 %v4624_v30, %v4585_v14  ;;  %v1754_v53 = vrot.slane %v1753_v1, 4  ;;  %v1898_v54 = vmul.f32 %v4598_v0, %v1897_v31 }
 0x21e   : > { %1566 = vadd.xlane.f32.xlu2 %v1539_v21  ;;  %v1635_v7 = vsel %vm1592_vm12, %v4644_v15, -inf  ;;  %vm1428_vm6 = vweird.f32 %v4624_v30 }
 0x21f   : > { %v1784_v12 = vrot.slane %v1783_v13, 2  ;;  %v1424_v49 = vsub.f32 1.0, %v1423_v37  ;;  %v1899_v55 = vadd.f32 %v4598_v0, %v1898_v54  ;;  %v1636_v31 = vrot.slane %v1635_v7, 4  ;;  %vm4695_vm9 = vmor %vm1427_vm5, %vm1428_vm6 }
 0x220   : > { %v4675_v37 = vsel %vm1507_vm4, %v1509_v42, %v1505_v32  ;;  %v1755_v2 = vadd.f32 %v1754_v53, %v1753_v1  ;;  %v1433_v53 = vand.u32 2147483648, %v4585_v14  ;;  %v1403_v42 = vand.u32 2147483648, %v4554_v26 }
 0x221   : > { %v4634_v34 = vpop.eup %3430  ;;  %v1785_v24 = vadd.f32 %v1784_v12, %v1783_v13  ;;  %1564 = vadd.xlane.f32.xlu1 %v1538_v38  ;;  %v1657_v13 = vrot.slane %v1656_v8, 4  ;;  %v1425_v52 = vmul.f32 %v4624_v30, %v1424_v49  ;;  %v1904_v12 = vand.u32 2147483647, %v4568_v11 }
 0x222   : > { %v1788_v43 = vsel %vm1592_vm12, %v4634_v34, 0.0  ;;  %v2130_v38 = vadd.f32 %v2129_v46, %v2128_v19  ;;  %v1401_v19 = vand.u32 2147483647, %v4554_v26  ;;  %v1907_v11 = vor.u32 1.1754944e-38, %v1906_v23 }
 0x223   : > { %v1786_v35 = vrot.slane %v1785_v24, 1  ;;  %v1789_v60 = vrot.slane %v1788_v43, 4  ;;  %v1658_v59 = vmax.f32 %v1656_v8, %v1657_v13  ;;  %v1426_v1 = vadd.f32 %v4624_v30, %v1425_v52  ;;  %v4759_v13 = vpop.permute.xlu2 %2255 }
 0x224   : > { %v2131_v17 = vrot.slane %v2130_v38, 2  ;;  %v1637_v49 = vmax.f32 %v1635_v7, %v1636_v31  ;;  %vm1905_vm10 = vcmp.eq.f32.partialorder %v1904_v12, 8.507059e+37  ;;  %v1400_v31 = vsel %vm4713_vm11, %v4583_v39, %v4655_v4 }
 0x225   : > { %v4657_v21 = vadd.f32 %v1786_v35, %v1785_v24  ;;  %v1790_v44 = vadd.f32 %v1789_v60, %v1788_v43  ;;  %v1618_v24 = vmax.f32 %v1616_v61, %v1617_v48  ;;  %v1903_v35 = vsel %vm4682_vm7, %v4598_v0, %v1899_v55 }
 0x226   : > { %v1908_v46 = vsel %vm1905_vm10, %v1907_v11, %v1903_v35  ;;  %v1659_v32 = vrot.slane %v1658_v59, 2  ;;  %v1430_v14 = vsel %vm4695_vm9, %v4624_v30, %v1426_v1  ;;  %v1434_v55 = vor.u32 1.1754944e-38, %v1433_v53 }
 0x227   : > { %3432 = vrcp.f32 %v4657_v21  ;;  %v1791_v57 = vrot.slane %v1790_v44, 2  ;;  %v1619_v8 = vrot.slane %v1618_v24, 1  ;;  %v2132_v52 = vadd.f32 %v2131_v17, %v2130_v38 }
 0x228   : > { %v1934_v30 = vand.u32 2147483647, %v4657_v21  ;;  %v1638_v23 = vrot.slane %v1637_v49, 2  ;;  %v4724_v26 = vmul.f32 %v4530_v22, %v1908_v46  ;;  %vm1930_vm15 = vweird.f32 %v4657_v21 }
 0x229   : > { %v1792_v33 = vadd.f32 %v1791_v57, %v1790_v44  ;;  %v1756_v44 = vrot.slane %v1755_v2, 2  ;;  %v1936_v57 = vand.u32 2147483648, %v4657_v21  ;;  %vm4731_vm0 = vcmp.eq.f32.partialorder %v1401_v19, 8.507059e+37 }
 0x22a   : > { %v4738_v22 = vsel %vm4718_vm13, %v1434_v55, %v1430_v14  ;;  %vm1935_vm2 = vcmp.eq.f32.partialorder %v1934_v30, 8.507059e+37  ;;  %v1639_v4 = vmax.f32 %v1637_v49, %v1638_v23  ;;  %v3185_v38 = vmul.f32 -1.442695, %v4472_v18 }
 0x22b   : > { %v1793_v40 = vrot.slane %v1792_v33, 1  ;;  %v1757_v35 = vadd.f32 %v1756_v44, %v1755_v2  ;;  %v1937_v1 = vor.u32 1.1754944e-38, %v1936_v57 }
 0x22d   : > { %v3433_v60 = vpop.eup %3432  ;;  %2315 = vperm.xlu0 %3337, %v4675_v37   ;;  %v4702_v0 = vadd.f32 %v1793_v40, %v1792_v33  ;;  %v1620_v33 = vmax.f32 %v1618_v24, %v1619_v8  ;;  %v1660_v40 = vmax.f32 %v1658_v59, %v1659_v32  ;;  %v1404_v24 = vor.u32 1.1754944e-38, %v1403_v42 }
 0x22e   : > { %v1926_v54 = vmul.f32 %v3433_v60, %v4657_v21  ;;  %vm1931_vm14 = vweird.f32 %v3433_v60  ;;  %v2133_v21 = vrot.slane %v2132_v52, 1  ;;  %v1758_v53 = vrot.slane %v1757_v35, 1 }
 0x22f   : > { %3434 = vrcp.f32 %v4702_v0  ;;  %vm1932_vm1 = vmor %vm1930_vm15, %vm1931_vm14  ;;  %v1708_v59 = vsub.f32 %v4605_v20, %v1620_v33  ;;  %v1661_v6 = vrot.slane %v1660_v40, 1  ;;  %v4748_v17 = vsel %vm4731_vm0, %v1404_v24, %v1400_v31 }
 0x230   : > { %v1927_v48 = vsub.f32 1.0, %v1926_v54  ;;  %v1640_v54 = vrot.slane %v1639_v4, 1  ;;  %v2134_v49 = vadd.f32 %v2133_v21, %v2132_v52  ;;  %v1951_v44 = vand.u32 2147483648, %v4702_v0 }
 0x231   : > { %v1727_v8 = vmul.f32 1.442695, %v1708_v59  ;;  %v1662_v42 = vmax.f32 %v1660_v40, %v1661_v6  ;;  %vm1945_vm4 = vweird.f32 %v4702_v0  ;;  %v4757_v7 = vadd.f32 %v1758_v53, %v1757_v35 }
 0x232   : > { %v1928_v12 = vmul.f32 %v3433_v60, %v1927_v48  ;;  %v1641_v57 = vmax.f32 %v1639_v4, %v1640_v54 }
 0x233   : > { %3436 = vpow2.f32 %v1727_v8  ;;  %vm1870_vm8 = vweird.f32 %v4757_v7 }
 0x234   : > { %v1929_v43 = vadd.f32 %v3433_v60, %v1928_v12  ;;  %v1714_v12 = vsub.f32 %v4637_v5, %v1662_v42  ;;  %3438 = vrcp.f32 %v4757_v7 }
 0x235   : > { %2348 = vperm.xlu0 %3337, %v4724_v26   ;;  %v3435_v11 = vpop.eup %3434 }
 0x236   : > { %v1933_v39 = vsel %vm1932_vm1, %v3433_v60, %v1929_v43  ;;  %2290 = vperm.xlu2 %3336, %v4738_v22   ;;  %v1941_v2 = vmul.f32 %v3435_v11, %v4702_v0  ;;  %vm1946_vm3 = vweird.f32 %v3435_v11  ;;  %v1739_v43 = vmul.f32 1.442695, %v1714_v12 }
 0x237   : > { %v1938_v19 = vsel %vm1935_vm2, %v1937_v1, %v1933_v39  ;;  %vm1947_vm5 = vmor %vm1945_vm4, %vm1946_vm3  ;;  %v4771_v1 = vpop.permute.xlu0 %2285  ;;  %v4780_v39 = vpop.permute.xlu1 %2260 }
 0x238   : > { %v4744_v61 = vmul.f32 %v4607_v63, %v1938_v19  ;;  %v1942_v60 = vsub.f32 1.0, %v1941_v2  ;;  %v1949_v63 = vand.u32 2147483647, %v4702_v0  ;;  %v1711_v0 = vsub.f32 %v4644_v15, %v1641_v57  ;;  %v4778_v15 = vpop.permute.xlu2 %2265 }
 0x239   : > { %v4767_v40 = vpop.eup %3436  ;;  %3440 = vpow2.f32 %v1739_v43 }
 0x23a   : > { %2280 = vperm.xlu1 %3335, %v4748_v17   ;;  %v2109_v20 = vmul.f32 %v4744_v61, %v4421_v16  ;;  %v1943_v46 = vmul.f32 %v3435_v11, %v1942_v60  ;;  %v1952_v16 = vor.u32 1.1754944e-38, %v1951_v44  ;;  %vm1950_vm6 = vcmp.eq.f32.partialorder %v1949_v63, 8.507059e+37  ;;  %v4773_v24 = vpop.eup %3438 }
 0x23b   : > { %v1733_v35 = vmul.f32 1.442695, %v1711_v0  ;;  %3442 = vpow2.f32 %v3185_v38  ;;  %v1866_v21 = vmul.f32 %v4773_v24, %v4757_v7  ;;  %vm1871_vm7 = vweird.f32 %v4773_v24 }
 0x23c   : > { %v2149_v48 = vsel %vm1592_vm12, %v2109_v20, 0.0  ;;  %v1944_v32 = vadd.f32 %v3435_v11, %v1943_v46  ;;  %vm4827_vm9 = vmor %vm1870_vm8, %vm1871_vm7 }
 0x23d   : > { %2442 = vperm.xlu0 %3337, %v2134_v49   ;;  %v2150_v14 = vrot.slane %v2149_v48, 4  ;;  %3444 = vpow2.f32 %v1733_v35  ;;  %v1867_v60 = vsub.f32 1.0, %v1866_v21 }
 0x23e   : > { %v1948_v55 = vsel %vm1947_vm5, %v3435_v11, %v1944_v32  ;;  %v3187_v11 = vmul.f32 -1.442695, %v4480_v47 }
 0x23f   : > { %v2151_v52 = vadd.f32 %v2150_v14, %v2149_v48  ;;  %v1953_v30 = vsel %vm1950_vm6, %v1952_v16, %v1948_v55  ;;  %v4784_v19 = vpop.eup %3440  ;;  %v1868_v55 = vmul.f32 %v4773_v24, %v1867_v60 }
 0x240   : > { %v4765_v33 = vmul.f32 %v4634_v34, %v1953_v30  ;;  %v1774_v34 = vsel %vm1592_vm12, %v4767_v40, 0.0  ;;  %3446 = vpow2.f32 %v3187_v11  ;;  %v1816_v44 = vsel %vm1592_vm12, %v4784_v19, 0.0 }
 0x241   : > { %v2152_v23 = vrot.slane %v2151_v52, 2  ;;  %v1775_v18 = vrot.slane %v1774_v34, 4  ;;  %v3443_v2 = vpop.eup %3442  ;;  %3448 = vtanh.f32 %v4616_v50 }
 0x242   : > { %v4798_v42 = vadd.f32 1.0, %v3443_v2  ;;  %3450 = vtanh.f32 %v4480_v47 }
 0x243   : > { %v2153_v31 = vadd.f32 %v2152_v23, %v2151_v52  ;;  %v1776_v6 = vadd.f32 %v1775_v18, %v1774_v34  ;;  %v4789_v54 = vpop.eup %3444  ;;  %v1817_v52 = vrot.slane %v1816_v44, 4 }
 0x244   : > { %v1795_v14 = vsel %vm1592_vm12, %v4789_v54, 0.0  ;;  %3452 = vrcp.f32 %v4798_v42  ;;  %vm1442_vm14 = vweird.f32 %v4798_v42 }
 0x245   : > { %2363 = vperm.xlu0 %3337, %v4765_v33   ;;  %v2154_v5 = vrot.slane %v2153_v31, 1  ;;  %v1777_v57 = vrot.slane %v1776_v6, 2  ;;  %v1796_v35 = vrot.slane %v1795_v14, 4  ;;  %v1818_v18 = vadd.f32 %v1817_v52, %v1816_v44 }
 0x246   : > { %v3447_v63 = vpop.eup %3446 }
 0x247   : > { %v2155_v4 = vadd.f32 %v2154_v5, %v2153_v31  ;;  %v4811_v0 = vadd.f32 1.0, %v3447_v63  ;;  %v3188_v31 = vmul.f32 -1.442695, %v4616_v50  ;;  %v1778_v5 = vadd.f32 %v1777_v57, %v1776_v6  ;;  %v3449_v34 = vpop.eup %3448  ;;  %v3498_v63 = vld [vmem:[%s5408_s2 + $0x9] ss:$0 sm:$0xff] }
 0x248   : > { %v1876_v50 = vand.u32 2147483648, %v4757_v7  ;;  %v3451_v6 = vpop.eup %3450 }
 0x249   : > { %3454 = vrcp.f32 %v4811_v0  ;;  %vm1472_vm11 = vweird.f32 %v4811_v0 }
 0x24a   : > { %3456 = vpow2.f32 %v3188_v31 }
 0x24d   : > { %2457 = vperm.xlu0 %3337, %v2155_v4  }
 0x24e   : > { %v1569_v59 = vpop.xlane.xlu0 %1568 }
 0x24f   : > { %v4787_v53 = vadd.f32 %v1569_v59, %v4430_v51  ;;  %v1869_v59 = vadd.f32 %v4773_v24, %v1868_v55 }
 0x250   : > { %v1561_v49 = vpop.xlane.xlu2 %1560 }
 0x251   : > { %v1677_v20 = vsel %vm1592_vm12, %v4787_v53, -inf  ;;  %v4796_v8 = vadd.f32 %v1561_v49, %v4430_v51  ;;  %v1559_v46 = vpop.xlane.xlu1 %1558  ;;  %v1874_v49 = vand.u32 2147483647, %v4757_v7  ;;  %v1873_v7 = vsel %vm4827_vm9, %v4773_v24, %v1869_v59 }
 0x252   : > { %v1678_v48 = vrot.slane %v1677_v20, 4  ;;  %v4802_v32 = vadd.f32 %v1559_v46, %v4430_v51  ;;  %v1779_v46 = vrot.slane %v1778_v5, 1 }
 0x253   : > { %v1649_v16 = vsel %vm1592_vm12, %v4796_v8, -inf  ;;  %vm1875_vm10 = vcmp.eq.f32.partialorder %v1874_v49, 8.507059e+37 }
 0x254   : > { %v1679_v12 = vmax.f32 %v1677_v20, %v1678_v48  ;;  %v1650_v30 = vrot.slane %v1649_v16, 4  ;;  %v1642_v23 = vsel %vm1592_vm12, %v4802_v32, -inf  ;;  %v1797_v20 = vadd.f32 %v1796_v35, %v1795_v14  ;;  %v4834_v14 = vpop.eup %3452 }
 0x255   : > { %v1643_v51 = vrot.slane %v1642_v23, 4  ;;  %v1542_v48 = vmul.f32 %v3498_v63, %v3449_v34  ;;  %v4837_v31 = vpop.eup %3454  ;;  %vm1443_vm15 = vweird.f32 %v4834_v14 }
 0x256   : > { %v1680_v43 = vrot.slane %v1679_v12, 2  ;;  %v1651_v38 = vmax.f32 %v1649_v16, %v1650_v30  ;;  %v1819_v16 = vrot.slane %v1818_v18, 2  ;;  %v1877_v30 = vor.u32 1.1754944e-38, %v1876_v50  ;;  %v3457_v34 = vpop.eup %3456  ;;  %vm4908_vm2 = vmor %vm1442_vm14, %vm1443_vm15 }
 0x257   : > { %v1644_v11 = vmax.f32 %v1642_v23, %v1643_v51  ;;  %v4849_v49 = vadd.f32 1.0, %v3457_v34  ;;  %vm1473_vm13 = vweird.f32 %v4837_v31 }
 0x258   : > { %v1681_v4 = vmax.f32 %v1679_v12, %v1680_v43  ;;  %v1652_v21 = vrot.slane %v1651_v38, 2  ;;  %v1798_v43 = vrot.slane %v1797_v20, 2  ;;  %vm4895_vm0 = vmor %vm1472_vm11, %vm1473_vm13 }
 0x259   : > { %v1645_v47 = vrot.slane %v1644_v11, 2  ;;  %vm1487_vm6 = vweird.f32 %v4849_v49 }
 0x25a   : > { %v1682_v2 = vrot.slane %v1681_v4, 1  ;;  %v1653_v60 = vmax.f32 %v1651_v38, %v1652_v21  ;;  %v4839_v38 = vadd.f32 %v1779_v46, %v1778_v5 }
 0x25b   : > { %v1646_v44 = vmax.f32 %v1644_v11, %v1645_v47  ;;  %v1878_v11 = vsel %vm1875_vm10, %v1877_v30, %v1873_v7 }
 0x25c   : > { %v1683_v55 = vmax.f32 %v1681_v4, %v1682_v2  ;;  %v1654_v52 = vrot.slane %v1653_v60, 1  ;;  %v1820_v4 = vadd.f32 %v1819_v16, %v1818_v18  ;;  %v4844_v50 = vmul.f32 %v4613_v10, %v1878_v11 }
 0x25d   : > { %v1647_v12 = vrot.slane %v1646_v44, 1  ;;  %v1799_v2 = vadd.f32 %v1798_v43, %v1797_v20  ;;  %v1476_v43 = vand.u32 2147483647, %v4811_v0  ;;  %vm1915_vm5 = vweird.f32 %v4839_v38 }
 0x25e   : > { %v1717_v23 = vsub.f32 %v4787_v53, %v1683_v55  ;;  %v1655_v51 = vmax.f32 %v1653_v60, %v1654_v52  ;;  %v1541_v53 = vmul.f32 %v3498_v63, %v3451_v6  ;;  %v1468_v60 = vmul.f32 %v4837_v31, %v4811_v0 }
 0x25f   : > { %v1648_v35 = vmax.f32 %v1646_v44, %v1647_v12  ;;  %1572 = vadd.xlane.f32.xlu2 %v1542_v48  ;;  %v1821_v18 = vrot.slane %v1820_v4, 1  ;;  %v1800_v10 = vrot.slane %v1799_v2, 1  ;;  %v2107_v6 = vmul.f32 %v4724_v26, %v4312_v41 }
 0x260   : > { %v1745_v21 = vmul.f32 1.442695, %v1717_v23  ;;  %v1713_v24 = vsub.f32 %v4796_v8, %v1655_v51  ;;  %v1438_v8 = vmul.f32 %v4834_v14, %v4798_v42  ;;  %v1469_v20 = vsub.f32 1.0, %v1468_v60 }
 0x261   : > { %v1712_v59 = vsub.f32 %v4802_v32, %v1648_v35  ;;  %v2105_v32 = vmul.f32 %v4844_v50, %v4323_v9  ;;  %v4860_v44 = vadd.f32 %v1821_v18, %v1820_v4  ;;  %v4869_v41 = vadd.f32 %v1800_v10, %v1799_v2 }
 0x262   : > { %3458 = vpow2.f32 %v1745_v21  ;;  %v1737_v47 = vmul.f32 1.442695, %v1713_v24  ;;  %v1439_v57 = vsub.f32 1.0, %v1438_v8  ;;  %v2135_v26 = vsel %vm1592_vm12, %v2107_v6, 0.0 }
 0x263   : > { %3460 = vrcp.f32 %v4839_v38  ;;  %v1735_v5 = vmul.f32 1.442695, %v1712_v59  ;;  %v2121_v55 = vsel %vm1592_vm12, %v2105_v32, 0.0  ;;  %v1470_v7 = vmul.f32 %v4837_v31, %v1469_v20 }
 0x264   : > { %3462 = vpow2.f32 %v1737_v47  ;;  %1570 = vadd.xlane.f32.xlu1 %v1541_v53  ;;  %v1440_v35 = vmul.f32 %v4834_v14, %v1439_v57  ;;  %v2136_v34 = vrot.slane %v2135_v26, 4  ;;  %v1478_v24 = vand.u32 2147483648, %v4811_v0 }
 0x265   : > { %3464 = vpow2.f32 %v1735_v5  ;;  %v1471_v59 = vadd.f32 %v4837_v31, %v1470_v7  ;;  %vm4899_vm1 = vcmp.eq.f32.partialorder %v1476_v43, 8.507059e+37  ;;  %v2122_v8 = vrot.slane %v2121_v55, 4 }
 0x266   : > { %3466 = vrcp.f32 %v4849_v49  ;;  %v1441_v18 = vadd.f32 %v4834_v14, %v1440_v35  ;;  %v1479_v0 = vor.u32 1.1754944e-38, %v1478_v24  ;;  %v1448_v57 = vand.u32 2147483648, %v4798_v42 }
 0x267   : > { %3468 = vrcp.f32 %v4860_v44  ;;  %v1446_v7 = vand.u32 2147483647, %v4798_v42  ;;  %v1921_v60 = vand.u32 2147483648, %v4839_v38  ;;  %vm1960_vm11 = vweird.f32 %v4869_v41 }
 0x268   : > { %v4857_v46 = vpop.eup %3458  ;;  %3470 = vrcp.f32 %v4869_v41  ;;  %v1445_v35 = vsel %vm4908_vm2, %v4834_v14, %v1441_v18  ;;  %v1919_v14 = vand.u32 2147483647, %v4839_v38  ;;  %vm2005_vm14 = vweird.f32 %v4860_v44 }
 0x269   : > { %v4862_v63 = vpop.eup %3460  ;;  %v1837_v48 = vsel %vm1592_vm12, %v4857_v46, 0.0  ;;  %vm1447_vm3 = vcmp.eq.f32.partialorder %v1446_v7, 8.507059e+37  ;;  %v1922_v7 = vor.u32 1.1754944e-38, %v1921_v60 }
 0x26a   : > { %v4866_v16 = vpop.eup %3462  ;;  %v1838_v9 = vrot.slane %v1837_v48, 4  ;;  %v1911_v23 = vmul.f32 %v4862_v63, %v4839_v38  ;;  %vm1916_vm4 = vweird.f32 %v4862_v63  ;;  %vm1920_vm9 = vcmp.eq.f32.partialorder %v1919_v14, 8.507059e+37 }
 0x26b   : > { %v1809_v52 = vsel %vm1592_vm12, %v4866_v16, 0.0  ;;  %v4878_v51 = vpop.eup %3464  ;;  %vm4950_vm8 = vmor %vm1915_vm5, %vm1916_vm4 }
 0x26c   : > { %v1839_v12 = vadd.f32 %v1838_v9, %v1837_v48  ;;  %v1810_v30 = vrot.slane %v1809_v52, 4  ;;  %v4884_v11 = vpop.eup %3466  ;;  %v1802_v53 = vsel %vm1592_vm12, %v4878_v51, 0.0  ;;  %v1912_v5 = vsub.f32 1.0, %v1911_v23 }
 0x26d   : > { %v1483_v32 = vmul.f32 %v4884_v11, %v4849_v49  ;;  %v4906_v10 = vpop.eup %3468  ;;  %v1803_v9 = vrot.slane %v1802_v53, 4  ;;  %vm1488_vm7 = vweird.f32 %v4884_v11 }
 0x26e   : > { %v1840_v4 = vrot.slane %v1839_v12, 2  ;;  %v1811_v21 = vadd.f32 %v1810_v30, %v1809_v52  ;;  %v1475_v52 = vsel %vm4895_vm0, %v4837_v31, %v1471_v59  ;;  %v2137_v30 = vadd.f32 %v2136_v34, %v2135_v26  ;;  %vm4967_vm10 = vmor %vm1487_vm6, %vm1488_vm7 }
 0x26f   : > { %v1913_v43 = vmul.f32 %v4862_v63, %v1912_v5  ;;  %v2001_v24 = vmul.f32 %v4906_v10, %v4860_v44  ;;  %v4931_v42 = vsel %vm4899_vm1, %v1479_v0, %v1475_v52  ;;  %v1449_v26 = vor.u32 1.1754944e-38, %v1448_v57 }
 0x270   : > { %v1812_v47 = vrot.slane %v1811_v21, 2  ;;  %v1841_v6 = vadd.f32 %v1840_v4, %v1839_v12  ;;  %v4918_v12 = vpop.eup %3470  ;;  %v1484_v4 = vsub.f32 1.0, %v1483_v32  ;;  %v1804_v34 = vadd.f32 %v1803_v9, %v1802_v53 }
 0x271   : > { %v2138_v59 = vrot.slane %v2137_v30, 2  ;;  %v1956_v2 = vmul.f32 %v4918_v12, %v4869_v41  ;;  %v2002_v53 = vsub.f32 1.0, %v2001_v24  ;;  %v1491_v52 = vand.u32 2147483647, %v4849_v49 }
 0x272   : > { %v1813_v20 = vadd.f32 %v1812_v47, %v1811_v21  ;;  %v4923_v21 = vadd.f32 %v2122_v8, %v2121_v55  ;;  %v1842_v47 = vrot.slane %v1841_v6, 1  ;;  %v1914_v55 = vadd.f32 %v4862_v63, %v1913_v43 }
 0x273   : > { %v1485_v5 = vmul.f32 %v4884_v11, %v1484_v4  ;;  %v4944_v8 = vsel %vm1447_vm3, %v1449_v26, %v1445_v35  ;;  %v4954_v48 = vadd.f32 %v2138_v59, %v2137_v30  ;;  %v1957_v38 = vsub.f32 1.0, %v1956_v2 }
 0x274   : > { %v1814_v23 = vrot.slane %v1813_v20, 1  ;;  %v4942_v18 = vadd.f32 %v1842_v47, %v1841_v6  ;;  %v2124_v32 = vrot.slane %v4923_v21, 2  ;;  %v1493_v6 = vand.u32 2147483648, %v4849_v49 }
 0x275   : > { %v1918_v57 = vsel %vm4950_vm8, %v4862_v63, %v1914_v55  ;;  %v1486_v9 = vadd.f32 %v4884_v11, %v1485_v5  ;;  %vm1961_vm13 = vweird.f32 %v4918_v12  ;;  %vm2006_vm15 = vweird.f32 %v4906_v10 }
 0x276   : > { %v4927_v31 = vadd.f32 %v1814_v23, %v1813_v20  ;;  %v1805_v20 = vrot.slane %v1804_v34, 2  ;;  %v2003_v23 = vmul.f32 %v4906_v10, %v2002_v53  ;;  %v1923_v35 = vsel %vm1920_vm9, %v1922_v7, %v1918_v57  ;;  %vm4991_vm1 = vmor %vm2005_vm14, %vm2006_vm15 }
 0x277   : > { %2305 = vperm.xlu2 %3336, %v4931_v42   ;;  %v1494_v24 = vor.u32 1.1754944e-38, %v1493_v6  ;;  %v1958_v49 = vmul.f32 %v4918_v12, %v1957_v38  ;;  %v2009_v47 = vand.u32 2147483647, %v4860_v44  ;;  %v2011_v26 = vand.u32 2147483648, %v4860_v44  ;;  %vm5010_vm4 = vmor %vm1960_vm11, %vm1961_vm13 }
 0x278   : > { %3472 = vrcp.f32 %v4927_v31  ;;  %v1806_v63 = vadd.f32 %v1805_v20, %v1804_v34  ;;  %v1490_v14 = vsel %vm4967_vm10, %v4884_v11, %v1486_v9  ;;  %vm1492_vm0 = vcmp.eq.f32.partialorder %v1491_v52, 8.507059e+37 }
 0x279   : > { %3474 = vrcp.f32 %v4942_v18  ;;  %v2110_v59 = vmul.f32 %v4765_v33, %v4419_v62  ;;  %v1924_v55 = vmul.f32 %v4767_v40, %v1923_v35  ;;  %v1996_v2 = vand.u32 2147483648, %v4927_v31  ;;  %v4998_v62 = vpop.permute.xlu0 %2300 }
 0x27a   : > { %v1964_v5 = vand.u32 2147483647, %v4869_v41  ;;  %v1807_v11 = vrot.slane %v1806_v63, 1  ;;  %v1994_v20 = vand.u32 2147483647, %v4927_v31  ;;  %v5000_v33 = vsel %vm1492_vm0, %v1494_v24, %v1490_v14 }
 0x27b   : > { %v1959_v40 = vadd.f32 %v4918_v12, %v1958_v49  ;;  %v1966_v6 = vand.u32 2147483648, %v4869_v41  ;;  %v2012_v44 = vor.u32 1.1754944e-38, %v2011_v26  ;;  %vm1990_vm3 = vweird.f32 %v4927_v31 }
 0x27c   : > { %vm2010_vm5 = vcmp.eq.f32.partialorder %v2009_v47, 8.507059e+37  ;;  %v2156_v52 = vsel %vm1592_vm12, %v2110_v59, 0.0  ;;  %v2108_v7 = vmul.f32 %v1924_v55, %v4392_v3  ;;  %v5021_v30 = vadd.f32 %v1807_v11, %v1806_v63  ;;  %v5026_v3 = vpop.permute.xlu2 %2275 }
 0x27d   : > { %2295 = vperm.xlu1 %3335, %v4944_v8   ;;  %vm1995_vm7 = vcmp.eq.f32.partialorder %v1994_v20, 8.507059e+37  ;;  %v1967_v24 = vor.u32 1.1754944e-38, %v1966_v6  ;;  %v2157_v47 = vrot.slane %v2156_v52, 4  ;;  %vm1965_vm8 = vcmp.eq.f32.partialorder %v1964_v5, 8.507059e+37  ;;  %v5045_v5 = vld [vmem:[%s5408_s2 + $0x2] ss:$0 sm:$0xff] }
 0x27e   : > { %v3473_v43 = vpop.eup %3472  ;;  %3476 = vrcp.f32 %v5021_v30  ;;  %vm2050_vm9 = vweird.f32 %v4942_v18  ;;  %vm1975_vm15 = vweird.f32 %v5021_v30 }
 0x27f   : > { %2338 = vperm.xlu2 %3336, %v4844_v50   ;;  %v1986_v4 = vmul.f32 %v3473_v43, %v4927_v31  ;;  %v2004_v50 = vadd.f32 %v4906_v10, %v2003_v23  ;;  %vm1991_vm2 = vweird.f32 %v3473_v43  ;;  %v4996_v0 = vpop.eup %3474  ;;  %v1997_v31 = vor.u32 1.1754944e-38, %v1996_v2 }
 0x280   : > { %vm1992_vm6 = vmor %vm1990_vm3, %vm1991_vm2  ;;  %v2125_v23 = vadd.f32 %v2124_v32, %v4923_v21  ;;  %v2046_v35 = vmul.f32 %v4996_v0, %v4942_v18  ;;  %v1963_v21 = vsel %vm5010_vm4, %v4918_v12, %v1959_v40  ;;  %v2142_v32 = vsel %vm1592_vm12, %v2108_v7, 0.0 }
 0x281   : > { %v1987_v34 = vsub.f32 1.0, %v1986_v4  ;;  %v2008_v9 = vsel %vm4991_vm1, %v4906_v10, %v2004_v50  ;;  %v2140_v10 = vrot.slane %v4954_v48, 1  ;;  %v2143_v12 = vrot.slane %v2142_v32, 4 }
 0x282   : > { %v2013_v49 = vsel %vm2010_vm5, %v2012_v44, %v2008_v9  ;;  %v2047_v14 = vsub.f32 1.0, %v2046_v35  ;;  %v2126_v59 = vrot.slane %v2125_v23, 1  ;;  %vm2051_vm10 = vweird.f32 %v4996_v0 }
 0x283   : > { %v1988_v53 = vmul.f32 %v3473_v43, %v1987_v34  ;;  %v5036_v63 = vmul.f32 %v4784_v19, %v2013_v49  ;;  %v5038_v34 = vpop.permute.xlu1 %2270  ;;  %v2158_v19 = vadd.f32 %v2157_v47, %v2156_v52  ;;  %v2144_v9 = vadd.f32 %v2143_v12, %v2142_v32  ;;  %vm5075_vm11 = vmor %vm2050_vm9, %vm2051_vm10 }
 0x284   : > { %v2048_v20 = vmul.f32 %v4996_v0, %v2047_v14  ;;  %v2127_v6 = vadd.f32 %v2126_v59, %v2125_v23  ;;  %v2054_v35 = vand.u32 2147483647, %v4942_v18 }
 0x285   : > { %2310 = vperm.xlu1 %3335, %v5000_v33   ;;  %v1989_v57 = vadd.f32 %v3473_v43, %v1988_v53  ;;  %v2114_v53 = vmul.f32 %v5036_v63, %v4410_v25  ;;  %v2056_v25 = vand.u32 2147483648, %v4942_v18 }
 0x286   : > { %vm2055_vm13 = vcmp.eq.f32.partialorder %v2054_v35, 8.507059e+37 }
 0x287   : > { %2353 = vperm.xlu2 %3336, %v1924_v55   ;;  %v1993_v41 = vsel %vm1992_vm6, %v3473_v43, %v1989_v57  ;;  %v1968_v55 = vsel %vm1965_vm8, %v1967_v24, %v1963_v21  ;;  %v5057_v57 = vpop.eup %3476  ;;  %v2184_v23 = vsel %vm1592_vm12, %v2114_v53, 0.0  ;;  %v2057_v59 = vor.u32 1.1754944e-38, %v2056_v25 }
 0x288   : > { %v1998_v4 = vsel %vm1995_vm7, %v1997_v31, %v1993_v41  ;;  %v1969_v11 = vmul.f32 %v4789_v54, %v1968_v55  ;;  %v2049_v41 = vadd.f32 %v4996_v0, %v2048_v20  ;;  %v1971_v47 = vmul.f32 %v5057_v57, %v5021_v30 }
 0x289   : > { %v1999_v26 = vmul.f32 %v4866_v16, %v1998_v4  ;;  %v2141_v16 = vadd.f32 %v2140_v10, %v4954_v48  ;;  %vm1976_vm14 = vweird.f32 %v5057_v57 }
 0x28a   : > { %v2111_v31 = vmul.f32 %v1969_v11, %v4537_v28  ;;  %v2053_v18 = vsel %vm5075_vm11, %v4996_v0, %v2049_v41  ;;  %v1972_v53 = vsub.f32 1.0, %v1971_v47  ;;  %vm5109_vm0 = vmor %vm1975_vm15, %vm1976_vm14 }
 0x28b   : > { %v2113_v43 = vmul.f32 %v1999_v26, %v4748_v17  ;;  %2378 = vperm.xlu0 %3337, %v1999_v26  }
 0x28c   : > { %v1575_v50 = vpop.xlane.xlu0 %1574  ;;  %v2163_v0 = vsel %vm1592_vm12, %v2111_v31, 0.0  ;;  %v1973_v41 = vmul.f32 %v5057_v57, %v1972_v53 }
 0x28d   : > { %v2177_v2 = vsel %vm1592_vm12, %v2113_v43, 0.0  ;;  %v5048_v17 = vadd.f32 %v5045_v5, %v1575_v50  ;;  %2343 = vperm.xlu1 %3335, %v4601_v29   ;;  %v2159_v29 = vrot.slane %v2158_v19, 2  ;;  %v2145_v43 = vrot.slane %v2144_v9, 2 }
 0x28e   : > { %v2178_v60 = vrot.slane %v2177_v2, 4 }
 0x28f   : > { %v1698_v48 = vsel %vm1592_vm12, %v5048_v17, -inf  ;;  %2447 = vperm.xlu2 %3336, %v2141_v16   ;;  %v2160_v32 = vadd.f32 %v2159_v29, %v2158_v19  ;;  %v2185_v16 = vrot.slane %v2184_v23, 4 }
 0x290   : > { %v1699_v40 = vrot.slane %v1698_v48, 4  ;;  %v2179_v44 = vadd.f32 %v2178_v60, %v2177_v2 }
 0x291   : > { %v1567_v38 = vpop.xlane.xlu2 %1566  ;;  %v2161_v20 = vrot.slane %v2160_v32, 1 }
 0x292   : > { %v1700_v52 = vmax.f32 %v1698_v48, %v1699_v40  ;;  %v5062_v54 = vadd.f32 %v5045_v5, %v1567_v38  ;;  %v2180_v7 = vrot.slane %v2179_v44, 2  ;;  %v2233_v40 = vlaneseq }
 0x293   : > { %v2058_v38 = vsel %vm2055_vm13, %v2057_v59, %v2053_v18  ;;  %v1979_v59 = vand.u32 2147483647, %v5021_v30 }
 0x294   : > { %v1701_v4 = vrot.slane %v1700_v52, 2  ;;  %v1670_v10 = vsel %vm1592_vm12, %v5062_v54, -inf  ;;  %v1565_v24 = vpop.xlane.xlu1 %1564  ;;  %v2181_v49 = vadd.f32 %v2180_v7, %v2179_v44  ;;  %v2186_v7 = vadd.f32 %v2185_v16, %v2184_v23 }
 0x295   : > { %v1671_v28 = vrot.slane %v1670_v10, 4  ;;  %v5080_v21 = vadd.f32 %v5045_v5, %v1565_v24  ;;  %2437 = vperm.xlu1 %3335, %v2127_v6   ;;  %v5094_v24 = vshrl.u32 %v2233_v40, 7  ;;  %v2164_v23 = vrot.slane %v2163_v0, 4 }
 0x296   : > { %v1702_v14 = vmax.f32 %v1700_v52, %v1701_v4  ;;  %v2182_v50 = vrot.slane %v2181_v49, 1  ;;  %v2146_v52 = vadd.f32 %v2145_v43, %v2144_v9  ;;  %v2162_v4 = vadd.f32 %v2161_v20, %v2160_v32 }
 0x297   : > { %v1672_v55 = vmax.f32 %v1670_v10, %v1671_v28  ;;  %v1663_v12 = vsel %vm1592_vm12, %v5080_v21, -inf  ;;  %2368 = vperm.xlu2 %3336, %v1969_v11   ;;  %v5092_v10 = vmul.f32 %v4857_v46, %v2058_v38  ;;  %v2187_v31 = vrot.slane %v2186_v7, 2 }
 0x298   : > { %v1703_v2 = vrot.slane %v1702_v14, 1  ;;  %v1664_v60 = vrot.slane %v1663_v12, 4  ;;  %v2183_v48 = vadd.f32 %v2182_v50, %v2181_v49  ;;  %v1974_v43 = vadd.f32 %v5057_v57, %v1973_v41 }
 0x299   : > { %v1673_v19 = vrot.slane %v1672_v55, 2  ;;  %v2334_v46 = vadd.s32 8, %v5094_v24  ;;  %v1981_v32 = vand.u32 2147483648, %v5021_v30  ;;  %v5105_v50 = vand.u32 127, %v2233_v40 }
 0x29a   : > { %v1704_v6 = vmax.f32 %v1702_v14, %v1703_v2  ;;  %v1665_v44 = vmax.f32 %v1663_v12, %v1664_v60  ;;  %2477 = vperm.xlu0 %3337, %v2183_v48   ;;  %v2117_v14 = vmul.f32 %v5092_v10, %v4496_v36  ;;  %v1978_v36 = vsel %vm5109_vm0, %v5057_v57, %v1974_v43 }
 0x29b   : > { %v1674_v29 = vmax.f32 %v1672_v55, %v1673_v19  ;;  %v2188_v60 = vadd.f32 %v2187_v31, %v2186_v7  ;;  %vm5118_vm1 = vcmp.eq.s32.totalorder %v5105_v50, %v2334_v46  ;;  %v1982_v30 = vor.u32 1.1754944e-38, %v1981_v32 }
 0x29c   : > { %v1720_v11 = vsub.f32 %v5048_v17, %v1704_v6  ;;  %v1666_v25 = vrot.slane %v1665_v44, 2  ;;  %v2147_v17 = vrot.slane %v2146_v52, 1  ;;  %v2205_v53 = vsel %vm1592_vm12, %v2117_v14, 0.0 }
 0x29d   : > { %v1675_v35 = vrot.slane %v1674_v29, 1  ;;  %2358 = vperm.xlu1 %3335, %v4744_v61   ;;  %vm5127_vm2 = vcmp.eq.s32.totalorder %v5105_v50, %v5094_v24  ;;  %vm1980_vm3 = vcmp.eq.f32.partialorder %v1979_v59, 8.507059e+37  ;;  %v2206_v7 = vrot.slane %v2205_v53, 4 }
 0x29e   : > { %v1751_v49 = vmul.f32 1.442695, %v1720_v11  ;;  %v1667_v47 = vmax.f32 %v1665_v44, %v1666_v25  ;;  %v2148_v12 = vadd.f32 %v2147_v17, %v2146_v52  ;;  %v2320_v20 = vsel %vm5127_vm2, %v4560_v58, 0.0 }
 0x29f   : > { %v1676_v9 = vmax.f32 %v1674_v29, %v1675_v35  ;;  %v5096_v26 = vpop.permute.xlu0 %2315  ;;  %2462 = vperm.xlu2 %3336, %v2162_v4   ;;  %v1983_v44 = vsel %vm1980_vm3, %v1982_v30, %v1978_v36  ;;  %v2189_v11 = vrot.slane %v2188_v60, 1  ;;  %v2207_v4 = vadd.f32 %v2206_v7, %v2205_v53 }
 0x2a0   : > { %3478 = vpow2.f32 %v1751_v49  ;;  %v1668_v28 = vrot.slane %v1667_v47, 1  ;;  %v5144_v58 = vmul.f32 %v4878_v51, %v1983_v44  ;;  %vm2432_vm3 = vcmp.eq.s32.totalorder %v5105_v50, 16 }
 0x2a1   : > { %v1716_v61 = vsub.f32 %v5062_v54, %v1676_v9  ;;  %v2165_v54 = vadd.f32 %v2164_v23, %v2163_v0 }
 0x2a2   : > { %v1669_v16 = vmax.f32 %v1667_v47, %v1668_v28  ;;  %v2190_v47 = vadd.f32 %v2189_v11, %v2188_v60 }
 0x2a3   : > { %v1743_v55 = vmul.f32 1.442695, %v1716_v61  ;;  %v2166_v38 = vrot.slane %v2165_v54, 2  ;;  %v2208_v61 = vrot.slane %v2207_v4, 2 }
 0x2a4   : > { %v1715_v2 = vsub.f32 %v5080_v21, %v1669_v16 }
 0x2a5   : > { %3480 = vpow2.f32 %v1743_v55  ;;  %2452 = vperm.xlu1 %3335, %v2148_v12   ;;  %v2167_v41 = vadd.f32 %v2166_v38, %v2165_v54  ;;  %v2209_v12 = vadd.f32 %v2208_v61, %v2207_v4 }
 0x2a6   : > { %v5123_v19 = vpop.eup %3478  ;;  %v1741_v57 = vmul.f32 1.442695, %v1715_v2 }
 0x2a7   : > { %v1858_v40 = vsel %vm1592_vm12, %v5123_v19, 0.0  ;;  %v2349_v6 = vpop.permute.xlu0 %2348  ;;  %2383 = vperm.xlu2 %3336, %v5036_v63   ;;  %v2168_v51 = vrot.slane %v2167_v41, 1  ;;  %v2210_v60 = vrot.slane %v2209_v12, 1 }
 0x2a8   : > { %v1859_v29 = vrot.slane %v1858_v40, 4  ;;  %3482 = vpow2.f32 %v1741_v57  ;;  %v5139_v52 = vsel %vm5118_vm1, %v2349_v6, %v2320_v20 }
 0x2a9   : > { %v2169_v59 = vadd.f32 %v2168_v51, %v2167_v41  ;;  %v2211_v20 = vadd.f32 %v2210_v60, %v2209_v12 }
 0x2aa   : > { %v1860_v25 = vadd.f32 %v1859_v29, %v1858_v40 }
 0x2ab   : > { %v5141_v0 = vpop.eup %3480 }
 0x2ac   : > { %v1861_v35 = vrot.slane %v1860_v25, 2  ;;  %v1830_v63 = vsel %vm1592_vm12, %v5141_v0, 0.0  ;;  %v5164_v60 = vpop.permute.xlu1 %2280 }
 0x2ad   : > { %v1831_v49 = vrot.slane %v1830_v63, 4  ;;  %2373 = vperm.xlu1 %3335, %v5144_v58  }
 0x2ae   : > { %v5149_v9 = vpop.eup %3482  ;;  %v1862_v23 = vadd.f32 %v1861_v35, %v1860_v25 }
 0x2af   : > { %v1832_v17 = vadd.f32 %v1831_v49, %v1830_v63  ;;  %v1823_v31 = vsel %vm1592_vm12, %v5149_v9, 0.0  ;;  %2482 = vperm.xlu2 %3336, %v2190_v47  }
 0x2b0   : > { %v1863_v28 = vrot.slane %v1862_v23, 1  ;;  %v1824_v43 = vrot.slane %v1823_v31, 4 }
 0x2b1   : > { %v1833_v46 = vrot.slane %v1832_v17, 2 }
 0x2b2   : > { %v1864_v32 = vadd.f32 %v1863_v28, %v1862_v23  ;;  %v1825_v14 = vadd.f32 %v1824_v43, %v1823_v31 }
 0x2b3   : > { %v1834_v16 = vadd.f32 %v1833_v46, %v1832_v17 }
 0x2b4   : > { %3484 = vrcp.f32 %v1864_v32  ;;  %v1826_v55 = vrot.slane %v1825_v14, 2  ;;  %v2101_v40 = vand.u32 2147483648, %v1864_v32  ;;  %vm2095_vm4 = vweird.f32 %v1864_v32 }
 0x2b5   : > { %v1835_v18 = vrot.slane %v1834_v16, 1  ;;  %2467 = vperm.xlu1 %3335, %v2169_v59   ;;  %v2099_v44 = vand.u32 2147483647, %v1864_v32  ;;  %v5158_v59 = vpop.permute.xlu2 %2290 }
 0x2b6   : > { %v1827_v54 = vadd.f32 %v1826_v55, %v1825_v14  ;;  %v2102_v7 = vor.u32 1.1754944e-38, %v2101_v40 }
 0x2b7   : > { %v1836_v2 = vadd.f32 %v1835_v18, %v1834_v16  ;;  %2398 = vperm.xlu2 %3336, %v5092_v10   ;;  %vm2100_vm7 = vcmp.eq.f32.partialorder %v2099_v44, 8.507059e+37 }
 0x2b8   : > { %v1828_v36 = vrot.slane %v1827_v54, 1 }
 0x2b9   : > { %3486 = vrcp.f32 %v1836_v2  ;;  %v2041_v63 = vand.u32 2147483648, %v1836_v2  ;;  %v2039_v23 = vand.u32 2147483647, %v1836_v2  ;;  %vm2035_vm9 = vweird.f32 %v1836_v2 }
 0x2ba   : > { %v3485_v30 = vpop.eup %3484  ;;  %v1829_v53 = vadd.f32 %v1828_v36, %v1827_v54 }
 0x2bb   : > { %v2091_v57 = vmul.f32 %v3485_v30, %v1864_v32  ;;  %vm2096_vm5 = vweird.f32 %v3485_v30  ;;  %v2042_v43 = vor.u32 1.1754944e-38, %v2041_v63  ;;  %vm2040_vm13 = vcmp.eq.f32.partialorder %v2039_v23, 8.507059e+37 }
 0x2bc   : > { %3488 = vrcp.f32 %v1829_v53  ;;  %vm2097_vm6 = vmor %vm2095_vm4, %vm2096_vm5  ;;  %v2026_v28 = vand.u32 2147483648, %v1829_v53  ;;  %v2024_v46 = vand.u32 2147483647, %v1829_v53  ;;  %vm2020_vm14 = vweird.f32 %v1829_v53 }
 0x2bd   : > { %v2092_v6 = vsub.f32 1.0, %v2091_v57  ;;  %vm2433_vm4 = vcmp.eq.s32.totalorder %v5094_v24, 0 }
 0x2be   : > { %v2027_v55 = vor.u32 1.1754944e-38, %v2026_v28  ;;  %vm2025_vm0 = vcmp.eq.f32.partialorder %v2024_v46, 8.507059e+37  ;;  %vm5193_vm5 = vmand %vm2432_vm3, %vm2433_vm4  ;;  %vm2649_vm3 = vcmask 1044484   ;;  %vm2651_vm4 = vcmask 1045509  }
 0x2bf   : > { %v3487_v38 = vpop.eup %3486  ;;  %2497 = vperm.xlu2 %3336, %v2211_v20   ;;  %v2093_v29 = vmul.f32 %v3485_v30, %v2092_v6 }
 0x2c0   : > { %v2031_v11 = vmul.f32 %v3487_v38, %v1836_v2  ;;  %vm2036_vm8 = vweird.f32 %v3487_v38 }
 0x2c1   : > { %v2094_v10 = vadd.f32 %v3485_v30, %v2093_v29  ;;  %vm2037_vm10 = vmor %vm2035_vm9, %vm2036_vm8 }
 0x2c2   : > { %v3489_v25 = vpop.eup %3488  ;;  %v2032_v41 = vsub.f32 1.0, %v2031_v11 }
 0x2c3   : > { %v2098_v35 = vsel %vm2097_vm6, %v3485_v30, %v2094_v10  ;;  %v2016_v4 = vmul.f32 %v3489_v25, %v1829_v53  ;;  %vm2021_vm11 = vweird.f32 %v3489_v25 }
 0x2c4   : > { %v2103_v49 = vsel %vm2100_vm7, %v2102_v7, %v2098_v35  ;;  %v2033_v47 = vmul.f32 %v3487_v38, %v2032_v41  ;;  %vm2022_vm15 = vmor %vm2020_vm14, %vm2021_vm11  ;;  %vm2643_vm11 = vcmask 1041409  }
 0x2c5   : > { %v5155_v17 = vmul.f32 %v5123_v19, %v2103_v49  ;;  %v2017_v31 = vsub.f32 1.0, %v2016_v4 }
 0x2c6   : > { %v2034_v51 = vadd.f32 %v3487_v38, %v2033_v47 }
 0x2c7   : > { %2413 = vperm.xlu2 %3336, %v5155_v17   ;;  %v2018_v61 = vmul.f32 %v3489_v25, %v2017_v31 }
 0x2c8   : > { %v2038_v32 = vsel %vm2037_vm10, %v3487_v38, %v2034_v51 }
 0x2c9   : > { %v2043_v14 = vsel %vm2040_vm13, %v2042_v43, %v2038_v32  ;;  %v2019_v16 = vadd.f32 %v3489_v25, %v2018_v61 }
 0x2ca   : > { %v2044_v19 = vmul.f32 %v5141_v0, %v2043_v14 }
 0x2cb   : > { %v2023_v12 = vsel %vm2022_vm15, %v3489_v25, %v2019_v16 }
 0x2cc   : > { %v2116_v18 = vmul.f32 %v2044_v19, %v4944_v8  ;;  %2393 = vperm.xlu0 %3337, %v2044_v19   ;;  %v2028_v54 = vsel %vm2025_vm0, %v2027_v55, %v2023_v12  ;;  %vm2645_vm0 = vcmask 1042434  }
 0x2cd   : > { %v2029_v2 = vmul.f32 %v5149_v9, %v2028_v54 }
 0x2ce   : > { %v2198_v36 = vsel %vm1592_vm12, %v2116_v18, 0.0  ;;  %v2443_v18 = vpop.permute.xlu0 %2442 }
 0x2cf   : > { %v2199_v30 = vrot.slane %v2198_v36, 4  ;;  %v2115_v53 = vmul.f32 %v2029_v2, %v4738_v22  ;;  %2388 = vperm.xlu1 %3335, %v2029_v2   ;;  %v2112_v2 = vmul.f32 %v5144_v58, %v4532_v56 }
 0x2d1   : > { %v2191_v0 = vsel %vm1592_vm12, %v2115_v53, 0.0  ;;  %v2200_v57 = vadd.f32 %v2199_v30, %v2198_v36 }
 0x2d2   : > { %v2192_v20 = vrot.slane %v2191_v0, 4  ;;  %v1573_v40 = vpop.xlane.xlu2 %1572 }
 0x2d3   : > { %v1590_v6 = vadd.f32 %v5045_v5, %v1573_v40  ;;  %v2201_v8 = vrot.slane %v2200_v57, 2 }
 0x2d4   : > { %v2193_v44 = vadd.f32 %v2192_v20, %v2191_v0  ;;  %v2170_v0 = vsel %vm1592_vm12, %v2112_v2, 0.0 }
 0x2d5   : > { %v1691_v38 = vsel %vm1592_vm12, %v1590_v6, -inf  ;;  %v2202_v9 = vadd.f32 %v2201_v8, %v2200_v57  ;;  %v2171_v8 = vrot.slane %v2170_v0, 4 }
 0x2d6   : > { %v1692_v29 = vrot.slane %v1691_v38, 4  ;;  %v2194_v7 = vrot.slane %v2193_v44, 2 }
 0x2d7   : > { %v1571_v11 = vpop.xlane.xlu1 %1570  ;;  %v2203_v10 = vrot.slane %v2202_v9, 1 }
 0x2d8   : > { %v1693_v25 = vmax.f32 %v1691_v38, %v1692_v29  ;;  %v1589_v22 = vadd.f32 %v5045_v5, %v1571_v11  ;;  %v2195_v41 = vadd.f32 %v2194_v7, %v2193_v44  ;;  %v2364_v44 = vpop.permute.xlu0 %2363  ;;  %v2172_v11 = vadd.f32 %v2171_v8, %v2170_v0 }
 0x2d9   : > { %v2204_v35 = vadd.f32 %v2203_v10, %v2202_v9 }
 0x2da   : > { %v1694_v63 = vrot.slane %v1693_v25, 2  ;;  %v1684_v4 = vsel %vm1592_vm12, %v1589_v22, -inf  ;;  %v5172_v49 = vpop.permute.xlu2 %2305  ;;  %v2196_v47 = vrot.slane %v2195_v41, 1  ;;  %v2173_v50 = vrot.slane %v2172_v11, 2 }
 0x2db   : > { %v1685_v23 = vrot.slane %v1684_v4, 4  ;;  %2492 = vperm.xlu0 %3337, %v2204_v35  }
 0x2dc   : > { %v1695_v31 = vmax.f32 %v1693_v25, %v1694_v63  ;;  %v2197_v51 = vadd.f32 %v2196_v47, %v2195_v41 }
 0x2dd   : > { %v1686_v28 = vmax.f32 %v1684_v4, %v1685_v23 }
 0x2de   : > { %v1696_v43 = vrot.slane %v1695_v31, 1  ;;  %2487 = vperm.xlu1 %3335, %v2197_v51  }
 0x2df   : > { %v1687_v61 = vrot.slane %v1686_v28, 2 }
 0x2e0   : > { %v1697_v46 = vmax.f32 %v1695_v31, %v1696_v43  ;;  %v5204_v23 = vpop.permute.xlu0 %2457  ;;  %v2319_v43 = vsel %vm5127_vm2, %v4539_v45, 0.0  ;;  %v2318_v45 = vsel %vm5127_vm2, %v4564_v27, 0.0 }
 0x2e1   : > { %v1688_v32 = vmax.f32 %v1686_v28, %v1687_v61  ;;  %v2174_v28 = vadd.f32 %v2173_v50, %v2172_v11  ;;  %v2120_v61 = vmul.f32 %v5155_v17, %v4675_v37  ;;  %v2323_v37 = vsel %vm5127_vm2, %v4778_v15, 0.0 }
 0x2e2   : > { %v1719_v14 = vsub.f32 %v1590_v6, %v1697_v46  ;;  %v5174_v5 = vpop.permute.xlu2 %2338  ;;  %v2327_v17 = vsel %vm5127_vm2, %v4771_v1, 0.0 }
 0x2e3   : > { %v1689_v16 = vrot.slane %v1688_v32, 1  ;;  %v5228_v2 = vsel %vm1592_vm12, %v2120_v61, 0.0 }
 0x2e4   : > { %v1749_v19 = vmul.f32 1.442695, %v1719_v14 }
 0x2e5   : > { %v1690_v55 = vmax.f32 %v1688_v32, %v1689_v16 }
 0x2e6   : > { %3490 = vpow2.f32 %v1749_v19 }
 0x2e7   : > { %v1718_v12 = vsub.f32 %v1589_v22, %v1690_v55  ;;  %v2175_v55 = vrot.slane %v2174_v28, 1 }
 0x2e9   : > { %v1747_v54 = vmul.f32 1.442695, %v1718_v12 }
 0x2ea   : > { %v5178_v36 = vpop.permute.xlu2 %2353 }
 0x2eb   : > { %3492 = vpow2.f32 %v1747_v54 }
 0x2ec   : > { %v5180_v30 = vpop.eup %3490 }
 0x2ed   : > { %v1851_v53 = vsel %vm1592_vm12, %v5180_v30, 0.0 }
 0x2ee   : > { %v1852_v57 = vrot.slane %v1851_v53, 4 }
 0x2ef   : > { %v5185_v20 = vpop.permute.xlu1 %2295 }
 0x2f0   : > { %v1853_v40 = vadd.f32 %v1852_v57, %v1851_v53  ;;  %v2322_v53 = vsel %vm5127_vm2, %v4780_v39, 0.0 }
 0x2f1   : > { %v5187_v6 = vpop.eup %3492 }
 0x2f2   : > { %v1854_v38 = vrot.slane %v1853_v40, 2  ;;  %v1844_v56 = vsel %vm1592_vm12, %v5187_v6, 0.0  ;;  %v2448_v58 = vpop.permute.xlu2 %2447 }
 0x2f3   : > { %v1845_v9 = vrot.slane %v1844_v56, 4  ;;  %v2517_v4 = vsel %vm5193_vm5, %v2448_v58, %v5139_v52  ;;  %v2326_v58 = vsel %vm5127_vm2, %v5164_v60, 0.0 }
 0x2f4   : > { %v1855_v29 = vadd.f32 %v1854_v38, %v1853_v40  ;;  %v2543_v31 = vrot.slane %v2517_v4, 4 }
 0x2f5   : > { %v1846_v7 = vadd.f32 %v1845_v9, %v1844_v56  ;;  %v5233_v56 = vadd.f32 %v2175_v55, %v2174_v28  ;;  %v2421_v9 = vsel %vm5118_vm1, %v2364_v44, %v2323_v37 }
 0x2f6   : > { %v1856_v10 = vrot.slane %v1855_v29, 1  ;;  %v2544_v32 = vadd.f32 %v2543_v31, %v2517_v4 }
 0x2f7   : > { %v1847_v22 = vrot.slane %v1846_v7, 2  ;;  %v5197_v41 = vpop.permute.xlu1 %2310 }
 0x2f8   : > { %v1857_v35 = vadd.f32 %v1856_v10, %v1855_v29  ;;  %v2545_v0 = vrot.slane %v2544_v32, 2  ;;  %v2227_v29 = vrot.slane %v5228_v2, 4 }
 0x2f9   : > { %v1848_v63 = vadd.f32 %v1847_v22, %v1846_v7  ;;  %v2416_v7 = vsel %vm5118_vm1, %v5174_v5, %v2318_v45 }
 0x2fa   : > { %3494 = vrcp.f32 %v1857_v35  ;;  %v5202_v24 = vpop.permute.xlu2 %2368  ;;  %v2086_v40 = vand.u32 2147483648, %v1857_v35  ;;  %v2084_v15 = vand.u32 2147483647, %v1857_v35  ;;  %vm2080_vm7 = vweird.f32 %v1857_v35 }
 0x2fb   : > { %v1849_v47 = vrot.slane %v1848_v63, 1 }
 0x2fc   : > { %v2087_v60 = vor.u32 1.1754944e-38, %v2086_v40  ;;  %vm2085_vm9 = vcmp.eq.f32.partialorder %v2084_v15, 8.507059e+37 }
 0x2fd   : > { %v5206_v51 = vadd.f32 %v1849_v47, %v1848_v63  ;;  %v2379_v27 = vpop.permute.xlu0 %2378  ;;  %v2546_v63 = vadd.f32 %v2545_v0, %v2544_v32 }
 0x2ff   : > { %3496 = vrcp.f32 %v5206_v51  ;;  %v2344_v52 = vpop.permute.xlu1 %2343  ;;  %v2071_v31 = vand.u32 2147483648, %v5206_v51  ;;  %v2069_v5 = vand.u32 2147483647, %v5206_v51  ;;  %vm2065_vm13 = vweird.f32 %v5206_v51 }
 0x300   : > { %v3495_v46 = vpop.eup %3494  ;;  %v2417_v14 = vsel %vm5118_vm1, %v2344_v52, %v2319_v43 }
 0x301   : > { %v2516_v16 = vsel %vm5193_vm5, %v2443_v18, %v2417_v14  ;;  %v2076_v19 = vmul.f32 %v3495_v46, %v1857_v35  ;;  %vm2081_vm6 = vweird.f32 %v3495_v46  ;;  %v2547_v14 = vrot.slane %v2546_v63, 1 }
 0x302   : > { %v2537_v12 = vrot.slane %v2516_v16, 4  ;;  %v2463_v54 = vpop.permute.xlu2 %2462  ;;  %vm2082_vm8 = vmor %vm2080_vm7, %vm2081_vm6  ;;  %v2072_v37 = vor.u32 1.1754944e-38, %v2071_v31  ;;  %vm2070_vm15 = vcmp.eq.f32.partialorder %v2069_v5, 8.507059e+37 }
 0x303   : > { %v2077_v18 = vsub.f32 1.0, %v2076_v19  ;;  %v2548_v1 = vadd.f32 %v2547_v14, %v2546_v63 }
 0x304   : > { %v2538_v57 = vadd.f32 %v2537_v12, %v2516_v16  ;;  %v2424_v16 = vsel %vm5118_vm1, %v2379_v27, %v2326_v58 }
 0x305   : > { %v3497_v8 = vpop.eup %3496  ;;  %v2078_v38 = vmul.f32 %v3495_v46, %v2077_v18 }
 0x306   : > { %v2061_v39 = vmul.f32 %v3497_v8, %v5206_v51  ;;  %v2539_v11 = vrot.slane %v2538_v57, 2  ;;  %vm2066_vm10 = vweird.f32 %v3497_v8 }
 0x307   : > { %v2438_v10 = vpop.permute.xlu1 %2437  ;;  %v2079_v22 = vadd.f32 %v3495_v46, %v2078_v38  ;;  %vm2067_vm14 = vmor %vm2065_vm13, %vm2066_vm10 }
 0x308   : > { %v2515_v4 = vsel %vm5193_vm5, %v2438_v10, %v2416_v7  ;;  %v2062_v50 = vsub.f32 1.0, %v2061_v39  ;;  %v2540_v52 = vadd.f32 %v2539_v11, %v2538_v57 }
 0x309   : > { %v2531_v44 = vrot.slane %v2515_v4, 4  ;;  %v2083_v47 = vsel %vm2082_vm8, %v3495_v46, %v2079_v22 }
 0x30a   : > { %v2384_v28 = vpop.permute.xlu2 %2383  ;;  %v2088_v43 = vsel %vm2085_vm9, %v2087_v60, %v2083_v47  ;;  %v2063_v61 = vmul.f32 %v3497_v8, %v2062_v50  ;;  %v2541_v27 = vrot.slane %v2540_v52, 1 }
 0x30b   : > { %v2532_v35 = vadd.f32 %v2531_v44, %v2515_v4  ;;  %v2089_v32 = vmul.f32 %v5180_v30, %v2088_v43  ;;  %v2520_v30 = vsel %vm5193_vm5, %v2463_v54, %v2421_v9  ;;  %v2425_v54 = vsel %vm5118_vm1, %v2384_v28, %v2327_v17 }
 0x30c   : > { %v2478_v19 = vpop.permute.xlu0 %2477  ;;  %v2064_v46 = vadd.f32 %v3497_v8, %v2063_v61  ;;  %v2561_v7 = vrot.slane %v2520_v30, 4  ;;  %v2542_v4 = vadd.f32 %v2541_v27, %v2540_v52  ;;  %v2321_v43 = vsel %vm5127_vm2, %v4759_v13, 0.0 }
 0x30d   : > { %v2533_v55 = vrot.slane %v2532_v35, 2  ;;  %v2523_v45 = vsel %vm5193_vm5, %v2478_v19, %v2424_v16  ;;  %v2119_v12 = vmul.f32 %v2089_v32, %v5000_v33  ;;  %2408 = vperm.xlu0 %3337, %v2089_v32   ;;  %v2419_v63 = vsel %vm5118_vm1, %v5178_v36, %v2321_v43 }
 0x30e   : > { %v2579_v18 = vrot.slane %v2523_v45, 4  ;;  %v2068_v0 = vsel %vm2067_vm14, %v3497_v8, %v2064_v46  ;;  %v2562_v31 = vadd.f32 %v2561_v7, %v2520_v30 }
 0x30f   : > { %v2534_v57 = vadd.f32 %v2533_v55, %v2532_v35  ;;  %v2219_v51 = vsel %vm1592_vm12, %v2119_v12, 0.0  ;;  %v2359_v40 = vpop.permute.xlu1 %2358  ;;  %v2073_v38 = vsel %vm2070_vm15, %v2072_v37, %v2068_v0 }
 0x310   : > { %v2580_v15 = vadd.f32 %v2579_v18, %v2523_v45  ;;  %v2220_v58 = vrot.slane %v2219_v51, 4  ;;  %v2420_v33 = vsel %vm5118_vm1, %v2359_v40, %v2322_v53  ;;  %v2074_v39 = vmul.f32 %v5187_v6, %v2073_v38 }
 0x311   : > { %v2535_v11 = vrot.slane %v2534_v57, 1  ;;  %v2519_v8 = vsel %vm5193_vm5, %v5204_v23, %v2420_v33  ;;  %v2563_v46 = vrot.slane %v2562_v31, 2 }
 0x312   : > { %v2581_v9 = vrot.slane %v2580_v15, 2  ;;  %v2555_v10 = vrot.slane %v2519_v8, 4  ;;  %v2483_v22 = vpop.permute.xlu2 %2482  ;;  %v2118_v53 = vmul.f32 %v2074_v39, %v4931_v42  ;;  %2403 = vperm.xlu1 %3335, %v2074_v39   ;;  %v2221_v6 = vadd.f32 %v2220_v58, %v2219_v51 }
 0x313   : > { %v2536_v60 = vadd.f32 %v2535_v11, %v2534_v57  ;;  %v2524_v50 = vsel %vm5193_vm5, %v2483_v22, %v2425_v54  ;;  %v2564_v40 = vadd.f32 %v2563_v46, %v2562_v31 }
 0x314   : > { %v2556_v44 = vadd.f32 %v2555_v10, %v2519_v8  ;;  %v2585_v17 = vrot.slane %v2524_v50, 4  ;;  %v2212_v47 = vsel %vm1592_vm12, %v2118_v53, 0.0  ;;  %v2222_v42 = vrot.slane %v2221_v6, 2 }
 0x315   : > { %v2644_v23 = vsel %vm2643_vm11, %v2542_v4, %v2536_v60  ;;  %v2213_v28 = vrot.slane %v2212_v47, 4  ;;  %2472 = vperm.xlu0 %3337, %v5233_v56   ;;  %v2582_v61 = vadd.f32 %v2581_v9, %v2580_v15  ;;  %v2228_v56 = vadd.f32 %v2227_v29, %v5228_v2 }
 0x316   : > { %v2586_v5 = vadd.f32 %v2585_v17, %v2524_v50  ;;  %v2646_v52 = vsel %vm2645_vm0, %v2548_v1, %v2644_v23  ;;  %v2223_v32 = vadd.f32 %v2222_v42, %v2221_v6  ;;  %v2557_v16 = vrot.slane %v2556_v44, 2 }
 0x317   : > { %v2453_v35 = vpop.permute.xlu1 %2452  ;;  %v2214_v14 = vadd.f32 %v2213_v28, %v2212_v47  ;;  %v2583_v37 = vrot.slane %v2582_v61, 1  ;;  %v2229_v27 = vrot.slane %v2228_v56, 2  ;;  %v2565_v8 = vrot.slane %v2564_v40, 1 }
 0x318   : > { %v2587_v19 = vrot.slane %v2586_v5, 2  ;;  %v2518_v13 = vsel %vm5193_vm5, %v2453_v35, %v2419_v63  ;;  %v2224_v45 = vrot.slane %v2223_v32, 1  ;;  %v2558_v57 = vadd.f32 %v2557_v16, %v2556_v44 }
 0x319   : > { %v2549_v55 = vrot.slane %v2518_v13, 4  ;;  %v2215_v12 = vrot.slane %v2214_v14, 2  ;;  %v2584_v29 = vadd.f32 %v2583_v37, %v2582_v61  ;;  %v2230_v7 = vadd.f32 %v2229_v27, %v2228_v56 }
 0x31a   : > { %v2588_v30 = vadd.f32 %v2587_v19, %v2586_v5  ;;  %v2225_v36 = vadd.f32 %v2224_v45, %v2223_v32  ;;  %v2559_v11 = vrot.slane %v2558_v57, 1  ;;  %vm2647_vm12 = vcmask 1043459  }
 0x31b   : > { %v2550_v18 = vadd.f32 %v2549_v55, %v2518_v13  ;;  %v2216_v0 = vadd.f32 %v2215_v12, %v2214_v14  ;;  %v2231_v22 = vrot.slane %v2230_v7, 1  ;;  %v2566_v6 = vadd.f32 %v2565_v8, %v2564_v40 }
 0x31c   : > { %v2589_v51 = vrot.slane %v2588_v30, 1  ;;  %2507 = vperm.xlu2 %3336, %v2225_v36   ;;  %v2560_v53 = vadd.f32 %v2559_v11, %v2558_v57  ;;  %v2324_v60 = vsel %vm5127_vm2, %v5038_v34, 0.0 }
 0x31d   : > { %v2551_v38 = vrot.slane %v2550_v18, 2  ;;  %v2217_v2 = vrot.slane %v2216_v0, 1  ;;  %v2422_v1 = vsel %vm5118_vm1, %v5202_v24, %v2324_v60  ;;  %v2232_v47 = vadd.f32 %v2231_v22, %v2230_v7 }
 0x31e   : > { %v2590_v15 = vadd.f32 %v2589_v51, %v2588_v30 }
 0x31f   : > { %v2552_v58 = vadd.f32 %v2551_v38, %v2550_v18  ;;  %v5290_v33 = vpop.permute.xlu1 %2373  ;;  %v2218_v39 = vadd.f32 %v2217_v2, %v2216_v0 }
 0x320   : > { %v5293_v54 = vsel %vm2643_vm11, %v2590_v15, %v2584_v29 }
 0x321   : > { %v2553_v9 = vrot.slane %v2552_v58, 1  ;;  %2502 = vperm.xlu1 %3335, %v2218_v39  }
 0x323   : > { %v2554_v10 = vadd.f32 %v2553_v9, %v2552_v58 }
 0x325   : > { %v2648_v4 = vsel %vm2647_vm12, %v2554_v10, %v2646_v52 }
 0x326   : > { %v2650_v50 = vsel %vm2649_vm3, %v2560_v53, %v2648_v4 }
 0x327   : > { %v2652_v44 = vsel %vm2651_vm4, %v2566_v6, %v2650_v50  ;;  %v2468_v17 = vpop.permute.xlu1 %2467 }
 0x328   : > { %v2521_v31 = vsel %vm5193_vm5, %v2468_v17, %v2422_v1 }
 0x329   : > { %v2567_v23 = vrot.slane %v2521_v31, 4  ;;  %2512 = vperm.xlu1 %3335, %v2232_v47  }
 0x32b   : > { %v2568_v34 = vadd.f32 %v2567_v23, %v2521_v31 }
 0x32d   : > { %v2569_v24 = vrot.slane %v2568_v34, 2 }
 0x32e   : > { %3527 = shalt.err (!%p3524_p3)
}
 0x32f   : > { %s3565_s28 = smov 128   ;;  %s3566_s9 = smov 8   ;;  %v2570_v28 = vadd.f32 %v2569_v24, %v2568_v34  ;;  %vm2653_vm6 = vcmask 1046534   ;;  %v2399_v5 = vpop.permute.xlu2 %2398  ;;  %v2330_v63 = vsel %vm5127_vm2, %v4998_v62, 0.0  ;;  %v2329_v19 = vsel %vm5127_vm2, %v5185_v20, 0.0 }
 0x330   : > { %3293 = dma.vmem_to_hbm [thread:$0]  (%p3630_p5), %s2687_s12, 2048, %s2689_s22, %s2669_s23, %s3565_s28, %s3565_s28, %s3566_s9   ;;  %v2428_v32 = vsel %vm5118_vm1, %v2399_v5, %v2330_v63  ;;  %v2328_v45 = vsel %vm5127_vm2, %v5158_v59, 0.0  ;;  %v2332_v53 = vsel %vm5127_vm2, %v5197_v41, 0.0  ;;  %v2325_v6 = vsel %vm5127_vm2, %v5026_v3, 0.0 }
 0x331   : > { %v2571_v42 = vrot.slane %v2570_v28, 1  ;;  %s2788_s25 = sshll.u32 %s3613_s19, 1  ;;  %vm2655_vm7 = vcmask 1047559  }
 0x332   : > { %p211_p4 = scmp.lt.s32.totalorder %s2788_s25, 7 }
 0x333   : > { %v2572_v43 = vadd.f32 %v2571_v42, %v2570_v28 }
 0x334   : > { %s5468_s25 = smov (!%p211_p4, %s2788_s25), 7 }
 0x335   : > { %v5324_v61 = vsel %vm2653_vm6, %v2572_v43, %v2652_v44  ;;  %s2789_s19 = sshll.u32 %s5468_s25, 3 }
 0x336   : > { %s214_s12 = scalar_lea.vmem %s5410_s4, %s2789_s19 }
 0x337   : > { %v2498_v52 = vpop.permute.xlu2 %2497 }
 0x338   : > { %v2527_v14 = vsel %vm5193_vm5, %v2498_v52, %v2428_v32 }
 0x339   : > { %v2603_v16 = vrot.slane %v2527_v14, 4 }
 0x33b   : > { %v2604_v55 = vadd.f32 %v2603_v16, %v2527_v14 }
 0x33d   : > { %v2605_v36 = vrot.slane %v2604_v55, 2 }
 0x33e   : > { %v2394_v35 = vpop.permute.xlu0 %2393 }
 0x33f   : > { %v2427_v13 = vsel %vm5118_vm1, %v2394_v35, %v2329_v19  ;;  %v2606_v40 = vadd.f32 %v2605_v36, %v2604_v55  ;;  %v2414_v22 = vpop.permute.xlu2 %2413 }
 0x341   : > { %v2389_v56 = vpop.permute.xlu1 %2388  ;;  %v2607_v59 = vrot.slane %v2606_v40, 1 }
 0x342   : > { %v2426_v37 = vsel %vm5118_vm1, %v2389_v56, %v2328_v45  ;;  %v2333_v56 = vsel %vm5127_vm2, %v5096_v26, 0.0 }
 0x343   : > { %v2608_v7 = vadd.f32 %v2607_v59, %v2606_v40  ;;  %v2431_v16 = vsel %vm5118_vm1, %v2414_v22, %v2333_v56 }
 0x34d   : > { %v2493_v46 = vpop.permute.xlu0 %2492 }
 0x34e   : > { %v2526_v62 = vsel %vm5193_vm5, %v2493_v46, %v2427_v13 }
 0x34f   : > { %v2597_v12 = vrot.slane %v2526_v62, 4 }
 0x350   : > { %v2488_v30 = vpop.permute.xlu1 %2487 }
 0x351   : > { %v2598_v18 = vadd.f32 %v2597_v12, %v2526_v62  ;;  %v2525_v20 = vsel %vm5193_vm5, %v2488_v30, %v2426_v37 }
 0x352   : > { %v2591_v0 = vrot.slane %v2525_v20, 4 }
 0x353   : > { %v2599_v27 = vrot.slane %v2598_v18, 2 }
 0x354   : > { %v2592_v57 = vadd.f32 %v2591_v0, %v2525_v20 }
 0x355   : > { %v2600_v51 = vadd.f32 %v2599_v27, %v2598_v18 }
 0x356   : > { %v2593_v38 = vrot.slane %v2592_v57, 2 }
 0x357   : > { %v2601_v29 = vrot.slane %v2600_v51, 1 }
 0x358   : > { %v2594_v2 = vadd.f32 %v2593_v38, %v2592_v57 }
 0x359   : > { %v2602_v39 = vadd.f32 %v2601_v29, %v2600_v51 }
 0x35a   : > { %v2595_v15 = vrot.slane %v2594_v2, 1 }
 0x35c   : > { %v2596_v58 = vadd.f32 %v2595_v15, %v2594_v2 }
 0x35e   : > { %v2658_v11 = vsel %vm2645_vm0, %v2596_v58, %v5293_v54  ;;  %v2423_v54 = vsel %vm5118_vm1, %v5290_v33, %v2325_v6  ;;  %v2331_v33 = vsel %vm5127_vm2, %v5172_v49, 0.0 }
 0x35f   : > { %v2659_v8 = vsel %vm2647_vm12, %v2602_v39, %v2658_v11 }
 0x360   : > { %v2660_v9 = vsel %vm2649_vm3, %v2608_v7, %v2659_v8 }
 0x376   : > { %v2508_v50 = vpop.permute.xlu2 %2507 }
 0x37f   : > { %v2409_v10 = vpop.permute.xlu0 %2408 }
 0x380   : > { %v2430_v4 = vsel %vm5118_vm1, %v2409_v10, %v2332_v53 }
 0x381   : > { %v2529_v41 = vsel %vm5193_vm5, %v2508_v50, %v2430_v4 }
 0x382   : > { %v2615_v3 = vrot.slane %v2529_v41, 4 }
 0x384   : > { %v2404_v17 = vpop.permute.xlu1 %2403  ;;  %v2616_v34 = vadd.f32 %v2615_v3, %v2529_v41 }
 0x385   : > { %v2429_v28 = vsel %vm5118_vm1, %v2404_v17, %v2331_v33 }
 0x386   : > { %v2617_v5 = vrot.slane %v2616_v34, 2 }
 0x387   : > { %v2473_v60 = vpop.permute.xlu0 %2472 }
 0x388   : > { %v2522_v1 = vsel %vm5193_vm5, %v2473_v60, %v2423_v54  ;;  %v2618_v32 = vadd.f32 %v2617_v5, %v2616_v34 }
 0x389   : > { %v2573_v44 = vrot.slane %v2522_v1, 4 }
 0x38a   : > { %v2619_v46 = vrot.slane %v2618_v32, 1 }
 0x38b   : > { %v2574_v47 = vadd.f32 %v2573_v44, %v2522_v1 }
 0x38c   : > { %v2620_v37 = vadd.f32 %v2619_v46, %v2618_v32 }
 0x38d   : > { %v2575_v31 = vrot.slane %v2574_v47, 2 }
 0x38f   : > { %v2576_v23 = vadd.f32 %v2575_v31, %v2574_v47 }
 0x391   : > { %v2577_v24 = vrot.slane %v2576_v23, 1 }
 0x393   : > { %v2578_v42 = vadd.f32 %v2577_v24, %v2576_v23  ;;  %v2503_v43 = vpop.permute.xlu1 %2502 }
 0x394   : > { %v2528_v52 = vsel %vm5193_vm5, %v2503_v43, %v2429_v28 }
 0x395   : > { %v2656_v63 = vsel %vm2655_vm7, %v2578_v42, %v5324_v61  ;;  %v2609_v35 = vrot.slane %v2528_v52, 4 }
 0x396   : > { %2666 = vst [vmem:[%s214_s12] sm:$0xff] %v2656_v63 }
 0x397   : > { %v2610_v49 = vadd.f32 %v2609_v35, %v2528_v52 }
 0x399   : > { %v2611_v14 = vrot.slane %v2610_v49, 2 }
 0x39b   : > { %v2612_v19 = vadd.f32 %v2611_v14, %v2610_v49  ;;  %v2513_v13 = vpop.permute.xlu1 %2512 }
 0x39c   : > { %v2530_v55 = vsel %vm5193_vm5, %v2513_v13, %v2431_v16 }
 0x39d   : > { %v2613_v62 = vrot.slane %v2612_v19, 1  ;;  %v2621_v61 = vrot.slane %v2530_v55, 4 }
 0x39f   : > { %v2614_v45 = vadd.f32 %v2613_v62, %v2612_v19  ;;  %v2622_v12 = vadd.f32 %v2621_v61, %v2530_v55 }
 0x3a1   : > { %v2661_v30 = vsel %vm2651_vm4, %v2614_v45, %v2660_v9  ;;  %v2623_v18 = vrot.slane %v2622_v12, 2 }
 0x3a2   : > { %v2662_v21 = vsel %vm2653_vm6, %v2620_v37, %v2661_v30 }
 0x3a3   : > { %v2624_v26 = vadd.f32 %v2623_v18, %v2622_v12 }
 0x3a5   : > { %v2625_v20 = vrot.slane %v2624_v26, 1 }
 0x3a7   : > { %v2626_v48 = vadd.f32 %v2625_v20, %v2624_v26 }
 0x3a9   : > { %v2663_v36 = vsel %vm2655_vm7, %v2626_v48, %v2662_v21 }
 0x3aa   : > { %2667 = vst [vmem:[%s214_s12 + $0x8] sm:$0xff] %v2663_v36 }
 0x3ab PF: > { %p3299_p5 = scmp.ge.s32.totalorder %s3562_s18, 2  ;;  %s2707_s13 = sand.u32 1, %s3550_s15  }
 0x3ac   : > { %s2708_s14 = scalar_lea.sflag [#allocation3], %s2707_s13 }
 0x3ad   : > { %p3296_p7 = pnand %p3299_p5, %p3634_p6 }
 0x3af   : > { %p3297_p8 = pneg %p3296_p7 }
 0x3b1   : > { %3545 = dma.done.wait (%p3297_p8), %s2708_s14, 2048  }
 0x3b2   : > { %3547 = vsyncadd (%p3297_p8), %s2708_s14, 4294965248  ;;  %p15_p9 = scmp.ge.s32.totalorder %s3617_s21, 6   ;;  %s5461_s15 = smov %s3554_s16 }
 0x3b3   : > { %s5462_s16 = smov %s3558_s17  ;;  %s5463_s17 = smov %s3628_s24 }
 0x3b4   : > { %s5464_s18 = smov %s3617_s21  ;;  %17 = sbr.rel (!%p15_p9) target bundleno = 3 (0x3), region = 79 }
 0x3b9   :  { %2722 = vsyncpa [#allocation3], 1 }
 0x3ba   :  { %2724 = vsyncpa [#allocation3 + $0x1], 1 }

</bundles_post_ra>
